<compile_context>
chip_gen: v5e
topology: v5e:2x2
jax: 0.10.0
libtpu: 0.0.40
codegen_flags: <defaults>
</compile_context>

<pallas_src>
import functools

import numpy as np
import jax
import jax.numpy as jnp
from jax.experimental import pallas as pl
from jax.experimental.pallas import tpu as pltpu


FC1_TILE_K = 5632  # 45056 / 8 -> 8 pipelined K steps, ~2.9 MiB f32 weight block


# ----------------------------------------------------------------------------
# Fused conv(5x5, VALID) + bias + ReLU + maxpool(2x2) Pallas kernel (MXU-based)
# ----------------------------------------------------------------------------
def _conv_relu_pool_kernel(a_ref, w_ref, b_ref, o_ref, *, KH, H, Hp):
    # a_ref : (1, 2*H, KC, Wp)  tap planes, parity-major along dim 1
    #         a[0, p*H + h, kw*Cin + c, j] = x[h, c, 2j + p + kw]
    # w_ref : (KH, Cout, KC)    w_ref[kh][co, kw*Cin + c] = w[co, c, kh, kw]
    # b_ref : (Cout, 1)
    # o_ref : (1, Hp, Cout, Wp) pooled output for this batch element
    bias = b_ref[...]                                    # hoisted out of row loop

    @pl.loop(0, Hp)
    def _row(hp):
        acc = []
        for p in range(2):                               # output-column parity
            # 6 distinct input rows cover all (dr, kh) pairs for this pooled row
            rows = [a_ref[0, p * H + 2 * hp + q] for q in range(KH + 1)]
            for dr in range(2):                          # pre-pool row offset
                s = None
                for kh in range(KH):
                    d = jnp.dot(w_ref[kh], rows[dr + kh],
                                preferred_element_type=jnp.float32)
                    s = d if s is None else s + d
                acc.append(s)                            # (Cout, Wp)
        z = jnp.maximum(jnp.maximum(acc[0], acc[1]),
                        jnp.maximum(acc[2], acc[3])) + bias
        o_ref[0, hp] = jnp.maximum(z, 0.0)


def build_tap_planes(xt, KW):
    """xt: (B, H, C, W) -> (B, 2*H, KW*C, Wp) with
       out[b, p*H + h, kw*C + c, j] = xt[b, h, c, 2*j + p + kw]."""
    B, H, C, W = xt.shape
    Wp = (W - KW + 1) // 2
    planes = []
    for p in range(2):
        taps = [xt[:, :, :, p + kw: p + kw + 2 * Wp: 2] for kw in range(KW)]
        planes.append(jnp.stack(taps, axis=2).reshape(B, H, KW * C, Wp))
    return jnp.concatenate(planes, axis=1)


def conv_relu_pool(a, wt, b):
    """a: (B, 2H, KC, Wp) tap planes; wt: (KH, Cout, KC); b: (Cout,)."""
    B, twoH, KC, Wp = a.shape
    KH, Cout, KC2 = wt.shape
    assert KC == KC2
    H = twoH // 2
    assert (H - KH + 1) % 2 == 0
    Hp = (H - KH + 1) // 2

    kernel = functools.partial(_conv_relu_pool_kernel, KH=KH, H=H, Hp=Hp)
    return pl.pallas_call(
        kernel,
        out_shape=jax.ShapeDtypeStruct((B, Hp, Cout, Wp), jnp.float32),
        grid_spec=pltpu.PrefetchScalarGridSpec(
            num_scalar_prefetch=0,
            grid=(B,),
            in_specs=[pl.BlockSpec((1, twoH, KC, Wp), lambda i: (i, 0, 0, 0)),
                      pl.BlockSpec((KH, Cout, KC), lambda i: (0, 0, 0)),
                      pl.BlockSpec((Cout, 1), lambda i: (0, 0))],
            out_specs=pl.BlockSpec((1, Hp, Cout, Wp), lambda i: (i, 0, 0, 0))),
        compiler_params=pltpu.CompilerParams(
            dimension_semantics=("parallel",)),
    )(a, wt, b.reshape(Cout, 1))


# ----------------------------------------------------------------------------
# Fused fc1 (K-tiled) + ReLU + fc2 + ReLU + fc3 Pallas kernel
# ----------------------------------------------------------------------------
def _fc_fused_kernel(x_ref, w1_ref, b1_ref, w2_ref, b2_ref, w3_ref, b3_ref,
                     o_ref, acc_ref):
    k = pl.program_id(0)

    @pl.when(k == 0)
    def _init():
        acc_ref[...] = jnp.zeros_like(acc_ref)

    acc_ref[...] += jnp.dot(x_ref[...], w1_ref[...],
                            preferred_element_type=jnp.float32)

    @pl.when(k == pl.num_programs(0) - 1)
    def _finish():
        h1 = jnp.maximum(acc_ref[...] + b1_ref[...], 0.0)
        h2 = jnp.maximum(jnp.dot(h1, w2_ref[...],
                                 preferred_element_type=jnp.float32)
                         + b2_ref[...], 0.0)
        o_ref[...] = (jnp.dot(h2, w3_ref[...],
                              preferred_element_type=jnp.float32)
                      + b3_ref[...]).astype(o_ref.dtype)


def fc_fused(x, w1, b1, w2, b2, w3, b3, *, tile_k=FC1_TILE_K):
    """x: (B, Kp); w1: (Kp, N); w2, w3: (N, N); biases: (1, N).  All pre-padded."""
    B, Kp = x.shape
    Kw, N = w1.shape
    assert Kp == Kw and Kp % tile_k == 0
    steps = Kp // tile_k

    return pl.pallas_call(
        _fc_fused_kernel,
        out_shape=jax.ShapeDtypeStruct((B, N), jnp.float32),
        grid_spec=pltpu.PrefetchScalarGridSpec(
            num_scalar_prefetch=0,
            grid=(steps,),
            in_specs=[pl.BlockSpec((B, tile_k), lambda k: (0, k)),
                      pl.BlockSpec((tile_k, N), lambda k: (k, 0)),
                      pl.BlockSpec((1, N), lambda k: (0, 0)),
                      pl.BlockSpec((N, N), lambda k: (0, 0)),
                      pl.BlockSpec((1, N), lambda k: (0, 0)),
                      pl.BlockSpec((N, N), lambda k: (0, 0)),
                      pl.BlockSpec((1, N), lambda k: (0, 0))],
            out_specs=pl.BlockSpec((B, N), lambda k: (0, 0)),
            scratch_shapes=[pltpu.VMEM((B, N), jnp.float32)]),
        compiler_params=pltpu.CompilerParams(
            dimension_semantics=("arbitrary",)),
    )(x, w1, b1, w2, b2, w3, b3)


# ----------------------------------------------------------------------------
# One-time parameter preparation (runs once, outside the jitted forward)
# ----------------------------------------------------------------------------
def _prep_conv_w(w):
    # (Cout, Cin, KH, KW) -> (KH, Cout, KW*Cin) with [kh, co, kw*Cin + c]
    Cout, Cin, KH, KW = w.shape
    return jnp.transpose(w, (2, 0, 3, 1)).reshape(KH, Cout, KW * Cin)


def prepare_params(p, *, tile_k=FC1_TILE_K):
    N1, K = p["fw1"].shape                     # (120, 44944)
    C2 = p["cw2"].shape[0]                     # 16
    S2 = int(np.sqrt(K // C2))                 # 53
    Kp = ((K + tile_k - 1) // tile_k) * tile_k # 45056

    # fc1: reorder K axis from PyTorch (C, H, W) flatten order to the kernel's
    # (H, C, W) output order, transpose to (K, N), pad K and N once.
    w1 = p["fw1"].reshape(N1, C2, S2, S2).transpose(0, 2, 1, 3).reshape(N1, K).T
    w1 = jnp.pad(w1, ((0, Kp - K), (0, 128 - N1)))

    w2t = p["fw2"].T
    w2 = jnp.pad(w2t, ((0, 128 - w2t.shape[0]), (0, 128 - w2t.shape[1])))
    w3t = p["fw3"].T
    w3 = jnp.pad(w3t, ((0, 128 - w3t.shape[0]), (0, 128 - w3t.shape[1])))

    b1 = jnp.pad(p["fb1"], (0, 128 - p["fb1"].shape[0])).reshape(1, 128)
    b2 = jnp.pad(p["fb2"], (0, 128 - p["fb2"].shape[0])).reshape(1, 128)
    b3 = jnp.pad(p["fb3"], (0, 128 - p["fb3"].shape[0])).reshape(1, 128)

    return {"cw1": _prep_conv_w(p["cw1"]), "cb1": p["cb1"],
            "cw2": _prep_conv_w(p["cw2"]), "cb2": p["cb2"],
            "fw1": w1, "fb1": b1, "fw2": w2, "fb2": b2, "fw3": w3, "fb3": b3}


# ----------------------------------------------------------------------------
# LeNet forward (Pallas) and pure-JAX reference
# ----------------------------------------------------------------------------
def lenet_forward(x, pp):
    # x: (B, 3, 224, 224) NCHW float32; pp: prepared params (arrays only)
    B = x.shape[0]
    xt = jnp.transpose(x, (0, 2, 1, 3))                   # (B, H, C, W)
    a1 = build_tap_planes(xt, KW=5)                       # (B, 448, 15, 110)
    y1 = conv_relu_pool(a1, pp["cw1"], pp["cb1"])         # (B, 110, 6, 110)
    a2 = build_tap_planes(y1, KW=5)                       # (B, 220, 30, 53)
    y2 = conv_relu_pool(a2, pp["cw2"], pp["cb2"])         # (B, 53, 16, 53)

    h = y2.reshape(B, -1)                                 # (B, 44944) in (H,C,W) order
    Kp = pp["fw1"].shape[0]
    h = jnp.pad(h, ((0, 0), (0, Kp - h.shape[1])))        # (B, 45056), tiny pad
    out = fc_fused(h, pp["fw1"], pp["fb1"], pp["fw2"], pp["fb2"],
                   pp["fw3"], pp["fb3"])                  # (B, 128)
    return out[:, :10]


def lenet_reference(x, p):
    hp = jax.lax.Precision.HIGHEST

    def conv(z, w, b):
        y = jax.lax.conv_general_dilated(
            z, w, window_strides=(1, 1), padding="VALID",
            dimension_numbers=("NCHW", "OIHW", "NCHW"), precision=hp)
        return y + b[None, :, None, None]

    def pool(z):
        return jax.lax.reduce_window(z, -jnp.inf, jax.lax.max,
                                     (1, 1, 2, 2), (1, 1, 2, 2), "VALID")

    h = pool(jax.nn.relu(conv(x, p["cw1"], p["cb1"])))
    h = pool(jax.nn.relu(conv(h, p["cw2"], p["cb2"])))
    h = h.reshape(h.shape[0], -1)
    h = jax.nn.relu(jnp.dot(h, p["fw1"].T, precision=hp) + p["fb1"])
    h = jax.nn.relu(jnp.dot(h, p["fw2"].T, precision=hp) + p["fb2"])
    return jnp.dot(h, p["fw3"].T, precision=hp) + p["fb3"]


def init_params(key):
    # deterministic synthetic init mimicking PyTorch's U(-1/sqrt(fan_in), 1/sqrt(fan_in))
    def uinit(k, shape, fan_in):
        bound = 1.0 / float(np.sqrt(fan_in))
        return jax.random.uniform(k, shape, jnp.float32, -bound, bound)

    ks = jax.random.split(key, 10)
    return {
        "cw1": uinit(ks[0], (6, 3, 5, 5), 3 * 25),
        "cb1": uinit(ks[1], (6,), 3 * 25),
        "cw2": uinit(ks[2], (16, 6, 5, 5), 6 * 25),
        "cb2": uinit(ks[3], (16,), 6 * 25),
        "fw1": uinit(ks[4], (120, 44944), 44944),
        "fb1": uinit(ks[5], (120,), 44944),
        "fw2": uinit(ks[6], (84, 120), 120),
        "fb2": uinit(ks[7], (84,), 120),
        "fw3": uinit(ks[8], (10, 84), 84),
        "fb3": uinit(ks[9], (10,), 84),
    }


if __name__ == "__main__":
    key = jax.random.PRNGKey(0)
    pkey, xkey = jax.random.split(key)
    params = init_params(pkey)
    prepped = prepare_params(params)          # one-time weight re-layout / padding
    # 224x224 is dictated by fc1 (44944 = 16*53*53); keep batch small.
    x = jax.random.normal(xkey, (2, 3, 224, 224), dtype=jnp.float32)

    out = jax.block_until_ready(jax.jit(lenet_forward)(x, prepped))
    assert out.shape == (2, 10) and out.dtype == jnp.float32

    ref = jax.block_until_ready(jax.jit(lenet_reference)(x, params))
    np.testing.assert_allclose(np.asarray(out), np.asarray(ref),
                               rtol=2e-3, atol=2e-3)
    print("KERNEL_OK")
</pallas_src>

<mosaic_0001>
module attributes {stable_mosaic.version = 11 : i64} {
  func.func @_conv_relu_pool_kernel(%arg0: i32, %arg1: memref<1x448x15x110xf32, #tpu.memory_space<vmem>>, %arg2: memref<5x6x15xf32, #tpu.memory_space<vmem>>, %arg3: memref<6x1xf32, #tpu.memory_space<vmem>>, %arg4: memref<1x110x6x110xf32, #tpu.memory_space<vmem>>) attributes {dimension_semantics = [#tpu.dimension_semantics<parallel>], iteration_bounds = array<i64: 2>, scalar_prefetch = 0 : i64, scratch_operands = 0 : i64, tpu.core_type = #tpu.core_type<tc>, window_params = [{transform_indices = @transform_0, window_bounds = array<i64: 1, 448, 15, 110>}, {pipeline_mode = #tpu.pipeline_mode<synchronous>, transform_indices = @transform_1, window_bounds = array<i64: 5, 6, 15>}, {pipeline_mode = #tpu.pipeline_mode<synchronous>, transform_indices = @transform_2, window_bounds = array<i64: 6, 1>}, {transform_indices = @transform_3, window_bounds = array<i64: 1, 110, 6, 110>}]} {
    %c0 = arith.constant 0 : index
    %c0_0 = arith.constant 0 : index
    %0 = vector.load %arg3[%c0, %c0_0] : memref<6x1xf32, #tpu.memory_space<vmem>>, vector<6x1xf32>
    %c0_i32 = arith.constant 0 : i32
    %c110_i32 = arith.constant 110 : i32
    %1 = arith.addi %c0_i32, %c110_i32 : i32
    %c1_i32 = arith.constant 1 : i32
    scf.for %arg5 = %c0_i32 to %1 step %c1_i32  : i32 {
      %c1_i32_2 = arith.constant 1 : i32
      %2 = arith.muli %arg5, %c1_i32_2 : i32
      %c0_i32_3 = arith.constant 0 : i32
      %3 = arith.addi %c0_i32_3, %2 : i32
      %c2_i32 = arith.constant 2 : i32
      %4 = arith.muli %c2_i32, %3 : i32
      %c0_i32_4 = arith.constant 0 : i32
      %5 = arith.addi %c0_i32_4, %4 : i32
      %c0_i32_5 = arith.constant 0 : i32
      %6 = arith.addi %5, %c0_i32_5 : i32
      %c0_6 = arith.constant 0 : index
      %7 = arith.index_cast %6 : i32 to index
      %c0_7 = arith.constant 0 : index
      %c0_8 = arith.constant 0 : index
      %8 = vector.load %arg1[%c0_6, %7, %c0_7, %c0_8] : memref<1x448x15x110xf32, #tpu.memory_space<vmem>>, vector<1x1x15x110xf32>
      %9 = vector.shape_cast %8 : vector<1x1x15x110xf32> to vector<15x110xf32>
      %c2_i32_9 = arith.constant 2 : i32
      %10 = arith.muli %c2_i32_9, %3 : i32
      %c0_i32_10 = arith.constant 0 : i32
      %11 = arith.addi %c0_i32_10, %10 : i32
      %c1_i32_11 = arith.constant 1 : i32
      %12 = arith.addi %11, %c1_i32_11 : i32
      %c0_12 = arith.constant 0 : index
      %13 = arith.index_cast %12 : i32 to index
      %c0_13 = arith.constant 0 : index
      %c0_14 = arith.constant 0 : index
      %14 = vector.load %arg1[%c0_12, %13, %c0_13, %c0_14] : memref<1x448x15x110xf32, #tpu.memory_space<vmem>>, vector<1x1x15x110xf32>
      %15 = vector.shape_cast %14 : vector<1x1x15x110xf32> to vector<15x110xf32>
      %c2_i32_15 = arith.constant 2 : i32
      %16 = arith.muli %c2_i32_15, %3 : i32
      %c0_i32_16 = arith.constant 0 : i32
      %17 = arith.addi %c0_i32_16, %16 : i32
      %c2_i32_17 = arith.constant 2 : i32
      %18 = arith.addi %17, %c2_i32_17 : i32
      %c0_18 = arith.constant 0 : index
      %19 = arith.index_cast %18 : i32 to index
      %c0_19 = arith.constant 0 : index
      %c0_20 = arith.constant 0 : index
      %20 = vector.load %arg1[%c0_18, %19, %c0_19, %c0_20] : memref<1x448x15x110xf32, #tpu.memory_space<vmem>>, vector<1x1x15x110xf32>
      %21 = vector.shape_cast %20 : vector<1x1x15x110xf32> to vector<15x110xf32>
      %c2_i32_21 = arith.constant 2 : i32
      %22 = arith.muli %c2_i32_21, %3 : i32
      %c0_i32_22 = arith.constant 0 : i32
      %23 = arith.addi %c0_i32_22, %22 : i32
      %c3_i32 = arith.constant 3 : i32
      %24 = arith.addi %23, %c3_i32 : i32
      %c0_23 = arith.constant 0 : index
      %25 = arith.index_cast %24 : i32 to index
      %c0_24 = arith.constant 0 : index
      %c0_25 = arith.constant 0 : index
      %26 = vector.load %arg1[%c0_23, %25, %c0_24, %c0_25] : memref<1x448x15x110xf32, #tpu.memory_space<vmem>>, vector<1x1x15x110xf32>
      %27 = vector.shape_cast %26 : vector<1x1x15x110xf32> to vector<15x110xf32>
      %c2_i32_26 = arith.constant 2 : i32
      %28 = arith.muli %c2_i32_26, %3 : i32
      %c0_i32_27 = arith.constant 0 : i32
      %29 = arith.addi %c0_i32_27, %28 : i32
      %c4_i32 = arith.constant 4 : i32
      %30 = arith.addi %29, %c4_i32 : i32
      %c0_28 = arith.constant 0 : index
      %31 = arith.index_cast %30 : i32 to index
      %c0_29 = arith.constant 0 : index
      %c0_30 = arith.constant 0 : index
      %32 = vector.load %arg1[%c0_28, %31, %c0_29, %c0_30] : memref<1x448x15x110xf32, #tpu.memory_space<vmem>>, vector<1x1x15x110xf32>
      %33 = vector.shape_cast %32 : vector<1x1x15x110xf32> to vector<15x110xf32>
      %c2_i32_31 = arith.constant 2 : i32
      %34 = arith.muli %c2_i32_31, %3 : i32
      %c0_i32_32 = arith.constant 0 : i32
      %35 = arith.addi %c0_i32_32, %34 : i32
      %c5_i32 = arith.constant 5 : i32
      %36 = arith.addi %35, %c5_i32 : i32
      %c0_33 = arith.constant 0 : index
      %37 = arith.index_cast %36 : i32 to index
      %c0_34 = arith.constant 0 : index
      %c0_35 = arith.constant 0 : index
      %38 = vector.load %arg1[%c0_33, %37, %c0_34, %c0_35] : memref<1x448x15x110xf32, #tpu.memory_space<vmem>>, vector<1x1x15x110xf32>
      %39 = vector.shape_cast %38 : vector<1x1x15x110xf32> to vector<15x110xf32>
      %c0_36 = arith.constant 0 : index
      %c0_37 = arith.constant 0 : index
      %c0_38 = arith.constant 0 : index
      %40 = vector.load %arg2[%c0_36, %c0_37, %c0_38] : memref<5x6x15xf32, #tpu.memory_space<vmem>>, vector<1x6x15xf32>
      %41 = vector.shape_cast %40 : vector<1x6x15xf32> to vector<6x15xf32>
      %cst = arith.constant dense<0.000000e+00> : vector<6x110xf32>
      %42 = tpu.matmul %41, %9, %cst {dimension_numbers = #tpu.dot_dimension_numbers<[1], [0], [0], [1], [0, 0, 1, 1], [], []>} : vector<6x15xf32>, vector<15x110xf32>, vector<6x110xf32> -> vector<6x110xf32>
      %c1 = arith.constant 1 : index
      %c0_39 = arith.constant 0 : index
      %c0_40 = arith.constant 0 : index
      %43 = vector.load %arg2[%c1, %c0_39, %c0_40] : memref<5x6x15xf32, #tpu.memory_space<vmem>>, vector<1x6x15xf32>
      %44 = vector.shape_cast %43 : vector<1x6x15xf32> to vector<6x15xf32>
      %cst_41 = arith.constant dense<0.000000e+00> : vector<6x110xf32>
      %45 = tpu.matmul %44, %15, %cst_41 {dimension_numbers = #tpu.dot_dimension_numbers<[1], [0], [0], [1], [0, 0, 1, 1], [], []>} : vector<6x15xf32>, vector<15x110xf32>, vector<6x110xf32> -> vector<6x110xf32>
      %46 = arith.addf %42, %45 : vector<6x110xf32>
      %c2 = arith.constant 2 : index
      %c0_42 = arith.constant 0 : index
      %c0_43 = arith.constant 0 : index
      %47 = vector.load %arg2[%c2, %c0_42, %c0_43] : memref<5x6x15xf32, #tpu.memory_space<vmem>>, vector<1x6x15xf32>
      %48 = vector.shape_cast %47 : vector<1x6x15xf32> to vector<6x15xf32>
      %cst_44 = arith.constant dense<0.000000e+00> : vector<6x110xf32>
      %49 = tpu.matmul %48, %21, %cst_44 {dimension_numbers = #tpu.dot_dimension_numbers<[1], [0], [0], [1], [0, 0, 1, 1], [], []>} : vector<6x15xf32>, vector<15x110xf32>, vector<6x110xf32> -> vector<6x110xf32>
      %50 = arith.addf %46, %49 : vector<6x110xf32>
      %c3 = arith.constant 3 : index
      %c0_45 = arith.constant 0 : index
      %c0_46 = arith.constant 0 : index
      %51 = vector.load %arg2[%c3, %c0_45, %c0_46] : memref<5x6x15xf32, #tpu.memory_space<vmem>>, vector<1x6x15xf32>
      %52 = vector.shape_cast %51 : vector<1x6x15xf32> to vector<6x15xf32>
      %cst_47 = arith.constant dense<0.000000e+00> : vector<6x110xf32>
      %53 = tpu.matmul %52, %27, %cst_47 {dimension_numbers = #tpu.dot_dimension_numbers<[1], [0], [0], [1], [0, 0, 1, 1], [], []>} : vector<6x15xf32>, vector<15x110xf32>, vector<6x110xf32> -> vector<6x110xf32>
      %54 = arith.addf %50, %53 : vector<6x110xf32>
      %c4 = arith.constant 4 : index
      %c0_48 = arith.constant 0 : index
      %c0_49 = arith.constant 0 : index
      %55 = vector.load %arg2[%c4, %c0_48, %c0_49] : memref<5x6x15xf32, #tpu.memory_space<vmem>>, vector<1x6x15xf32>
      %56 = vector.shape_cast %55 : vector<1x6x15xf32> to vector<6x15xf32>
      %cst_50 = arith.constant dense<0.000000e+00> : vector<6x110xf32>
      %57 = tpu.matmul %56, %33, %cst_50 {dimension_numbers = #tpu.dot_dimension_numbers<[1], [0], [0], [1], [0, 0, 1, 1], [], []>} : vector<6x15xf32>, vector<15x110xf32>, vector<6x110xf32> -> vector<6x110xf32>
      %58 = arith.addf %54, %57 : vector<6x110xf32>
      %c0_51 = arith.constant 0 : index
      %c0_52 = arith.constant 0 : index
      %c0_53 = arith.constant 0 : index
      %59 = vector.load %arg2[%c0_51, %c0_52, %c0_53] : memref<5x6x15xf32, #tpu.memory_space<vmem>>, vector<1x6x15xf32>
      %60 = vector.shape_cast %59 : vector<1x6x15xf32> to vector<6x15xf32>
      %cst_54 = arith.constant dense<0.000000e+00> : vector<6x110xf32>
      %61 = tpu.matmul %60, %15, %cst_54 {dimension_numbers = #tpu.dot_dimension_numbers<[1], [0], [0], [1], [0, 0, 1, 1], [], []>} : vector<6x15xf32>, vector<15x110xf32>, vector<6x110xf32> -> vector<6x110xf32>
      %c1_55 = arith.constant 1 : index
      %c0_56 = arith.constant 0 : index
      %c0_57 = arith.constant 0 : index
      %62 = vector.load %arg2[%c1_55, %c0_56, %c0_57] : memref<5x6x15xf32, #tpu.memory_space<vmem>>, vector<1x6x15xf32>
      %63 = vector.shape_cast %62 : vector<1x6x15xf32> to vector<6x15xf32>
      %cst_58 = arith.constant dense<0.000000e+00> : vector<6x110xf32>
      %64 = tpu.matmul %63, %21, %cst_58 {dimension_numbers = #tpu.dot_dimension_numbers<[1], [0], [0], [1], [0, 0, 1, 1], [], []>} : vector<6x15xf32>, vector<15x110xf32>, vector<6x110xf32> -> vector<6x110xf32>
      %65 = arith.addf %61, %64 : vector<6x110xf32>
      %c2_59 = arith.constant 2 : index
      %c0_60 = arith.constant 0 : index
      %c0_61 = arith.constant 0 : index
      %66 = vector.load %arg2[%c2_59, %c0_60, %c0_61] : memref<5x6x15xf32, #tpu.memory_space<vmem>>, vector<1x6x15xf32>
      %67 = vector.shape_cast %66 : vector<1x6x15xf32> to vector<6x15xf32>
      %cst_62 = arith.constant dense<0.000000e+00> : vector<6x110xf32>
      %68 = tpu.matmul %67, %27, %cst_62 {dimension_numbers = #tpu.dot_dimension_numbers<[1], [0], [0], [1], [0, 0, 1, 1], [], []>} : vector<6x15xf32>, vector<15x110xf32>, vector<6x110xf32> -> vector<6x110xf32>
      %69 = arith.addf %65, %68 : vector<6x110xf32>
      %c3_63 = arith.constant 3 : index
      %c0_64 = arith.constant 0 : index
      %c0_65 = arith.constant 0 : index
      %70 = vector.load %arg2[%c3_63, %c0_64, %c0_65] : memref<5x6x15xf32, #tpu.memory_space<vmem>>, vector<1x6x15xf32>
      %71 = vector.shape_cast %70 : vector<1x6x15xf32> to vector<6x15xf32>
      %cst_66 = arith.constant dense<0.000000e+00> : vector<6x110xf32>
      %72 = tpu.matmul %71, %33, %cst_66 {dimension_numbers = #tpu.dot_dimension_numbers<[1], [0], [0], [1], [0, 0, 1, 1], [], []>} : vector<6x15xf32>, vector<15x110xf32>, vector<6x110xf32> -> vector<6x110xf32>
      %73 = arith.addf %69, %72 : vector<6x110xf32>
      %c4_67 = arith.constant 4 : index
      %c0_68 = arith.constant 0 : index
      %c0_69 = arith.constant 0 : index
      %74 = vector.load %arg2[%c4_67, %c0_68, %c0_69] : memref<5x6x15xf32, #tpu.memory_space<vmem>>, vector<1x6x15xf32>
      %75 = vector.shape_cast %74 : vector<1x6x15xf32> to vector<6x15xf32>
      %cst_70 = arith.constant dense<0.000000e+00> : vector<6x110xf32>
      %76 = tpu.matmul %75, %39, %cst_70 {dimension_numbers = #tpu.dot_dimension_numbers<[1], [0], [0], [1], [0, 0, 1, 1], [], []>} : vector<6x15xf32>, vector<15x110xf32>, vector<6x110xf32> -> vector<6x110xf32>
      %77 = arith.addf %73, %76 : vector<6x110xf32>
      %c2_i32_71 = arith.constant 2 : i32
      %78 = arith.muli %c2_i32_71, %3 : i32
      %c224_i32 = arith.constant 224 : i32
      %79 = arith.addi %c224_i32, %78 : i32
      %c0_i32_72 = arith.constant 0 : i32
      %80 = arith.addi %79, %c0_i32_72 : i32
      %c0_73 = arith.constant 0 : index
      %81 = arith.index_cast %80 : i32 to index
      %c0_74 = arith.constant 0 : index
      %c0_75 = arith.constant 0 : index
      %82 = vector.load %arg1[%c0_73, %81, %c0_74, %c0_75] : memref<1x448x15x110xf32, #tpu.memory_space<vmem>>, vector<1x1x15x110xf32>
      %83 = vector.shape_cast %82 : vector<1x1x15x110xf32> to vector<15x110xf32>
      %c2_i32_76 = arith.constant 2 : i32
      %84 = arith.muli %c2_i32_76, %3 : i32
      %c224_i32_77 = arith.constant 224 : i32
      %85 = arith.addi %c224_i32_77, %84 : i32
      %c1_i32_78 = arith.constant 1 : i32
      %86 = arith.addi %85, %c1_i32_78 : i32
      %c0_79 = arith.constant 0 : index
      %87 = arith.index_cast %86 : i32 to index
      %c0_80 = arith.constant 0 : index
      %c0_81 = arith.constant 0 : index
      %88 = vector.load %arg1[%c0_79, %87, %c0_80, %c0_81] : memref<1x448x15x110xf32, #tpu.memory_space<vmem>>, vector<1x1x15x110xf32>
      %89 = vector.shape_cast %88 : vector<1x1x15x110xf32> to vector<15x110xf32>
      %c2_i32_82 = arith.constant 2 : i32
      %90 = arith.muli %c2_i32_82, %3 : i32
      %c224_i32_83 = arith.constant 224 : i32
      %91 = arith.addi %c224_i32_83, %90 : i32
      %c2_i32_84 = arith.constant 2 : i32
      %92 = arith.addi %91, %c2_i32_84 : i32
      %c0_85 = arith.constant 0 : index
      %93 = arith.index_cast %92 : i32 to index
      %c0_86 = arith.constant 0 : index
      %c0_87 = arith.constant 0 : index
      %94 = vector.load %arg1[%c0_85, %93, %c0_86, %c0_87] : memref<1x448x15x110xf32, #tpu.memory_space<vmem>>, vector<1x1x15x110xf32>
      %95 = vector.shape_cast %94 : vector<1x1x15x110xf32> to vector<15x110xf32>
      %c2_i32_88 = arith.constant 2 : i32
      %96 = arith.muli %c2_i32_88, %3 : i32
      %c224_i32_89 = arith.constant 224 : i32
      %97 = arith.addi %c224_i32_89, %96 : i32
      %c3_i32_90 = arith.constant 3 : i32
      %98 = arith.addi %97, %c3_i32_90 : i32
      %c0_91 = arith.constant 0 : index
      %99 = arith.index_cast %98 : i32 to index
      %c0_92 = arith.constant 0 : index
      %c0_93 = arith.constant 0 : index
      %100 = vector.load %arg1[%c0_91, %99, %c0_92, %c0_93] : memref<1x448x15x110xf32, #tpu.memory_space<vmem>>, vector<1x1x15x110xf32>
      %101 = vector.shape_cast %100 : vector<1x1x15x110xf32> to vector<15x110xf32>
      %c2_i32_94 = arith.constant 2 : i32
      %102 = arith.muli %c2_i32_94, %3 : i32
      %c224_i32_95 = arith.constant 224 : i32
      %103 = arith.addi %c224_i32_95, %102 : i32
      %c4_i32_96 = arith.constant 4 : i32
      %104 = arith.addi %103, %c4_i32_96 : i32
      %c0_97 = arith.constant 0 : index
      %105 = arith.index_cast %104 : i32 to index
      %c0_98 = arith.constant 0 : index
      %c0_99 = arith.constant 0 : index
      %106 = vector.load %arg1[%c0_97, %105, %c0_98, %c0_99] : memref<1x448x15x110xf32, #tpu.memory_space<vmem>>, vector<1x1x15x110xf32>
      %107 = vector.shape_cast %106 : vector<1x1x15x110xf32> to vector<15x110xf32>
      %c2_i32_100 = arith.constant 2 : i32
      %108 = arith.muli %c2_i32_100, %3 : i32
      %c224_i32_101 = arith.constant 224 : i32
      %109 = arith.addi %c224_i32_101, %108 : i32
      %c5_i32_102 = arith.constant 5 : i32
      %110 = arith.addi %109, %c5_i32_102 : i32
      %c0_103 = arith.constant 0 : index
      %111 = arith.index_cast %110 : i32 to index
      %c0_104 = arith.constant 0 : index
      %c0_105 = arith.constant 0 : index
      %112 = vector.load %arg1[%c0_103, %111, %c0_104, %c0_105] : memref<1x448x15x110xf32, #tpu.memory_space<vmem>>, vector<1x1x15x110xf32>
      %113 = vector.shape_cast %112 : vector<1x1x15x110xf32> to vector<15x110xf32>
      %c0_106 = arith.constant 0 : index
      %c0_107 = arith.constant 0 : index
      %c0_108 = arith.constant 0 : index
      %114 = vector.load %arg2[%c0_106, %c0_107, %c0_108] : memref<5x6x15xf32, #tpu.memory_space<vmem>>, vector<1x6x15xf32>
      %115 = vector.shape_cast %114 : vector<1x6x15xf32> to vector<6x15xf32>
      %cst_109 = arith.constant dense<0.000000e+00> : vector<6x110xf32>
      %116 = tpu.matmul %115, %83, %cst_109 {dimension_numbers = #tpu.dot_dimension_numbers<[1], [0], [0], [1], [0, 0, 1, 1], [], []>} : vector<6x15xf32>, vector<15x110xf32>, vector<6x110xf32> -> vector<6x110xf32>
      %c1_110 = arith.constant 1 : index
      %c0_111 = arith.constant 0 : index
      %c0_112 = arith.constant 0 : index
      %117 = vector.load %arg2[%c1_110, %c0_111, %c0_112] : memref<5x6x15xf32, #tpu.memory_space<vmem>>, vector<1x6x15xf32>
      %118 = vector.shape_cast %117 : vector<1x6x15xf32> to vector<6x15xf32>
      %cst_113 = arith.constant dense<0.000000e+00> : vector<6x110xf32>
      %119 = tpu.matmul %118, %89, %cst_113 {dimension_numbers = #tpu.dot_dimension_numbers<[1], [0], [0], [1], [0, 0, 1, 1], [], []>} : vector<6x15xf32>, vector<15x110xf32>, vector<6x110xf32> -> vector<6x110xf32>
      %120 = arith.addf %116, %119 : vector<6x110xf32>
      %c2_114 = arith.constant 2 : index
      %c0_115 = arith.constant 0 : index
      %c0_116 = arith.constant 0 : index
      %121 = vector.load %arg2[%c2_114, %c0_115, %c0_116] : memref<5x6x15xf32, #tpu.memory_space<vmem>>, vector<1x6x15xf32>
      %122 = vector.shape_cast %121 : vector<1x6x15xf32> to vector<6x15xf32>
      %cst_117 = arith.constant dense<0.000000e+00> : vector<6x110xf32>
      %123 = tpu.matmul %122, %95, %cst_117 {dimension_numbers = #tpu.dot_dimension_numbers<[1], [0], [0], [1], [0, 0, 1, 1], [], []>} : vector<6x15xf32>, vector<15x110xf32>, vector<6x110xf32> -> vector<6x110xf32>
      %124 = arith.addf %120, %123 : vector<6x110xf32>
      %c3_118 = arith.constant 3 : index
      %c0_119 = arith.constant 0 : index
      %c0_120 = arith.constant 0 : index
      %125 = vector.load %arg2[%c3_118, %c0_119, %c0_120] : memref<5x6x15xf32, #tpu.memory_space<vmem>>, vector<1x6x15xf32>
      %126 = vector.shape_cast %125 : vector<1x6x15xf32> to vector<6x15xf32>
      %cst_121 = arith.constant dense<0.000000e+00> : vector<6x110xf32>
      %127 = tpu.matmul %126, %101, %cst_121 {dimension_numbers = #tpu.dot_dimension_numbers<[1], [0], [0], [1], [0, 0, 1, 1], [], []>} : vector<6x15xf32>, vector<15x110xf32>, vector<6x110xf32> -> vector<6x110xf32>
      %128 = arith.addf %124, %127 : vector<6x110xf32>
      %c4_122 = arith.constant 4 : index
      %c0_123 = arith.constant 0 : index
      %c0_124 = arith.constant 0 : index
      %129 = vector.load %arg2[%c4_122, %c0_123, %c0_124] : memref<5x6x15xf32, #tpu.memory_space<vmem>>, vector<1x6x15xf32>
      %130 = vector.shape_cast %129 : vector<1x6x15xf32> to vector<6x15xf32>
      %cst_125 = arith.constant dense<0.000000e+00> : vector<6x110xf32>
      %131 = tpu.matmul %130, %107, %cst_125 {dimension_numbers = #tpu.dot_dimension_numbers<[1], [0], [0], [1], [0, 0, 1, 1], [], []>} : vector<6x15xf32>, vector<15x110xf32>, vector<6x110xf32> -> vector<6x110xf32>
      %132 = arith.addf %128, %131 : vector<6x110xf32>
      %c0_126 = arith.constant 0 : index
      %c0_127 = arith.constant 0 : index
      %c0_128 = arith.constant 0 : index
      %133 = vector.load %arg2[%c0_126, %c0_127, %c0_128] : memref<5x6x15xf32, #tpu.memory_space<vmem>>, vector<1x6x15xf32>
      %134 = vector.shape_cast %133 : vector<1x6x15xf32> to vector<6x15xf32>
      %cst_129 = arith.constant dense<0.000000e+00> : vector<6x110xf32>
      %135 = tpu.matmul %134, %89, %cst_129 {dimension_numbers = #tpu.dot_dimension_numbers<[1], [0], [0], [1], [0, 0, 1, 1], [], []>} : vector<6x15xf32>, vector<15x110xf32>, vector<6x110xf32> -> vector<6x110xf32>
      %c1_130 = arith.constant 1 : index
      %c0_131 = arith.constant 0 : index
      %c0_132 = arith.constant 0 : index
      %136 = vector.load %arg2[%c1_130, %c0_131, %c0_132] : memref<5x6x15xf32, #tpu.memory_space<vmem>>, vector<1x6x15xf32>
      %137 = vector.shape_cast %136 : vector<1x6x15xf32> to vector<6x15xf32>
      %cst_133 = arith.constant dense<0.000000e+00> : vector<6x110xf32>
      %138 = tpu.matmul %137, %95, %cst_133 {dimension_numbers = #tpu.dot_dimension_numbers<[1], [0], [0], [1], [0, 0, 1, 1], [], []>} : vector<6x15xf32>, vector<15x110xf32>, vector<6x110xf32> -> vector<6x110xf32>
      %139 = arith.addf %135, %138 : vector<6x110xf32>
      %c2_134 = arith.constant 2 : index
      %c0_135 = arith.constant 0 : index
      %c0_136 = arith.constant 0 : index
      %140 = vector.load %arg2[%c2_134, %c0_135, %c0_136] : memref<5x6x15xf32, #tpu.memory_space<vmem>>, vector<1x6x15xf32>
      %141 = vector.shape_cast %140 : vector<1x6x15xf32> to vector<6x15xf32>
      %cst_137 = arith.constant dense<0.000000e+00> : vector<6x110xf32>
      %142 = tpu.matmul %141, %101, %cst_137 {dimension_numbers = #tpu.dot_dimension_numbers<[1], [0], [0], [1], [0, 0, 1, 1], [], []>} : vector<6x15xf32>, vector<15x110xf32>, vector<6x110xf32> -> vector<6x110xf32>
      %143 = arith.addf %139, %142 : vector<6x110xf32>
      %c3_138 = arith.constant 3 : index
      %c0_139 = arith.constant 0 : index
      %c0_140 = arith.constant 0 : index
      %144 = vector.load %arg2[%c3_138, %c0_139, %c0_140] : memref<5x6x15xf32, #tpu.memory_space<vmem>>, vector<1x6x15xf32>
      %145 = vector.shape_cast %144 : vector<1x6x15xf32> to vector<6x15xf32>
      %cst_141 = arith.constant dense<0.000000e+00> : vector<6x110xf32>
      %146 = tpu.matmul %145, %107, %cst_141 {dimension_numbers = #tpu.dot_dimension_numbers<[1], [0], [0], [1], [0, 0, 1, 1], [], []>} : vector<6x15xf32>, vector<15x110xf32>, vector<6x110xf32> -> vector<6x110xf32>
      %147 = arith.addf %143, %146 : vector<6x110xf32>
      %c4_142 = arith.constant 4 : index
      %c0_143 = arith.constant 0 : index
      %c0_144 = arith.constant 0 : index
      %148 = vector.load %arg2[%c4_142, %c0_143, %c0_144] : memref<5x6x15xf32, #tpu.memory_space<vmem>>, vector<1x6x15xf32>
      %149 = vector.shape_cast %148 : vector<1x6x15xf32> to vector<6x15xf32>
      %cst_145 = arith.constant dense<0.000000e+00> : vector<6x110xf32>
      %150 = tpu.matmul %149, %113, %cst_145 {dimension_numbers = #tpu.dot_dimension_numbers<[1], [0], [0], [1], [0, 0, 1, 1], [], []>} : vector<6x15xf32>, vector<15x110xf32>, vector<6x110xf32> -> vector<6x110xf32>
      %151 = arith.addf %147, %150 : vector<6x110xf32>
      %152 = arith.maximumf %58, %77 : vector<6x110xf32>
      %153 = arith.maximumf %132, %151 : vector<6x110xf32>
      %154 = arith.maximumf %152, %153 : vector<6x110xf32>
      %155 = vector.broadcast %0 : vector<6x1xf32> to vector<6x110xf32>
      %156 = arith.addf %154, %155 : vector<6x110xf32>
      %cst_146 = arith.constant 0.000000e+00 : f32
      %157 = vector.broadcast %cst_146 : f32 to vector<6x110xf32>
      %158 = arith.maximumf %156, %157 : vector<6x110xf32>
      %c0_147 = arith.constant 0 : index
      %159 = arith.index_cast %3 : i32 to index
      %c0_148 = arith.constant 0 : index
      %c0_149 = arith.constant 0 : index
      %160 = vector.load %arg4[%c0_147, %159, %c0_148, %c0_149] : memref<1x110x6x110xf32, #tpu.memory_space<vmem>>, vector<1x1x6x110xf32>
      %161 = vector.shape_cast %160 : vector<1x1x6x110xf32> to vector<6x110xf32>
      %162 = vector.shape_cast %158 : vector<6x110xf32> to vector<1x1x6x110xf32>
      tpu.vector_store %arg4[%c0_147, %159, %c0_148, %c0_149], %162 {strides = array<i32>} : memref<1x110x6x110xf32, #tpu.memory_space<vmem>>, vector<1x1x6x110xf32>,
    }
    %c110_i32_1 = arith.constant 110 : i32
    return
  }
  func.func @transform_0(%arg0: i32) -> (i32, i32, i32, i32) {
    %c0_i32 = arith.constant 0 : i32
    %c0_i32_0 = arith.constant 0 : i32
    %c0_i32_1 = arith.constant 0 : i32
    %c0_i32_2 = arith.constant 0 : i32
    return %arg0, %c0_i32, %c0_i32_0, %c0_i32_1 : i32, i32, i32, i32
  }
  func.func @transform_1(%arg0: i32) -> (i32, i32, i32) {
    %c0_i32 = arith.constant 0 : i32
    %c0_i32_0 = arith.constant 0 : i32
    %c0_i32_1 = arith.constant 0 : i32
    %c0_i32_2 = arith.constant 0 : i32
    return %c0_i32, %c0_i32_0, %c0_i32_1 : i32, i32, i32
  }
  func.func @transform_2(%arg0: i32) -> (i32, i32) {
    %c0_i32 = arith.constant 0 : i32
    %c0_i32_0 = arith.constant 0 : i32
    %c0_i32_1 = arith.constant 0 : i32
    return %c0_i32, %c0_i32_0 : i32, i32
  }
  func.func @transform_3(%arg0: i32) -> (i32, i32, i32, i32) {
    %c0_i32 = arith.constant 0 : i32
    %c0_i32_0 = arith.constant 0 : i32
    %c0_i32_1 = arith.constant 0 : i32
    %c0_i32_2 = arith.constant 0 : i32
    return %arg0, %c0_i32, %c0_i32_0, %c0_i32_1 : i32, i32, i32, i32
  }
}

module attributes {stable_mosaic.version = 11 : i64} {
  func.func @_conv_relu_pool_kernel(%arg0: i32, %arg1: memref<1x220x30x53xf32, #tpu.memory_space<vmem>>, %arg2: memref<5x16x30xf32, #tpu.memory_space<vmem>>, %arg3: memref<16x1xf32, #tpu.memory_space<vmem>>, %arg4: memref<1x53x16x53xf32, #tpu.memory_space<vmem>>) attributes {dimension_semantics = [#tpu.dimension_semantics<parallel>], iteration_bounds = array<i64: 2>, scalar_prefetch = 0 : i64, scratch_operands = 0 : i64, tpu.core_type = #tpu.core_type<tc>, window_params = [{transform_indices = @transform_0, window_bounds = array<i64: 1, 220, 30, 53>}, {pipeline_mode = #tpu.pipeline_mode<synchronous>, transform_indices = @transform_1, window_bounds = array<i64: 5, 16, 30>}, {pipeline_mode = #tpu.pipeline_mode<synchronous>, transform_indices = @transform_2, window_bounds = array<i64: 16, 1>}, {transform_indices = @transform_3, window_bounds = array<i64: 1, 53, 16, 53>}]} {
    %c0 = arith.constant 0 : index
    %c0_0 = arith.constant 0 : index
    %0 = vector.load %arg3[%c0, %c0_0] : memref<16x1xf32, #tpu.memory_space<vmem>>, vector<16x1xf32>
    %c0_i32 = arith.constant 0 : i32
    %c53_i32 = arith.constant 53 : i32
    %1 = arith.addi %c0_i32, %c53_i32 : i32
    %c1_i32 = arith.constant 1 : i32
    scf.for %arg5 = %c0_i32 to %1 step %c1_i32  : i32 {
      %c1_i32_2 = arith.constant 1 : i32
      %2 = arith.muli %arg5, %c1_i32_2 : i32
      %c0_i32_3 = arith.constant 0 : i32
      %3 = arith.addi %c0_i32_3, %2 : i32
      %c2_i32 = arith.constant 2 : i32
      %4 = arith.muli %c2_i32, %3 : i32
      %c0_i32_4 = arith.constant 0 : i32
      %5 = arith.addi %c0_i32_4, %4 : i32
      %c0_i32_5 = arith.constant 0 : i32
      %6 = arith.addi %5, %c0_i32_5 : i32
      %c0_6 = arith.constant 0 : index
      %7 = arith.index_cast %6 : i32 to index
      %c0_7 = arith.constant 0 : index
      %c0_8 = arith.constant 0 : index
      %8 = vector.load %arg1[%c0_6, %7, %c0_7, %c0_8] : memref<1x220x30x53xf32, #tpu.memory_space<vmem>>, vector<1x1x30x53xf32>
      %9 = vector.shape_cast %8 : vector<1x1x30x53xf32> to vector<30x53xf32>
      %c2_i32_9 = arith.constant 2 : i32
      %10 = arith.muli %c2_i32_9, %3 : i32
      %c0_i32_10 = arith.constant 0 : i32
      %11 = arith.addi %c0_i32_10, %10 : i32
      %c1_i32_11 = arith.constant 1 : i32
      %12 = arith.addi %11, %c1_i32_11 : i32
      %c0_12 = arith.constant 0 : index
      %13 = arith.index_cast %12 : i32 to index
      %c0_13 = arith.constant 0 : index
      %c0_14 = arith.constant 0 : index
      %14 = vector.load %arg1[%c0_12, %13, %c0_13, %c0_14] : memref<1x220x30x53xf32, #tpu.memory_space<vmem>>, vector<1x1x30x53xf32>
      %15 = vector.shape_cast %14 : vector<1x1x30x53xf32> to vector<30x53xf32>
      %c2_i32_15 = arith.constant 2 : i32
      %16 = arith.muli %c2_i32_15, %3 : i32
      %c0_i32_16 = arith.constant 0 : i32
      %17 = arith.addi %c0_i32_16, %16 : i32
      %c2_i32_17 = arith.constant 2 : i32
      %18 = arith.addi %17, %c2_i32_17 : i32
      %c0_18 = arith.constant 0 : index
      %19 = arith.index_cast %18 : i32 to index
      %c0_19 = arith.constant 0 : index
      %c0_20 = arith.constant 0 : index
      %20 = vector.load %arg1[%c0_18, %19, %c0_19, %c0_20] : memref<1x220x30x53xf32, #tpu.memory_space<vmem>>, vector<1x1x30x53xf32>
      %21 = vector.shape_cast %20 : vector<1x1x30x53xf32> to vector<30x53xf32>
      %c2_i32_21 = arith.constant 2 : i32
      %22 = arith.muli %c2_i32_21, %3 : i32
      %c0_i32_22 = arith.constant 0 : i32
      %23 = arith.addi %c0_i32_22, %22 : i32
      %c3_i32 = arith.constant 3 : i32
      %24 = arith.addi %23, %c3_i32 : i32
      %c0_23 = arith.constant 0 : index
      %25 = arith.index_cast %24 : i32 to index
      %c0_24 = arith.constant 0 : index
      %c0_25 = arith.constant 0 : index
      %26 = vector.load %arg1[%c0_23, %25, %c0_24, %c0_25] : memref<1x220x30x53xf32, #tpu.memory_space<vmem>>, vector<1x1x30x53xf32>
      %27 = vector.shape_cast %26 : vector<1x1x30x53xf32> to vector<30x53xf32>
      %c2_i32_26 = arith.constant 2 : i32
      %28 = arith.muli %c2_i32_26, %3 : i32
      %c0_i32_27 = arith.constant 0 : i32
      %29 = arith.addi %c0_i32_27, %28 : i32
      %c4_i32 = arith.constant 4 : i32
      %30 = arith.addi %29, %c4_i32 : i32
      %c0_28 = arith.constant 0 : index
      %31 = arith.index_cast %30 : i32 to index
      %c0_29 = arith.constant 0 : index
      %c0_30 = arith.constant 0 : index
      %32 = vector.load %arg1[%c0_28, %31, %c0_29, %c0_30] : memref<1x220x30x53xf32, #tpu.memory_space<vmem>>, vector<1x1x30x53xf32>
      %33 = vector.shape_cast %32 : vector<1x1x30x53xf32> to vector<30x53xf32>
      %c2_i32_31 = arith.constant 2 : i32
      %34 = arith.muli %c2_i32_31, %3 : i32
      %c0_i32_32 = arith.constant 0 : i32
      %35 = arith.addi %c0_i32_32, %34 : i32
      %c5_i32 = arith.constant 5 : i32
      %36 = arith.addi %35, %c5_i32 : i32
      %c0_33 = arith.constant 0 : index
      %37 = arith.index_cast %36 : i32 to index
      %c0_34 = arith.constant 0 : index
      %c0_35 = arith.constant 0 : index
      %38 = vector.load %arg1[%c0_33, %37, %c0_34, %c0_35] : memref<1x220x30x53xf32, #tpu.memory_space<vmem>>, vector<1x1x30x53xf32>
      %39 = vector.shape_cast %38 : vector<1x1x30x53xf32> to vector<30x53xf32>
      %c0_36 = arith.constant 0 : index
      %c0_37 = arith.constant 0 : index
      %c0_38 = arith.constant 0 : index
      %40 = vector.load %arg2[%c0_36, %c0_37, %c0_38] : memref<5x16x30xf32, #tpu.memory_space<vmem>>, vector<1x16x30xf32>
      %41 = vector.shape_cast %40 : vector<1x16x30xf32> to vector<16x30xf32>
      %cst = arith.constant dense<0.000000e+00> : vector<16x53xf32>
      %42 = tpu.matmul %41, %9, %cst {dimension_numbers = #tpu.dot_dimension_numbers<[1], [0], [0], [1], [0, 0, 1, 1], [], []>} : vector<16x30xf32>, vector<30x53xf32>, vector<16x53xf32> -> vector<16x53xf32>
      %c1 = arith.constant 1 : index
      %c0_39 = arith.constant 0 : index
      %c0_40 = arith.constant 0 : index
      %43 = vector.load %arg2[%c1, %c0_39, %c0_40] : memref<5x16x30xf32, #tpu.memory_space<vmem>>, vector<1x16x30xf32>
      %44 = vector.shape_cast %43 : vector<1x16x30xf32> to vector<16x30xf32>
      %cst_41 = arith.constant dense<0.000000e+00> : vector<16x53xf32>
      %45 = tpu.matmul %44, %15, %cst_41 {dimension_numbers = #tpu.dot_dimension_numbers<[1], [0], [0], [1], [0, 0, 1, 1], [], []>} : vector<16x30xf32>, vector<30x53xf32>, vector<16x53xf32> -> vector<16x53xf32>
      %46 = arith.addf %42, %45 : vector<16x53xf32>
      %c2 = arith.constant 2 : index
      %c0_42 = arith.constant 0 : index
      %c0_43 = arith.constant 0 : index
      %47 = vector.load %arg2[%c2, %c0_42, %c0_43] : memref<5x16x30xf32, #tpu.memory_space<vmem>>, vector<1x16x30xf32>
      %48 = vector.shape_cast %47 : vector<1x16x30xf32> to vector<16x30xf32>
      %cst_44 = arith.constant dense<0.000000e+00> : vector<16x53xf32>
      %49 = tpu.matmul %48, %21, %cst_44 {dimension_numbers = #tpu.dot_dimension_numbers<[1], [0], [0], [1], [0, 0, 1, 1], [], []>} : vector<16x30xf32>, vector<30x53xf32>, vector<16x53xf32> -> vector<16x53xf32>
      %50 = arith.addf %46, %49 : vector<16x53xf32>
      %c3 = arith.constant 3 : index
      %c0_45 = arith.constant 0 : index
      %c0_46 = arith.constant 0 : index
      %51 = vector.load %arg2[%c3, %c0_45, %c0_46] : memref<5x16x30xf32, #tpu.memory_space<vmem>>, vector<1x16x30xf32>
      %52 = vector.shape_cast %51 : vector<1x16x30xf32> to vector<16x30xf32>
      %cst_47 = arith.constant dense<0.000000e+00> : vector<16x53xf32>
      %53 = tpu.matmul %52, %27, %cst_47 {dimension_numbers = #tpu.dot_dimension_numbers<[1], [0], [0], [1], [0, 0, 1, 1], [], []>} : vector<16x30xf32>, vector<30x53xf32>, vector<16x53xf32> -> vector<16x53xf32>
      %54 = arith.addf %50, %53 : vector<16x53xf32>
      %c4 = arith.constant 4 : index
      %c0_48 = arith.constant 0 : index
      %c0_49 = arith.constant 0 : index
      %55 = vector.load %arg2[%c4, %c0_48, %c0_49] : memref<5x16x30xf32, #tpu.memory_space<vmem>>, vector<1x16x30xf32>
      %56 = vector.shape_cast %55 : vector<1x16x30xf32> to vector<16x30xf32>
      %cst_50 = arith.constant dense<0.000000e+00> : vector<16x53xf32>
      %57 = tpu.matmul %56, %33, %cst_50 {dimension_numbers = #tpu.dot_dimension_numbers<[1], [0], [0], [1], [0, 0, 1, 1], [], []>} : vector<16x30xf32>, vector<30x53xf32>, vector<16x53xf32> -> vector<16x53xf32>
      %58 = arith.addf %54, %57 : vector<16x53xf32>
      %c0_51 = arith.constant 0 : index
      %c0_52 = arith.constant 0 : index
      %c0_53 = arith.constant 0 : index
      %59 = vector.load %arg2[%c0_51, %c0_52, %c0_53] : memref<5x16x30xf32, #tpu.memory_space<vmem>>, vector<1x16x30xf32>
      %60 = vector.shape_cast %59 : vector<1x16x30xf32> to vector<16x30xf32>
      %cst_54 = arith.constant dense<0.000000e+00> : vector<16x53xf32>
      %61 = tpu.matmul %60, %15, %cst_54 {dimension_numbers = #tpu.dot_dimension_numbers<[1], [0], [0], [1], [0, 0, 1, 1], [], []>} : vector<16x30xf32>, vector<30x53xf32>, vector<16x53xf32> -> vector<16x53xf32>
      %c1_55 = arith.constant 1 : index
      %c0_56 = arith.constant 0 : index
      %c0_57 = arith.constant 0 : index
      %62 = vector.load %arg2[%c1_55, %c0_56, %c0_57] : memref<5x16x30xf32, #tpu.memory_space<vmem>>, vector<1x16x30xf32>
      %63 = vector.shape_cast %62 : vector<1x16x30xf32> to vector<16x30xf32>
      %cst_58 = arith.constant dense<0.000000e+00> : vector<16x53xf32>
      %64 = tpu.matmul %63, %21, %cst_58 {dimension_numbers = #tpu.dot_dimension_numbers<[1], [0], [0], [1], [0, 0, 1, 1], [], []>} : vector<16x30xf32>, vector<30x53xf32>, vector<16x53xf32> -> vector<16x53xf32>
      %65 = arith.addf %61, %64 : vector<16x53xf32>
      %c2_59 = arith.constant 2 : index
      %c0_60 = arith.constant 0 : index
      %c0_61 = arith.constant 0 : index
      %66 = vector.load %arg2[%c2_59, %c0_60, %c0_61] : memref<5x16x30xf32, #tpu.memory_space<vmem>>, vector<1x16x30xf32>
      %67 = vector.shape_cast %66 : vector<1x16x30xf32> to vector<16x30xf32>
      %cst_62 = arith.constant dense<0.000000e+00> : vector<16x53xf32>
      %68 = tpu.matmul %67, %27, %cst_62 {dimension_numbers = #tpu.dot_dimension_numbers<[1], [0], [0], [1], [0, 0, 1, 1], [], []>} : vector<16x30xf32>, vector<30x53xf32>, vector<16x53xf32> -> vector<16x53xf32>
      %69 = arith.addf %65, %68 : vector<16x53xf32>
      %c3_63 = arith.constant 3 : index
      %c0_64 = arith.constant 0 : index
      %c0_65 = arith.constant 0 : index
      %70 = vector.load %arg2[%c3_63, %c0_64, %c0_65] : memref<5x16x30xf32, #tpu.memory_space<vmem>>, vector<1x16x30xf32>
      %71 = vector.shape_cast %70 : vector<1x16x30xf32> to vector<16x30xf32>
      %cst_66 = arith.constant dense<0.000000e+00> : vector<16x53xf32>
      %72 = tpu.matmul %71, %33, %cst_66 {dimension_numbers = #tpu.dot_dimension_numbers<[1], [0], [0], [1], [0, 0, 1, 1], [], []>} : vector<16x30xf32>, vector<30x53xf32>, vector<16x53xf32> -> vector<16x53xf32>
      %73 = arith.addf %69, %72 : vector<16x53xf32>
      %c4_67 = arith.constant 4 : index
      %c0_68 = arith.constant 0 : index
      %c0_69 = arith.constant 0 : index
      %74 = vector.load %arg2[%c4_67, %c0_68, %c0_69] : memref<5x16x30xf32, #tpu.memory_space<vmem>>, vector<1x16x30xf32>
      %75 = vector.shape_cast %74 : vector<1x16x30xf32> to vector<16x30xf32>
      %cst_70 = arith.constant dense<0.000000e+00> : vector<16x53xf32>
      %76 = tpu.matmul %75, %39, %cst_70 {dimension_numbers = #tpu.dot_dimension_numbers<[1], [0], [0], [1], [0, 0, 1, 1], [], []>} : vector<16x30xf32>, vector<30x53xf32>, vector<16x53xf32> -> vector<16x53xf32>
      %77 = arith.addf %73, %76 : vector<16x53xf32>
      %c2_i32_71 = arith.constant 2 : i32
      %78 = arith.muli %c2_i32_71, %3 : i32
      %c110_i32 = arith.constant 110 : i32
      %79 = arith.addi %c110_i32, %78 : i32
      %c0_i32_72 = arith.constant 0 : i32
      %80 = arith.addi %79, %c0_i32_72 : i32
      %c0_73 = arith.constant 0 : index
      %81 = arith.index_cast %80 : i32 to index
      %c0_74 = arith.constant 0 : index
      %c0_75 = arith.constant 0 : index
      %82 = vector.load %arg1[%c0_73, %81, %c0_74, %c0_75] : memref<1x220x30x53xf32, #tpu.memory_space<vmem>>, vector<1x1x30x53xf32>
      %83 = vector.shape_cast %82 : vector<1x1x30x53xf32> to vector<30x53xf32>
      %c2_i32_76 = arith.constant 2 : i32
      %84 = arith.muli %c2_i32_76, %3 : i32
      %c110_i32_77 = arith.constant 110 : i32
      %85 = arith.addi %c110_i32_77, %84 : i32
      %c1_i32_78 = arith.constant 1 : i32
      %86 = arith.addi %85, %c1_i32_78 : i32
      %c0_79 = arith.constant 0 : index
      %87 = arith.index_cast %86 : i32 to index
      %c0_80 = arith.constant 0 : index
      %c0_81 = arith.constant 0 : index
      %88 = vector.load %arg1[%c0_79, %87, %c0_80, %c0_81] : memref<1x220x30x53xf32, #tpu.memory_space<vmem>>, vector<1x1x30x53xf32>
      %89 = vector.shape_cast %88 : vector<1x1x30x53xf32> to vector<30x53xf32>
      %c2_i32_82 = arith.constant 2 : i32
      %90 = arith.muli %c2_i32_82, %3 : i32
      %c110_i32_83 = arith.constant 110 : i32
      %91 = arith.addi %c110_i32_83, %90 : i32
      %c2_i32_84 = arith.constant 2 : i32
      %92 = arith.addi %91, %c2_i32_84 : i32
      %c0_85 = arith.constant 0 : index
      %93 = arith.index_cast %92 : i32 to index
      %c0_86 = arith.constant 0 : index
      %c0_87 = arith.constant 0 : index
      %94 = vector.load %arg1[%c0_85, %93, %c0_86, %c0_87] : memref<1x220x30x53xf32, #tpu.memory_space<vmem>>, vector<1x1x30x53xf32>
      %95 = vector.shape_cast %94 : vector<1x1x30x53xf32> to vector<30x53xf32>
      %c2_i32_88 = arith.constant 2 : i32
      %96 = arith.muli %c2_i32_88, %3 : i32
      %c110_i32_89 = arith.constant 110 : i32
      %97 = arith.addi %c110_i32_89, %96 : i32
      %c3_i32_90 = arith.constant 3 : i32
      %98 = arith.addi %97, %c3_i32_90 : i32
      %c0_91 = arith.constant 0 : index
      %99 = arith.index_cast %98 : i32 to index
      %c0_92 = arith.constant 0 : index
      %c0_93 = arith.constant 0 : index
      %100 = vector.load %arg1[%c0_91, %99, %c0_92, %c0_93] : memref<1x220x30x53xf32, #tpu.memory_space<vmem>>, vector<1x1x30x53xf32>
      %101 = vector.shape_cast %100 : vector<1x1x30x53xf32> to vector<30x53xf32>
      %c2_i32_94 = arith.constant 2 : i32
      %102 = arith.muli %c2_i32_94, %3 : i32
      %c110_i32_95 = arith.constant 110 : i32
      %103 = arith.addi %c110_i32_95, %102 : i32
      %c4_i32_96 = arith.constant 4 : i32
      %104 = arith.addi %103, %c4_i32_96 : i32
      %c0_97 = arith.constant 0 : index
      %105 = arith.index_cast %104 : i32 to index
      %c0_98 = arith.constant 0 : index
      %c0_99 = arith.constant 0 : index
      %106 = vector.load %arg1[%c0_97, %105, %c0_98, %c0_99] : memref<1x220x30x53xf32, #tpu.memory_space<vmem>>, vector<1x1x30x53xf32>
      %107 = vector.shape_cast %106 : vector<1x1x30x53xf32> to vector<30x53xf32>
      %c2_i32_100 = arith.constant 2 : i32
      %108 = arith.muli %c2_i32_100, %3 : i32
      %c110_i32_101 = arith.constant 110 : i32
      %109 = arith.addi %c110_i32_101, %108 : i32
      %c5_i32_102 = arith.constant 5 : i32
      %110 = arith.addi %109, %c5_i32_102 : i32
      %c0_103 = arith.constant 0 : index
      %111 = arith.index_cast %110 : i32 to index
      %c0_104 = arith.constant 0 : index
      %c0_105 = arith.constant 0 : index
      %112 = vector.load %arg1[%c0_103, %111, %c0_104, %c0_105] : memref<1x220x30x53xf32, #tpu.memory_space<vmem>>, vector<1x1x30x53xf32>
      %113 = vector.shape_cast %112 : vector<1x1x30x53xf32> to vector<30x53xf32>
      %c0_106 = arith.constant 0 : index
      %c0_107 = arith.constant 0 : index
      %c0_108 = arith.constant 0 : index
      %114 = vector.load %arg2[%c0_106, %c0_107, %c0_108] : memref<5x16x30xf32, #tpu.memory_space<vmem>>, vector<1x16x30xf32>
      %115 = vector.shape_cast %114 : vector<1x16x30xf32> to vector<16x30xf32>
      %cst_109 = arith.constant dense<0.000000e+00> : vector<16x53xf32>
      %116 = tpu.matmul %115, %83, %cst_109 {dimension_numbers = #tpu.dot_dimension_numbers<[1], [0], [0], [1], [0, 0, 1, 1], [], []>} : vector<16x30xf32>, vector<30x53xf32>, vector<16x53xf32> -> vector<16x53xf32>
      %c1_110 = arith.constant 1 : index
      %c0_111 = arith.constant 0 : index
      %c0_112 = arith.constant 0 : index
      %117 = vector.load %arg2[%c1_110, %c0_111, %c0_112] : memref<5x16x30xf32, #tpu.memory_space<vmem>>, vector<1x16x30xf32>
      %118 = vector.shape_cast %117 : vector<1x16x30xf32> to vector<16x30xf32>
      %cst_113 = arith.constant dense<0.000000e+00> : vector<16x53xf32>
      %119 = tpu.matmul %118, %89, %cst_113 {dimension_numbers = #tpu.dot_dimension_numbers<[1], [0], [0], [1], [0, 0, 1, 1], [], []>} : vector<16x30xf32>, vector<30x53xf32>, vector<16x53xf32> -> vector<16x53xf32>
      %120 = arith.addf %116, %119 : vector<16x53xf32>
      %c2_114 = arith.constant 2 : index
      %c0_115 = arith.constant 0 : index
      %c0_116 = arith.constant 0 : index
      %121 = vector.load %arg2[%c2_114, %c0_115, %c0_116] : memref<5x16x30xf32, #tpu.memory_space<vmem>>, vector<1x16x30xf32>
      %122 = vector.shape_cast %121 : vector<1x16x30xf32> to vector<16x30xf32>
      %cst_117 = arith.constant dense<0.000000e+00> : vector<16x53xf32>
      %123 = tpu.matmul %122, %95, %cst_117 {dimension_numbers = #tpu.dot_dimension_numbers<[1], [0], [0], [1], [0, 0, 1, 1], [], []>} : vector<16x30xf32>, vector<30x53xf32>, vector<16x53xf32> -> vector<16x53xf32>
      %124 = arith.addf %120, %123 : vector<16x53xf32>
      %c3_118 = arith.constant 3 : index
      %c0_119 = arith.constant 0 : index
      %c0_120 = arith.constant 0 : index
      %125 = vector.load %arg2[%c3_118, %c0_119, %c0_120] : memref<5x16x30xf32, #tpu.memory_space<vmem>>, vector<1x16x30xf32>
      %126 = vector.shape_cast %125 : vector<1x16x30xf32> to vector<16x30xf32>
      %cst_121 = arith.constant dense<0.000000e+00> : vector<16x53xf32>
      %127 = tpu.matmul %126, %101, %cst_121 {dimension_numbers = #tpu.dot_dimension_numbers<[1], [0], [0], [1], [0, 0, 1, 1], [], []>} : vector<16x30xf32>, vector<30x53xf32>, vector<16x53xf32> -> vector<16x53xf32>
      %128 = arith.addf %124, %127 : vector<16x53xf32>
      %c4_122 = arith.constant 4 : index
      %c0_123 = arith.constant 0 : index
      %c0_124 = arith.constant 0 : index
      %129 = vector.load %arg2[%c4_122, %c0_123, %c0_124] : memref<5x16x30xf32, #tpu.memory_space<vmem>>, vector<1x16x30xf32>
      %130 = vector.shape_cast %129 : vector<1x16x30xf32> to vector<16x30xf32>
      %cst_125 = arith.constant dense<0.000000e+00> : vector<16x53xf32>
      %131 = tpu.matmul %130, %107, %cst_125 {dimension_numbers = #tpu.dot_dimension_numbers<[1], [0], [0], [1], [0, 0, 1, 1], [], []>} : vector<16x30xf32>, vector<30x53xf32>, vector<16x53xf32> -> vector<16x53xf32>
      %132 = arith.addf %128, %131 : vector<16x53xf32>
      %c0_126 = arith.constant 0 : index
      %c0_127 = arith.constant 0 : index
      %c0_128 = arith.constant 0 : index
      %133 = vector.load %arg2[%c0_126, %c0_127, %c0_128] : memref<5x16x30xf32, #tpu.memory_space<vmem>>, vector<1x16x30xf32>
      %134 = vector.shape_cast %133 : vector<1x16x30xf32> to vector<16x30xf32>
      %cst_129 = arith.constant dense<0.000000e+00> : vector<16x53xf32>
      %135 = tpu.matmul %134, %89, %cst_129 {dimension_numbers = #tpu.dot_dimension_numbers<[1], [0], [0], [1], [0, 0, 1, 1], [], []>} : vector<16x30xf32>, vector<30x53xf32>, vector<16x53xf32> -> vector<16x53xf32>
      %c1_130 = arith.constant 1 : index
      %c0_131 = arith.constant 0 : index
      %c0_132 = arith.constant 0 : index
      %136 = vector.load %arg2[%c1_130, %c0_131, %c0_132] : memref<5x16x30xf32, #tpu.memory_space<vmem>>, vector<1x16x30xf32>
      %137 = vector.shape_cast %136 : vector<1x16x30xf32> to vector<16x30xf32>
      %cst_133 = arith.constant dense<0.000000e+00> : vector<16x53xf32>
      %138 = tpu.matmul %137, %95, %cst_133 {dimension_numbers = #tpu.dot_dimension_numbers<[1], [0], [0], [1], [0, 0, 1, 1], [], []>} : vector<16x30xf32>, vector<30x53xf32>, vector<16x53xf32> -> vector<16x53xf32>
      %139 = arith.addf %135, %138 : vector<16x53xf32>
      %c2_134 = arith.constant 2 : index
      %c0_135 = arith.constant 0 : index
      %c0_136 = arith.constant 0 : index
      %140 = vector.load %arg2[%c2_134, %c0_135, %c0_136] : memref<5x16x30xf32, #tpu.memory_space<vmem>>, vector<1x16x30xf32>
      %141 = vector.shape_cast %140 : vector<1x16x30xf32> to vector<16x30xf32>
      %cst_137 = arith.constant dense<0.000000e+00> : vector<16x53xf32>
      %142 = tpu.matmul %141, %101, %cst_137 {dimension_numbers = #tpu.dot_dimension_numbers<[1], [0], [0], [1], [0, 0, 1, 1], [], []>} : vector<16x30xf32>, vector<30x53xf32>, vector<16x53xf32> -> vector<16x53xf32>
      %143 = arith.addf %139, %142 : vector<16x53xf32>
      %c3_138 = arith.constant 3 : index
      %c0_139 = arith.constant 0 : index
      %c0_140 = arith.constant 0 : index
      %144 = vector.load %arg2[%c3_138, %c0_139, %c0_140] : memref<5x16x30xf32, #tpu.memory_space<vmem>>, vector<1x16x30xf32>
      %145 = vector.shape_cast %144 : vector<1x16x30xf32> to vector<16x30xf32>
      %cst_141 = arith.constant dense<0.000000e+00> : vector<16x53xf32>
      %146 = tpu.matmul %145, %107, %cst_141 {dimension_numbers = #tpu.dot_dimension_numbers<[1], [0], [0], [1], [0, 0, 1, 1], [], []>} : vector<16x30xf32>, vector<30x53xf32>, vector<16x53xf32> -> vector<16x53xf32>
      %147 = arith.addf %143, %146 : vector<16x53xf32>
      %c4_142 = arith.constant 4 : index
      %c0_143 = arith.constant 0 : index
      %c0_144 = arith.constant 0 : index
      %148 = vector.load %arg2[%c4_142, %c0_143, %c0_144] : memref<5x16x30xf32, #tpu.memory_space<vmem>>, vector<1x16x30xf32>
      %149 = vector.shape_cast %148 : vector<1x16x30xf32> to vector<16x30xf32>
      %cst_145 = arith.constant dense<0.000000e+00> : vector<16x53xf32>
      %150 = tpu.matmul %149, %113, %cst_145 {dimension_numbers = #tpu.dot_dimension_numbers<[1], [0], [0], [1], [0, 0, 1, 1], [], []>} : vector<16x30xf32>, vector<30x53xf32>, vector<16x53xf32> -> vector<16x53xf32>
      %151 = arith.addf %147, %150 : vector<16x53xf32>
      %152 = arith.maximumf %58, %77 : vector<16x53xf32>
      %153 = arith.maximumf %132, %151 : vector<16x53xf32>
      %154 = arith.maximumf %152, %153 : vector<16x53xf32>
      %155 = vector.broadcast %0 : vector<16x1xf32> to vector<16x53xf32>
      %156 = arith.addf %154, %155 : vector<16x53xf32>
      %cst_146 = arith.constant 0.000000e+00 : f32
      %157 = vector.broadcast %cst_146 : f32 to vector<16x53xf32>
      %158 = arith.maximumf %156, %157 : vector<16x53xf32>
      %c0_147 = arith.constant 0 : index
      %159 = arith.index_cast %3 : i32 to index
      %c0_148 = arith.constant 0 : index
      %c0_149 = arith.constant 0 : index
      %160 = vector.load %arg4[%c0_147, %159, %c0_148, %c0_149] : memref<1x53x16x53xf32, #tpu.memory_space<vmem>>, vector<1x1x16x53xf32>
      %161 = vector.shape_cast %160 : vector<1x1x16x53xf32> to vector<16x53xf32>
      %162 = vector.shape_cast %158 : vector<16x53xf32> to vector<1x1x16x53xf32>
      tpu.vector_store %arg4[%c0_147, %159, %c0_148, %c0_149], %162 {strides = array<i32>} : memref<1x53x16x53xf32, #tpu.memory_space<vmem>>, vector<1x1x16x53xf32>,
    }
    %c53_i32_1 = arith.constant 53 : i32
    return
  }
  func.func @transform_0(%arg0: i32) -> (i32, i32, i32, i32) {
    %c0_i32 = arith.constant 0 : i32
    %c0_i32_0 = arith.constant 0 : i32
    %c0_i32_1 = arith.constant 0 : i32
    %c0_i32_2 = arith.constant 0 : i32
    return %arg0, %c0_i32, %c0_i32_0, %c0_i32_1 : i32, i32, i32, i32
  }
  func.func @transform_1(%arg0: i32) -> (i32, i32, i32) {
    %c0_i32 = arith.constant 0 : i32
    %c0_i32_0 = arith.constant 0 : i32
    %c0_i32_1 = arith.constant 0 : i32
    %c0_i32_2 = arith.constant 0 : i32
    return %c0_i32, %c0_i32_0, %c0_i32_1 : i32, i32, i32
  }
  func.func @transform_2(%arg0: i32) -> (i32, i32) {
    %c0_i32 = arith.constant 0 : i32
    %c0_i32_0 = arith.constant 0 : i32
    %c0_i32_1 = arith.constant 0 : i32
    return %c0_i32, %c0_i32_0 : i32, i32
  }
  func.func @transform_3(%arg0: i32) -> (i32, i32, i32, i32) {
    %c0_i32 = arith.constant 0 : i32
    %c0_i32_0 = arith.constant 0 : i32
    %c0_i32_1 = arith.constant 0 : i32
    %c0_i32_2 = arith.constant 0 : i32
    return %arg0, %c0_i32, %c0_i32_0, %c0_i32_1 : i32, i32, i32, i32
  }
}

module attributes {stable_mosaic.version = 11 : i64} {
  func.func @_fc_fused_kernel(%arg0: i32, %arg1: memref<2x5632xf32, #tpu.memory_space<vmem>>, %arg2: memref<5632x128xf32, #tpu.memory_space<vmem>>, %arg3: memref<1x128xf32, #tpu.memory_space<vmem>>, %arg4: memref<128x128xf32, #tpu.memory_space<vmem>>, %arg5: memref<1x128xf32, #tpu.memory_space<vmem>>, %arg6: memref<128x128xf32, #tpu.memory_space<vmem>>, %arg7: memref<1x128xf32, #tpu.memory_space<vmem>>, %arg8: memref<2x128xf32, #tpu.memory_space<vmem>>, %arg9: memref<2x128xf32, #tpu.memory_space<vmem>>) attributes {dimension_semantics = [#tpu.dimension_semantics<arbitrary>], iteration_bounds = array<i64: 8>, scalar_prefetch = 0 : i64, scratch_operands = 1 : i64, tpu.core_type = #tpu.core_type<tc>, window_params = [{transform_indices = @transform_0, window_bounds = array<i64: 2, 5632>}, {transform_indices = @transform_1, window_bounds = array<i64: 5632, 128>}, {pipeline_mode = #tpu.pipeline_mode<synchronous>, transform_indices = @transform_2, window_bounds = array<i64: 1, 128>}, {pipeline_mode = #tpu.pipeline_mode<synchronous>, transform_indices = @transform_3, window_bounds = array<i64: 128, 128>}, {pipeline_mode = #tpu.pipeline_mode<synchronous>, transform_indices = @transform_4, window_bounds = array<i64: 1, 128>}, {pipeline_mode = #tpu.pipeline_mode<synchronous>, transform_indices = @transform_5, window_bounds = array<i64: 128, 128>}, {pipeline_mode = #tpu.pipeline_mode<synchronous>, transform_indices = @transform_6, window_bounds = array<i64: 1, 128>}, {pipeline_mode = #tpu.pipeline_mode<synchronous>, transform_indices = @transform_7, window_bounds = array<i64: 2, 128>}]} {
    %c0_i32 = arith.constant 0 : i32
    %0 = arith.cmpi eq, %arg0, %c0_i32 : i32
    %1 = arith.extui %0 : i1 to i32
    %c0_i32_0 = arith.constant 0 : i32
    %2 = arith.cmpi ne, %1, %c0_i32_0 : i32
    scf.if %2 {
      %cst_9 = arith.constant 0.000000e+00 : f32
      %12 = vector.broadcast %cst_9 : f32 to vector<2x128xf32>
      %c0_10 = arith.constant 0 : index
      %c0_11 = arith.constant 0 : index
      %13 = vector.load %arg9[%c0_10, %c0_11] : memref<2x128xf32, #tpu.memory_space<vmem>>, vector<2x128xf32>
      tpu.vector_store %arg9[%c0_10, %c0_11], %12 {strides = array<i32>} : memref<2x128xf32, #tpu.memory_space<vmem>>, vector<2x128xf32>,
    } else {
    }
    %c0 = arith.constant 0 : index
    %c0_1 = arith.constant 0 : index
    %3 = vector.load %arg9[%c0, %c0_1] : memref<2x128xf32, #tpu.memory_space<vmem>>, vector<2x128xf32>
    %c0_2 = arith.constant 0 : index
    %c0_3 = arith.constant 0 : index
    %4 = vector.load %arg1[%c0_2, %c0_3] : memref<2x5632xf32, #tpu.memory_space<vmem>>, vector<2x5632xf32>
    %c0_4 = arith.constant 0 : index
    %c0_5 = arith.constant 0 : index
    %5 = vector.load %arg2[%c0_4, %c0_5] : memref<5632x128xf32, #tpu.memory_space<vmem>>, vector<5632x128xf32>
    %cst = arith.constant dense<0.000000e+00> : vector<2x128xf32>
    %6 = tpu.matmul %4, %5, %cst {dimension_numbers = #tpu.dot_dimension_numbers<[1], [0], [0], [1], [0, 0, 1, 1], [], []>} : vector<2x5632xf32>, vector<5632x128xf32>, vector<2x128xf32> -> vector<2x128xf32>
    %7 = arith.addf %3, %6 : vector<2x128xf32>
    %c0_6 = arith.constant 0 : index
    %c0_7 = arith.constant 0 : index
    %8 = vector.load %arg9[%c0_6, %c0_7] : memref<2x128xf32, #tpu.memory_space<vmem>>, vector<2x128xf32>
    tpu.vector_store %arg9[%c0_6, %c0_7], %7 {strides = array<i32>} : memref<2x128xf32, #tpu.memory_space<vmem>>, vector<2x128xf32>,
    %c7_i32 = arith.constant 7 : i32
    %9 = arith.cmpi eq, %arg0, %c7_i32 : i32
    %10 = arith.extui %9 : i1 to i32
    %c0_i32_8 = arith.constant 0 : i32
    %11 = arith.cmpi ne, %10, %c0_i32_8 : i32
    scf.if %11 {
      %c0_9 = arith.constant 0 : index
      %c0_10 = arith.constant 0 : index
      %12 = vector.load %arg9[%c0_9, %c0_10] : memref<2x128xf32, #tpu.memory_space<vmem>>, vector<2x128xf32>
      %c0_11 = arith.constant 0 : index
      %c0_12 = arith.constant 0 : index
      %13 = vector.load %arg3[%c0_11, %c0_12] : memref<1x128xf32, #tpu.memory_space<vmem>>, vector<1x128xf32>
      %14 = vector.broadcast %13 : vector<1x128xf32> to vector<2x128xf32>
      %15 = arith.addf %12, %14 : vector<2x128xf32>
      %cst_13 = arith.constant 0.000000e+00 : f32
      %16 = vector.broadcast %cst_13 : f32 to vector<2x128xf32>
      %17 = arith.maximumf %15, %16 : vector<2x128xf32>
      %c0_14 = arith.constant 0 : index
      %c0_15 = arith.constant 0 : index
      %18 = vector.load %arg4[%c0_14, %c0_15] : memref<128x128xf32, #tpu.memory_space<vmem>>, vector<128x128xf32>
      %cst_16 = arith.constant dense<0.000000e+00> : vector<2x128xf32>
      %19 = tpu.matmul %17, %18, %cst_16 {dimension_numbers = #tpu.dot_dimension_numbers<[1], [0], [0], [1], [0, 0, 1, 1], [], []>} : vector<2x128xf32>, vector<128x128xf32>, vector<2x128xf32> -> vector<2x128xf32>
      %c0_17 = arith.constant 0 : index
      %c0_18 = arith.constant 0 : index
      %20 = vector.load %arg5[%c0_17, %c0_18] : memref<1x128xf32, #tpu.memory_space<vmem>>, vector<1x128xf32>
      %21 = vector.broadcast %20 : vector<1x128xf32> to vector<2x128xf32>
      %22 = arith.addf %19, %21 : vector<2x128xf32>
      %cst_19 = arith.constant 0.000000e+00 : f32
      %23 = vector.broadcast %cst_19 : f32 to vector<2x128xf32>
      %24 = arith.maximumf %22, %23 : vector<2x128xf32>
      %c0_20 = arith.constant 0 : index
      %c0_21 = arith.constant 0 : index
      %25 = vector.load %arg6[%c0_20, %c0_21] : memref<128x128xf32, #tpu.memory_space<vmem>>, vector<128x128xf32>
      %cst_22 = arith.constant dense<0.000000e+00> : vector<2x128xf32>
      %26 = tpu.matmul %24, %25, %cst_22 {dimension_numbers = #tpu.dot_dimension_numbers<[1], [0], [0], [1], [0, 0, 1, 1], [], []>} : vector<2x128xf32>, vector<128x128xf32>, vector<2x128xf32> -> vector<2x128xf32>
      %c0_23 = arith.constant 0 : index
      %c0_24 = arith.constant 0 : index
      %27 = vector.load %arg7[%c0_23, %c0_24] : memref<1x128xf32, #tpu.memory_space<vmem>>, vector<1x128xf32>
      %28 = vector.broadcast %27 : vector<1x128xf32> to vector<2x128xf32>
      %29 = arith.addf %26, %28 : vector<2x128xf32>
      %c0_25 = arith.constant 0 : index
      %c0_26 = arith.constant 0 : index
      %30 = vector.load %arg8[%c0_25, %c0_26] : memref<2x128xf32, #tpu.memory_space<vmem>>, vector<2x128xf32>
      tpu.vector_store %arg8[%c0_25, %c0_26], %29 {strides = array<i32>} : memref<2x128xf32, #tpu.memory_space<vmem>>, vector<2x128xf32>,
    } else {
    }
    return
  }
  func.func @transform_0(%arg0: i32) -> (i32, i32) {
    %c0_i32 = arith.constant 0 : i32
    %c0_i32_0 = arith.constant 0 : i32
    return %c0_i32, %arg0 : i32, i32
  }
  func.func @transform_1(%arg0: i32) -> (i32, i32) {
    %c0_i32 = arith.constant 0 : i32
    %c0_i32_0 = arith.constant 0 : i32
    return %arg0, %c0_i32 : i32, i32
  }
  func.func @transform_2(%arg0: i32) -> (i32, i32) {
    %c0_i32 = arith.constant 0 : i32
    %c0_i32_0 = arith.constant 0 : i32
    %c0_i32_1 = arith.constant 0 : i32
    return %c0_i32, %c0_i32_0 : i32, i32
  }
  func.func @transform_3(%arg0: i32) -> (i32, i32) {
    %c0_i32 = arith.constant 0 : i32
    %c0_i32_0 = arith.constant 0 : i32
    %c0_i32_1 = arith.constant 0 : i32
    return %c0_i32, %c0_i32_0 : i32, i32
  }
  func.func @transform_4(%arg0: i32) -> (i32, i32) {
    %c0_i32 = arith.constant 0 : i32
    %c0_i32_0 = arith.constant 0 : i32
    %c0_i32_1 = arith.constant 0 : i32
    return %c0_i32, %c0_i32_0 : i32, i32
  }
  func.func @transform_5(%arg0: i32) -> (i32, i32) {
    %c0_i32 = arith.constant 0 : i32
    %c0_i32_0 = arith.constant 0 : i32
    %c0_i32_1 = arith.constant 0 : i32
    return %c0_i32, %c0_i32_0 : i32, i32
  }
  func.func @transform_6(%arg0: i32) -> (i32, i32) {
    %c0_i32 = arith.constant 0 : i32
    %c0_i32_0 = arith.constant 0 : i32
    %c0_i32_1 = arith.constant 0 : i32
    return %c0_i32, %c0_i32_0 : i32, i32
  }
  func.func @transform_7(%arg0: i32) -> (i32, i32) {
    %c0_i32 = arith.constant 0 : i32
    %c0_i32_0 = arith.constant 0 : i32
    %c0_i32_1 = arith.constant 0 : i32
    return %c0_i32, %c0_i32_0 : i32, i32
  }
}

</mosaic_0001>

<bundles_post_ra>
// kernel: lenet_forward.3
= control target key start
LH: loop header
LB: loop body
LE: loop exit
PB: predicated region body
PF: predicated region fallthrough
CT: control target
= control target key end

     0   :  { %s1003_s12 = smov 0   ;;  %s1147_s0 = inlined_call_operand.vmem [shape: f32[2,448,15,110], index: 0, kind: input, shape index: {}]   ;;  %s1148_s1 = inlined_call_operand.vmem [shape: f32[5,6,15], index: 1, kind: input, shape index: {}]   ;;  %s1149_s2 = inlined_call_operand.vmem [shape: f32[6,1], index: 2, kind: input, shape index: {}]   ;;  %s1150_s3 = inlined_call_operand.vmem [shape: f32[2,110,6,110], index: 3, kind: output, shape index: {}]  }
   0x1 LB: > { %s834_s13 = sadd.s32 4294967295, %s976_s12   ;;  %p838_p0 = scmp.ge.s32.totalorder %s976_s12, 1  ;;  %s976_s12 = sphi %s1003_s12, %s13_s12  }
   0x2   : > { %p137_p1 = scmp.lt.s32.totalorder %s976_s12, 3 }
   0x4   : > { %p138_p2 = pnand %p838_p0, %p137_p1 }
   0x5   : > { %p161_p3 = scmp.lt.s32.totalorder (!%p138_p2), %s834_s13, 1  ;;  %s1026_s24 = smov (!%p138_p2), 0  }
   0x6   : > { %141 = sbr.rel (%p138_p2) target bundleno = 200 (0xc8), region = 32 }
   0xb   : > { %v1014_v0 = vld [vmem:[%s1149_s2] sm:$0x3f]  ;;  %s1152_s13 = smov (!%p161_p3, %s834_s13), 1 }
   0xc   : > { %s946_s16 = smul.u32 7168, %s1152_s13 }
   0xd   : > { %s947_s17 = smul.u32 880, %s1152_s13 }
   0xe   : > { %s1019_s20 = scalar_lea.vmem %s1147_s0, %s946_s16 }
   0xf   : > { %s1024_s23 = scalar_lea.vmem %s1150_s3, %s947_s17 }
  0x10 LB: >> { %s934_s25 = sshll.u32 %s980_s24, 5  ;;  %vm215_vm0 = vcmask 1046528   ;;  %v1038_v1 = vld [vmem:[%s1148_s1 + $0x8] sm:$0x3f]  ;;  %vm211_vm1 = vcmask 121856   ;;  %v982_v30 = vmov 0   ;;  %s980_s24 = sphi %s1026_s24, %s177_s24  }
  0x11   : >> { %s1033_s26 = scalar_lea.vmem %s1019_s20, %s934_s25  ;;  %v1054_v9 = vld [vmem:[%s1148_s1 + $0x10] sm:$0x3f]  ;;  %v1059_v10 = vld [vmem:[%s1148_s1 + $0x18] sm:$0x3f]  ;;  %v1067_v12 = vld [vmem:[%s1148_s1] sm:$0x3f]  ;;  %965 = vset.pattern.permute.xlu0 %v982_v30 }
  0x12   : >> { %v846_v2 = vld [vmem:[%s1033_s26 + $0x18] sm:$0x7f]  ;;  %v850_v3 = vld [vmem:[%s1033_s26 + $0x28] sm:$0x7f]  ;;  %v845_v5 = vld [vmem:[%s1033_s26 + $0x10] sm:$0xff]  ;;  %717 = vperm.xlu0 %965, %v1014_v0   ;;  %s931_s10 = sshll.u32 %s980_s24, 3 }
  0x13   : >> { %v854_v4 = vld [vmem:[%s1033_s26 + $0x38] sm:$0x7f]  ;;  %864 = vmatpush.msk.msra.mxu0 %vm215_vm0, %v846_v2  ;;  %869 = vmatpush.msk.msra.mxu2 %vm215_vm0, %v850_v3  ;;  %v182_v6 = vld [vmem:[%s1033_s26 + $0x8] sm:$0x7f]  ;;  %v849_v7 = vld [vmem:[%s1033_s26 + $0x20] sm:$0xff]  ;;  %vm724_vm2 = vcmask 898048   ;;  %s723_s11 = scalar_lea.vmem %s1024_s23, %s931_s10 }
  0x14   : >> { %872 = vmatpush.msk.msra.mxu3 %vm215_vm0, %v854_v4  ;;  %866 = vmatpush.msk.msra.mxu1 %vm215_vm0, %v182_v6  ;;  %v853_v8 = vld [vmem:[%s1033_s26 + $0x30] sm:$0xff]  ;;  %v181_v11 = vld [vmem:[%s1033_s26] sm:$0xff]  ;;  %v858_v13 = vld [vmem:[%s1033_s26 + $0x48] sm:$0x7f]  ;;  %s177_s24 = sadd.s32 1, %s980_s24  }
  0x15   : >> { %234 = vmatpush.msra.mxu0 %v845_v5  ;;  %288 = vmatpush.msra.mxu2 %v849_v7  ;;  %v857_v14 = vld [vmem:[%s1033_s26 + $0x40] sm:$0xff]  ;;  %v894_v15 = vld [vmem:[%s1033_s26 + $0xe18] sm:$0x7f]  ;;  %v890_v17 = vld [vmem:[%s1033_s26 + $0xe08] sm:$0x7f]  ;;  %p174_p4 = scmp.ge.s32.totalorder %s177_s24, 110  }
  0x16   : >> { %317 = vmatpush.msra.mxu3 %v853_v8  ;;  %865 = vmatmul.msk.f32.vlgmr.msra.gmra.mxu0 %vm211_vm1, %v1038_v1  ;;  %v874_v16 = vld [vmem:[%s1148_s1 + $0x20] sm:$0x3f]  ;;  %v862_v18 = vld [vmem:[%s1033_s26 + $0x58] sm:$0x7f]  ;;  %v893_v19 = vld [vmem:[%s1033_s26 + $0xe10] sm:$0xff] }
  0x17   : >> { %870 = vmatmul.msk.f32.vlgmr.msra.gmra.mxu2 %vm211_vm1, %v1054_v9  ;;  %873 = vmatmul.msk.f32.vlgmr.msra.gmra.mxu3 %vm211_vm1, %v1059_v10  ;;  %v889_v20 = vld [vmem:[%s1033_s26 + $0xe00] sm:$0xff]  ;;  %v861_v21 = vld [vmem:[%s1033_s26 + $0x50] sm:$0xff]  ;;  %v906_v22 = vld [vmem:[%s1033_s26 + $0xe48] sm:$0x7f] }
  0x18   : >> { %879 = vmatpush.msk.msrb.mxu2 %vm215_vm0, %v846_v2  ;;  %260 = vmatpush.msra.mxu1 %v181_v11  ;;  %v898_v23 = vld [vmem:[%s1033_s26 + $0xe28] sm:$0x7f]  ;;  %v902_v24 = vld [vmem:[%s1033_s26 + $0xe38] sm:$0x7f]  ;;  %v905_v25 = vld [vmem:[%s1033_s26 + $0xe40] sm:$0xff] }
  0x19   : >> { %867 = vmatmul.msk.f32.vlgmr.msra.gmra.mxu1 %vm211_vm1, %v1067_v12  ;;  %875 = vmatpush.msk.msrb.mxu0 %vm215_vm0, %v858_v13  ;;  %v897_v26 = vld [vmem:[%s1033_s26 + $0xe20] sm:$0xff]  ;;  %v901_v27 = vld [vmem:[%s1033_s26 + $0xe30] sm:$0xff]  ;;  %v910_v28 = vld [vmem:[%s1033_s26 + $0xe58] sm:$0x7f] }
  0x1a   : >> { %881 = vmatpush.msk.msrb.mxu3 %vm215_vm0, %v854_v4  ;;  %877 = vmatpush.msk.msrb.mxu1 %vm215_vm0, %v850_v3  ;;  %v909_v29 = vld [vmem:[%s1033_s26 + $0xe50] sm:$0xff] }
  0x1b   : >> { %387 = vmatpush.msrb.mxu2 %v845_v5  ;;  %346 = vmatpush.msrb.mxu0 %v857_v14 }
  0x1c   : >> { %407 = vmatpush.msrb.mxu3 %v853_v8  ;;  %367 = vmatpush.msrb.mxu1 %v849_v7 }
  0x1d   : >> { %911 = vmatpush.msk.msra.mxu2 %vm215_vm0, %v894_v15  ;;  %883 = vmatpush.msk.msra.mxu0 %vm215_vm0, %v858_v13 }
  0x1e   : >> { %876 = vmatmul.msk.f32.vlgmr.msrb.gmra.mxu0 %vm211_vm1, %v874_v16  ;;  %913 = vmatpush.msk.msra.mxu3 %vm215_vm0, %v890_v17 }
  0x1f   : >> { %880 = vmatmul.msk.f32.vlgmr.msrb.gmra.mxu2 %vm211_vm1, %v1067_v12  ;;  %882 = vmatmul.msk.f32.vlgmr.msrb.gmra.mxu3 %vm211_vm1, %v1054_v9 }
  0x20   : >> { %885 = vmatpush.msk.msra.mxu1 %vm215_vm0, %v862_v18  ;;  %506 = vmatpush.msra.mxu2 %v893_v19 }
  0x21   : >> { %878 = vmatmul.msk.f32.vlgmr.msrb.gmra.mxu1 %vm211_vm1, %v1038_v1  ;;  %428 = vmatpush.msra.mxu0 %v857_v14 }
  0x22   : >> { %529 = vmatpush.msra.mxu3 %v889_v20  ;;  %452 = vmatpush.msra.mxu1 %v861_v21 }
  0x23   : >> { %919 = vmatpush.msk.msrb.mxu2 %vm215_vm0, %v906_v22  ;;  %915 = vmatpush.msk.msrb.mxu0 %vm215_vm0, %v898_v23 }
  0x24   : >> { %921 = vmatpush.msk.msrb.mxu3 %vm215_vm0, %v898_v23  ;;  %917 = vmatpush.msk.msrb.mxu1 %vm215_vm0, %v902_v24 }
  0x25   : >> { %600 = vmatpush.msrb.mxu2 %v905_v25  ;;  %552 = vmatpush.msrb.mxu0 %v897_v26 }
  0x26   : >> { %884 = vmatmul.msk.f32.vlgmr.msra.gmra.mxu0 %vm211_vm1, %v1059_v10  ;;  %621 = vmatpush.msrb.mxu3 %v897_v26 }
  0x27   : >> { %912 = vmatmul.msk.f32.vlgmr.msra.gmra.mxu2 %vm211_vm1, %v1038_v1  ;;  %914 = vmatmul.msk.f32.vlgmr.msra.gmra.mxu3 %vm211_vm1, %v1067_v12 }
  0x28   : >> { %576 = vmatpush.msrb.mxu1 %v901_v27  ;;  %927 = vmatpush.msk.msra.mxu2 %vm215_vm0, %v906_v22 }
  0x29   : >> { %886 = vmatmul.msk.f32.vlgmr.msra.gmra.mxu1 %vm211_vm1, %v874_v16  ;;  %923 = vmatpush.msk.msra.mxu0 %vm215_vm0, %v894_v15 }
  0x2a   : >> { %929 = vmatpush.msk.msra.mxu3 %vm215_vm0, %v910_v28  ;;  %925 = vmatpush.msk.msra.mxu1 %vm215_vm0, %v902_v24 }
  0x2b   : >> { %682 = vmatpush.msra.mxu2 %v905_v25  ;;  %641 = vmatpush.msra.mxu0 %v893_v19 }
  0x2c   : >> { %706 = vmatpush.msra.mxu3 %v909_v29  ;;  %661 = vmatpush.msra.mxu1 %v901_v27 }
  0x2e   : >> { %916 = vmatmul.msk.f32.vlgmr.msrb.gmra.mxu0 %vm211_vm1, %v1054_v9 }
  0x2f   : >> { %920 = vmatmul.msk.f32.vlgmr.msrb.gmra.mxu2 %vm211_vm1, %v874_v16  ;;  %922 = vmatmul.msk.f32.vlgmr.msrb.gmra.mxu3 %vm211_vm1, %v1038_v1 }
  0x31   : >> { %918 = vmatmul.msk.f32.vlgmr.msrb.gmra.mxu1 %vm211_vm1, %v1059_v10 }
  0x36   : >> { %924 = vmatmul.msk.f32.vlgmr.msra.gmra.mxu0 %vm211_vm1, %v1067_v12 }
  0x37   : >> { %928 = vmatmul.msk.f32.vlgmr.msra.gmra.mxu2 %vm211_vm1, %v1059_v10  ;;  %930 = vmatmul.msk.f32.vlgmr.msra.gmra.mxu3 %vm211_vm1, %v874_v16 }
  0x39   : >> { %926 = vmatmul.msk.f32.vlgmr.msra.gmra.mxu1 %vm211_vm1, %v1054_v9 }
  0x84   : >> { %v718_v6 = vpop.permute.xlu0 %717 }
  0x93   : >> { %v236_v31 = vpop.f32.mrf.mxu0 }
  0x96   : >> { %v262_v32 = vpop.f32.mrf.mxu1 }
  0x97   : >> { %v263_v48 = vadd.f32 %v262_v32, %v236_v31 }
  0x9a   : >> { %v290_v33 = vpop.f32.mrf.mxu2  ;;  %v319_v34 = vpop.f32.mrf.mxu3 }
  0x9b   : >> { %v348_v35 = vpop.f32.mrf.mxu0  ;;  %v293_v52 = vadd.f32 %v290_v33, %v263_v48 }
  0x9d   : >> { %v322_v57 = vadd.f32 %v319_v34, %v293_v52 }
  0x9e   : >> { %v369_v36 = vpop.f32.mrf.mxu1 }
  0x9f   : >> { %v351_v1 = vadd.f32 %v348_v35, %v322_v57 }
  0xa2   : >> { %v389_v37 = vpop.f32.mrf.mxu2  ;;  %v409_v38 = vpop.f32.mrf.mxu3 }
  0xa3   : >> { %v430_v39 = vpop.f32.mrf.mxu0  ;;  %v390_v45 = vadd.f32 %v389_v37, %v369_v36 }
  0xa5   : >> { %v412_v49 = vadd.f32 %v409_v38, %v390_v45 }
  0xa6   : >> { %v454_v40 = vpop.f32.mrf.mxu1 }
  0xa7   : >> { %v433_v55 = vadd.f32 %v430_v39, %v412_v49 }
  0xa9   : >> { %v457_v61 = vadd.f32 %v454_v40, %v433_v55 }
  0xaa   : >> { %v508_v41 = vpop.f32.mrf.mxu2  ;;  %v531_v42 = vpop.f32.mrf.mxu3 }
  0xab   : >> { %v554_v43 = vpop.f32.mrf.mxu0  ;;  %v532_v50 = vadd.f32 %v531_v42, %v508_v41  ;;  %v712_v4 = vmax.f32 %v351_v1, %v457_v61 }
  0xad   : >> { %v557_v56 = vadd.f32 %v554_v43, %v532_v50 }
  0xae   : >> { %v578_v44 = vpop.f32.mrf.mxu1 }
  0xaf   : >> { %v581_v62 = vadd.f32 %v578_v44, %v557_v56 }
  0xb2   : >> { %v602_v46 = vpop.f32.mrf.mxu2  ;;  %v623_v47 = vpop.f32.mrf.mxu3 }
  0xb3   : >> { %v643_v51 = vpop.f32.mrf.mxu0  ;;  %v605_v2 = vadd.f32 %v602_v46, %v581_v62 }
  0xb4   : >> { %v644_v53 = vadd.f32 %v643_v51, %v623_v47 }
  0xb6   : >> { %v663_v54 = vpop.f32.mrf.mxu1 }
  0xb7   : >> { %v666_v58 = vadd.f32 %v663_v54, %v644_v53 }
  0xba   : >> { %v684_v59 = vpop.f32.mrf.mxu2  ;;  %v708_v60 = vpop.f32.mrf.mxu3 }
  0xbb   : >> { %v687_v63 = vadd.f32 %v684_v59, %v666_v58 }
  0xbd   : >> { %v711_v3 = vadd.f32 %v708_v60, %v687_v63 }
  0xbf   : >> { %v713_v5 = vmax.f32 %v605_v2, %v711_v3 }
  0xc1   : >> { %v714_v7 = vmax.f32 %v712_v4, %v713_v5 }
  0xc3   : >> { %v720_v8 = vadd.f32 %v718_v6, %v714_v7  ;;  %176 = sbr.rel (!%p174_p4) target bundleno = 16 (0x10), region = 86 }
  0xc5   : >> { %v721_v9 = vmax.f32 %v720_v8, 0.0 }
  0xc7   : >> { %725 = vst.msk [vmem:[%s723_s11] sm:$0x3f] %vm724_vm2, %v721_v9 }
  0xc8 PF: > { %s13_s12 = sadd.s32 1, %s976_s12  }
  0xc9   : > { %p10_p5 = scmp.ge.s32.totalorder %s13_s12, 4  }
  0xcb   :  { %12 = sbr.rel (!%p10_p5) target bundleno = 1 (0x1), region = 97 }

// kernel: lenet_forward.4
= control target key start
LH: loop header
LB: loop body
LE: loop exit
PB: predicated region body
PF: predicated region fallthrough
CT: control target
= control target key end

     0   :  { %s1177_s12 = smov 0   ;;  %s1441_s0 = inlined_call_operand.vmem [shape: f32[2,220,30,53], index: 0, kind: input, shape index: {}]   ;;  %s1442_s1 = inlined_call_operand.vmem [shape: f32[5,16,30], index: 1, kind: input, shape index: {}]   ;;  %s1443_s2 = inlined_call_operand.vmem [shape: f32[16,1], index: 2, kind: input, shape index: {}]   ;;  %s1444_s3 = inlined_call_operand.vmem [shape: f32[2,53,16,53], index: 3, kind: output, shape index: {}]  }
   0x1 LB: > { %s962_s13 = sadd.s32 4294967295, %s1150_s12   ;;  %p966_p0 = scmp.ge.s32.totalorder %s1150_s12, 1  ;;  %s1150_s12 = sphi %s1177_s12, %s13_s12  }
   0x2   : > { %p137_p1 = scmp.lt.s32.totalorder %s1150_s12, 3 }
   0x4   : > { %p138_p2 = pnand %p966_p0, %p137_p1 }
   0x5   : > { %p161_p3 = scmp.lt.s32.totalorder (!%p138_p2), %s962_s13, 1  ;;  %s1205_s26 = smov (!%p138_p2), 0  }
   0x6   : > { %141 = sbr.rel (%p138_p2) target bundleno = 245 (0xf5), region = 32 }
   0xb   : > { %v1188_v0 = vld [vmem:[%s1443_s2] sm:$0xff]  ;;  %v1193_v1 = vld [vmem:[%s1443_s2 + $0x8] sm:$0xff]  ;;  %s1446_s13 = smov (!%p161_p3, %s962_s13), 1 }
   0xc   : > { %s1120_s18 = smul.u32 7040, %s1446_s13 }
   0xd   : > { %s1121_s19 = smul.u32 848, %s1446_s13 }
   0xe   : > { %s1198_s22 = scalar_lea.vmem %s1441_s0, %s1120_s18 }
   0xf   : > { %s1203_s25 = scalar_lea.vmem %s1444_s3, %s1121_s19 }
  0x10 LB: >> { %s1108_s27 = sshll.u32 %s1154_s26, 6  ;;  %vm233_vm0 = vcmask 1045504   ;;  %v1236_v17 = vld [vmem:[%s1442_s1 + $0x10] sm:$0xff]  ;;  %vm226_vm1 = vcmask 244736   ;;  %v1241_v18 = vld [vmem:[%s1442_s1 + $0x20] sm:$0xff]  ;;  %v1272_v25 = vld [vmem:[%s1442_s1 + $0x18] sm:$0xff]  ;;  %s1154_s26 = sphi %s1205_s26, %s178_s26  }
  0x11   : >> { %s1212_s28 = scalar_lea.vmem %s1198_s22, %s1108_s27  ;;  %v1246_v19 = vld [vmem:[%s1442_s1 + $0x30] sm:$0xff]  ;;  %v1254_v21 = vld [vmem:[%s1442_s1] sm:$0xff]  ;;  %v1277_v26 = vld [vmem:[%s1442_s1 + $0x28] sm:$0xff]  ;;  %v1156_v60 = vmov 0   ;;  %s1105_s24 = sshll.u32 %s1154_s26, 4  ;;  %vm851_vm2 = vcmask 433152  }
  0x12   : >> { %v976_v2 = vld [vmem:[%s1212_s28 + $0x38] sm:$0x3f]  ;;  %v975_v5 = vld [vmem:[%s1212_s28 + $0x30] sm:$0xff]  ;;  %v974_v9 = vld [vmem:[%s1212_s28 + $0x28] sm:$0xff]  ;;  %1139 = vset.pattern.permute.xlu0 %v1156_v60  ;;  %s850_s27 = scalar_lea.vmem %s1203_s25, %s1105_s24  ;;  %s178_s26 = sadd.s32 1, %s1154_s26  }
  0x13   : >> { %v982_v3 = vld [vmem:[%s1212_s28 + $0x58] sm:$0x3f]  ;;  %1003 = vmatpush.msk.msra.mxu0 %vm233_vm0, %v976_v2  ;;  %v981_v7 = vld [vmem:[%s1212_s28 + $0x50] sm:$0xff]  ;;  %v980_v11 = vld [vmem:[%s1212_s28 + $0x48] sm:$0xff]  ;;  %837 = vperm.xlu0 %1139, %v1188_v0   ;;  %p175_p4 = scmp.ge.s32.totalorder %s178_s26, 53  }
  0x14   : >> { %v988_v4 = vld [vmem:[%s1212_s28 + $0x78] sm:$0x3f]  ;;  %1011 = vmatpush.msk.msra.mxu2 %vm233_vm0, %v982_v3  ;;  %v987_v8 = vld [vmem:[%s1212_s28 + $0x70] sm:$0xff]  ;;  %v986_v12 = vld [vmem:[%s1212_s28 + $0x68] sm:$0xff] }
  0x15   : >> { %v185_v6 = vld [vmem:[%s1212_s28 + $0x18] sm:$0x3f]  ;;  %1016 = vmatpush.msk.msra.mxu3 %vm233_vm0, %v988_v4  ;;  %v184_v10 = vld [vmem:[%s1212_s28 + $0x10] sm:$0xff]  ;;  %250 = vmatpush.msra.mxu0 %v975_v5  ;;  %v973_v13 = vld [vmem:[%s1212_s28 + $0x20] sm:$0xff] }
  0x16   : >> { %1006 = vmatpush.msk.msra.mxu1 %vm233_vm0, %v185_v6  ;;  %317 = vmatpush.msra.mxu2 %v981_v7  ;;  %v183_v14 = vld [vmem:[%s1212_s28 + $0x8] sm:$0xff]  ;;  %v979_v15 = vld [vmem:[%s1212_s28 + $0x40] sm:$0xff]  ;;  %v994_v22 = vld [vmem:[%s1212_s28 + $0x98] sm:$0x3f] }
  0x17   : >> { %354 = vmatpush.msra.mxu3 %v987_v8  ;;  %251 = vmatpush.msra.mxu0 %v974_v9  ;;  %v985_v16 = vld [vmem:[%s1212_s28 + $0x60] sm:$0xff]  ;;  %v993_v23 = vld [vmem:[%s1212_s28 + $0x90] sm:$0xff]  ;;  %v992_v24 = vld [vmem:[%s1212_s28 + $0x88] sm:$0xff] }
  0x18   : >> { %282 = vmatpush.msra.mxu1 %v184_v10  ;;  %318 = vmatpush.msra.mxu2 %v980_v11  ;;  %v182_v20 = vld [vmem:[%s1212_s28] sm:$0xff]  ;;  %v1282_v27 = vld [vmem:[%s1442_s1 + $0x38] sm:$0xff]  ;;  %v1289_v28 = vld [vmem:[%s1442_s1 + $0x8] sm:$0xff] }
  0x19   : >> { %355 = vmatpush.msra.mxu3 %v986_v12  ;;  %252 = vmatpush.msra.mxu0 %v973_v13  ;;  %v991_v29 = vld [vmem:[%s1212_s28 + $0x80] sm:$0xff]  ;;  %v1297_v30 = vld [vmem:[%s1212_s28 + $0xdf8] sm:$0x3f]  ;;  %v1304_v33 = vld [vmem:[%s1212_s28 + $0xdf0] sm:$0xff] }
  0x1a   : >> { %283 = vmatpush.msra.mxu1 %v183_v14  ;;  %319 = vmatpush.msra.mxu2 %v979_v15  ;;  %v1044_v31 = vld [vmem:[%s1212_s28 + $0xdd8] sm:$0x3f]  ;;  %v1309_v34 = vld [vmem:[%s1442_s1 + $0x40] sm:$0xff]  ;;  %v1043_v35 = vld [vmem:[%s1212_s28 + $0xdd0] sm:$0xff] }
  0x1b   : >> { %356 = vmatpush.msra.mxu3 %v985_v16  ;;  %1004 = vmatmul.msk.f32.vlgmr.msra.gmra.mxu0 %vm226_vm1, %v1236_v17  ;;  %v1000_v32 = vld [vmem:[%s1212_s28 + $0xb8] sm:$0x3f]  ;;  %v999_v36 = vld [vmem:[%s1212_s28 + $0xb0] sm:$0xff]  ;;  %v1320_v37 = vld [vmem:[%s1212_s28 + $0xde8] sm:$0xff] }
  0x1c   : >> { %1012 = vmatmul.msk.f32.vlgmr.msra.gmra.mxu2 %vm226_vm1, %v1241_v18  ;;  %1017 = vmatmul.msk.f32.vlgmr.msra.gmra.mxu3 %vm226_vm1, %v1246_v19  ;;  %v1042_v38 = vld [vmem:[%s1212_s28 + $0xdc8] sm:$0xff]  ;;  %v1332_v40 = vld [vmem:[%s1212_s28 + $0xde0] sm:$0xff]  ;;  %v1068_v43 = vld [vmem:[%s1212_s28 + $0xe58] sm:$0x3f] }
  0x1d   : >> { %1027 = vmatpush.msk.msrb.mxu2 %vm233_vm0, %v976_v2  ;;  %284 = vmatpush.msra.mxu1 %v182_v20  ;;  %v998_v39 = vld [vmem:[%s1212_s28 + $0xa8] sm:$0xff]  ;;  %v1041_v41 = vld [vmem:[%s1212_s28 + $0xdc0] sm:$0xff]  ;;  %v1056_v44 = vld [vmem:[%s1212_s28 + $0xe18] sm:$0x3f] }
  0x1e   : >> { %1007 = vmatmul.msk.f32.vlgmr.msra.gmra.mxu1 %vm226_vm1, %v1254_v21  ;;  %1021 = vmatpush.msk.msrb.mxu0 %vm233_vm0, %v994_v22  ;;  %v997_v42 = vld [vmem:[%s1212_s28 + $0xa0] sm:$0xff]  ;;  %v1343_v45 = vld [vmem:[%s1442_s1 + $0x48] sm:$0xff]  ;;  %v1062_v46 = vld [vmem:[%s1212_s28 + $0xe38] sm:$0x3f] }
  0x1f   : >> { %1030 = vmatpush.msk.msrb.mxu3 %vm233_vm0, %v988_v4  ;;  %1024 = vmatpush.msk.msrb.mxu1 %vm233_vm0, %v982_v3  ;;  %v1067_v47 = vld [vmem:[%s1212_s28 + $0xe50] sm:$0xff]  ;;  %v1066_v50 = vld [vmem:[%s1212_s28 + $0xe48] sm:$0xff]  ;;  %v1065_v53 = vld [vmem:[%s1212_s28 + $0xe40] sm:$0xff] }
  0x20   : >> { %439 = vmatpush.msrb.mxu2 %v975_v5  ;;  %391 = vmatpush.msrb.mxu0 %v993_v23  ;;  %v1055_v48 = vld [vmem:[%s1212_s28 + $0xe10] sm:$0xff]  ;;  %v1054_v51 = vld [vmem:[%s1212_s28 + $0xe08] sm:$0xff]  ;;  %v1053_v54 = vld [vmem:[%s1212_s28 + $0xe00] sm:$0xff] }
  0x21   : >> { %462 = vmatpush.msrb.mxu3 %v987_v8  ;;  %416 = vmatpush.msrb.mxu1 %v981_v7  ;;  %v1061_v49 = vld [vmem:[%s1212_s28 + $0xe30] sm:$0xff]  ;;  %v1060_v52 = vld [vmem:[%s1212_s28 + $0xe28] sm:$0xff]  ;;  %v1059_v55 = vld [vmem:[%s1212_s28 + $0xe20] sm:$0xff] }
  0x22   : >> { %440 = vmatpush.msrb.mxu2 %v974_v9  ;;  %392 = vmatpush.msrb.mxu0 %v992_v24  ;;  %v1074_v56 = vld [vmem:[%s1212_s28 + $0xe78] sm:$0x3f]  ;;  %v1073_v57 = vld [vmem:[%s1212_s28 + $0xe70] sm:$0xff]  ;;  %v1072_v58 = vld [vmem:[%s1212_s28 + $0xe68] sm:$0xff] }
  0x23   : >> { %1005 = vmatmul.msk.f32.gmra.mxu0 %vm226_vm1, %v1272_v25  ;;  %463 = vmatpush.msrb.mxu3 %v986_v12  ;;  %v1071_v59 = vld [vmem:[%s1212_s28 + $0xe60] sm:$0xff] }
  0x24   : >> { %1013 = vmatmul.msk.f32.gmra.mxu2 %vm226_vm1, %v1277_v26  ;;  %1018 = vmatmul.msk.f32.gmra.mxu3 %vm226_vm1, %v1282_v27 }
  0x25   : >> { %417 = vmatpush.msrb.mxu1 %v980_v11  ;;  %441 = vmatpush.msrb.mxu2 %v973_v13 }
  0x26   : >> { %1008 = vmatmul.msk.f32.gmra.mxu1 %vm226_vm1, %v1289_v28  ;;  %393 = vmatpush.msrb.mxu0 %v991_v29 }
  0x27   : >> { %464 = vmatpush.msrb.mxu3 %v985_v16  ;;  %418 = vmatpush.msrb.mxu1 %v979_v15 }
  0x28   : >> { %1075 = vmatpush.msk.msra.mxu2 %vm233_vm0, %v1297_v30  ;;  %1033 = vmatpush.msk.msra.mxu0 %vm233_vm0, %v994_v22 }
  0x29   : >> { %1078 = vmatpush.msk.msra.mxu3 %vm233_vm0, %v1044_v31  ;;  %1036 = vmatpush.msk.msra.mxu1 %vm233_vm0, %v1000_v32 }
  0x2a   : >> { %585 = vmatpush.msra.mxu2 %v1304_v33  ;;  %487 = vmatpush.msra.mxu0 %v993_v23 }
  0x2b   : >> { %1022 = vmatmul.msk.f32.vlgmr.msrb.gmra.mxu0 %vm226_vm1, %v1309_v34  ;;  %611 = vmatpush.msra.mxu3 %v1043_v35 }
  0x2c   : >> { %1028 = vmatmul.msk.f32.vlgmr.msrb.gmra.mxu2 %vm226_vm1, %v1254_v21  ;;  %1031 = vmatmul.msk.f32.vlgmr.msrb.gmra.mxu3 %vm226_vm1, %v1241_v18 }
  0x2d   : >> { %515 = vmatpush.msra.mxu1 %v999_v36  ;;  %586 = vmatpush.msra.mxu2 %v1320_v37 }
  0x2e   : >> { %1025 = vmatmul.msk.f32.vlgmr.msrb.gmra.mxu1 %vm226_vm1, %v1236_v17  ;;  %488 = vmatpush.msra.mxu0 %v992_v24 }
  0x2f   : >> { %612 = vmatpush.msra.mxu3 %v1042_v38  ;;  %516 = vmatpush.msra.mxu1 %v998_v39 }
  0x30   : >> { %587 = vmatpush.msra.mxu2 %v1332_v40  ;;  %489 = vmatpush.msra.mxu0 %v991_v29 }
  0x31   : >> { %613 = vmatpush.msra.mxu3 %v1041_v41  ;;  %517 = vmatpush.msra.mxu1 %v997_v42 }
  0x32   : >> { %1087 = vmatpush.msk.msrb.mxu2 %vm233_vm0, %v1068_v43  ;;  %1081 = vmatpush.msk.msrb.mxu0 %vm233_vm0, %v1056_v44 }
  0x33   : >> { %1023 = vmatmul.msk.f32.gmra.mxu0 %vm226_vm1, %v1343_v45  ;;  %1090 = vmatpush.msk.msrb.mxu3 %vm233_vm0, %v1056_v44 }
  0x34   : >> { %1029 = vmatmul.msk.f32.gmra.mxu2 %vm226_vm1, %v1289_v28  ;;  %1032 = vmatmul.msk.f32.gmra.mxu3 %vm226_vm1, %v1277_v26 }
  0x35   : >> { %1084 = vmatpush.msk.msrb.mxu1 %vm233_vm0, %v1062_v46  ;;  %693 = vmatpush.msrb.mxu2 %v1067_v47 }
  0x36   : >> { %1026 = vmatmul.msk.f32.gmra.mxu1 %vm226_vm1, %v1272_v25  ;;  %637 = vmatpush.msrb.mxu0 %v1055_v48 }
  0x37   : >> { %718 = vmatpush.msrb.mxu3 %v1055_v48  ;;  %665 = vmatpush.msrb.mxu1 %v1061_v49 }
  0x38   : >> { %694 = vmatpush.msrb.mxu2 %v1066_v50  ;;  %638 = vmatpush.msrb.mxu0 %v1054_v51 }
  0x39   : >> { %719 = vmatpush.msrb.mxu3 %v1054_v51  ;;  %666 = vmatpush.msrb.mxu1 %v1060_v52 }
  0x3a   : >> { %695 = vmatpush.msrb.mxu2 %v1065_v53  ;;  %639 = vmatpush.msrb.mxu0 %v1053_v54 }
  0x3b   : >> { %1034 = vmatmul.msk.f32.vlgmr.msra.gmra.mxu0 %vm226_vm1, %v1246_v19  ;;  %720 = vmatpush.msrb.mxu3 %v1053_v54 }
  0x3c   : >> { %1076 = vmatmul.msk.f32.vlgmr.msra.gmra.mxu2 %vm226_vm1, %v1236_v17  ;;  %1079 = vmatmul.msk.f32.vlgmr.msra.gmra.mxu3 %vm226_vm1, %v1254_v21 }
  0x3d   : >> { %667 = vmatpush.msrb.mxu1 %v1059_v55  ;;  %1099 = vmatpush.msk.msra.mxu2 %vm233_vm0, %v1068_v43 }
  0x3e   : >> { %1037 = vmatmul.msk.f32.vlgmr.msra.gmra.mxu1 %vm226_vm1, %v1309_v34  ;;  %1093 = vmatpush.msk.msra.mxu0 %vm233_vm0, %v1297_v30 }
  0x3f   : >> { %1102 = vmatpush.msk.msra.mxu3 %vm233_vm0, %v1074_v56  ;;  %1096 = vmatpush.msk.msra.mxu1 %vm233_vm0, %v1062_v46 }
  0x40   : >> { %789 = vmatpush.msra.mxu2 %v1067_v47  ;;  %741 = vmatpush.msra.mxu0 %v1304_v33 }
  0x41   : >> { %817 = vmatpush.msra.mxu3 %v1073_v57  ;;  %764 = vmatpush.msra.mxu1 %v1061_v49 }
  0x42   : >> { %790 = vmatpush.msra.mxu2 %v1066_v50  ;;  %742 = vmatpush.msra.mxu0 %v1320_v37 }
  0x43   : >> { %1035 = vmatmul.msk.f32.gmra.mxu0 %vm226_vm1, %v1282_v27  ;;  %818 = vmatpush.msra.mxu3 %v1072_v58 }
  0x44   : >> { %1077 = vmatmul.msk.f32.gmra.mxu2 %vm226_vm1, %v1272_v25  ;;  %1080 = vmatmul.msk.f32.gmra.mxu3 %vm226_vm1, %v1289_v28 }
  0x45   : >> { %765 = vmatpush.msra.mxu1 %v1060_v52  ;;  %791 = vmatpush.msra.mxu2 %v1065_v53 }
  0x46   : >> { %1038 = vmatmul.msk.f32.gmra.mxu1 %vm226_vm1, %v1343_v45  ;;  %743 = vmatpush.msra.mxu0 %v1332_v40 }
  0x47   : >> { %819 = vmatpush.msra.mxu3 %v1071_v59  ;;  %766 = vmatpush.msra.mxu1 %v1059_v55 }
  0x48   : >> { %842 = vperm.xlu0 %1139, %v1193_v1  }
  0x4b   : >> { %1082 = vmatmul.msk.f32.vlgmr.msrb.gmra.mxu0 %vm226_vm1, %v1241_v18 }
  0x4c   : >> { %1088 = vmatmul.msk.f32.vlgmr.msrb.gmra.mxu2 %vm226_vm1, %v1309_v34  ;;  %1091 = vmatmul.msk.f32.vlgmr.msrb.gmra.mxu3 %vm226_vm1, %v1236_v17 }
  0x4e   : >> { %1085 = vmatmul.msk.f32.vlgmr.msrb.gmra.mxu1 %vm226_vm1, %v1246_v19 }
  0x53   : >> { %1083 = vmatmul.msk.f32.gmra.mxu0 %vm226_vm1, %v1277_v26 }
  0x54   : >> { %1089 = vmatmul.msk.f32.gmra.mxu2 %vm226_vm1, %v1343_v45  ;;  %1092 = vmatmul.msk.f32.gmra.mxu3 %vm226_vm1, %v1272_v25 }
  0x56   : >> { %1086 = vmatmul.msk.f32.gmra.mxu1 %vm226_vm1, %v1282_v27 }
  0x5b   : >> { %1094 = vmatmul.msk.f32.vlgmr.msra.gmra.mxu0 %vm226_vm1, %v1254_v21 }
  0x5c   : >> { %1100 = vmatmul.msk.f32.vlgmr.msra.gmra.mxu2 %vm226_vm1, %v1246_v19  ;;  %1103 = vmatmul.msk.f32.vlgmr.msra.gmra.mxu3 %vm226_vm1, %v1309_v34 }
  0x5e   : >> { %1097 = vmatmul.msk.f32.vlgmr.msra.gmra.mxu1 %vm226_vm1, %v1241_v18 }
  0x63   : >> { %1095 = vmatmul.msk.f32.gmra.mxu0 %vm226_vm1, %v1289_v28 }
  0x64   : >> { %1101 = vmatmul.msk.f32.gmra.mxu2 %vm226_vm1, %v1282_v27  ;;  %1104 = vmatmul.msk.f32.gmra.mxu3 %vm226_vm1, %v1343_v45 }
  0x66   : >> { %1098 = vmatmul.msk.f32.gmra.mxu1 %vm226_vm1, %v1277_v26 }
  0x98   : >> { %v254_v61 = vpop.f32.mrf.mxu0 }
  0x9b   : >> { %v286_v62 = vpop.f32.mrf.mxu1 }
  0x9c   : >> { %v287_v33 = vadd.f32 %v286_v62, %v254_v61 }
  0x9f   : >> { %v321_v63 = vpop.f32.mrf.mxu2  ;;  %v358_v2 = vpop.f32.mrf.mxu3 }
  0xa0   : >> { %v257_v3 = vpop.f32.mrf.mxu0  ;;  %v327_v37 = vadd.f32 %v321_v63, %v287_v33  ;;  %v838_v63 = vpop.permute.xlu0 %837 }
  0xa2   : >> { %v364_v43 = vadd.f32 %v358_v2, %v327_v37 }
  0xa3   : >> { %v289_v4 = vpop.f32.mrf.mxu1 }
  0xa4   : >> { %v290_v50 = vadd.f32 %v289_v4, %v257_v3 }
  0xa7   : >> { %v324_v5 = vpop.f32.mrf.mxu2  ;;  %v361_v6 = vpop.f32.mrf.mxu3 }
  0xa8   : >> { %v395_v7 = vpop.f32.mrf.mxu0  ;;  %v328_v57 = vadd.f32 %v324_v5, %v290_v50 }
  0xa9   : >> { %v401_v51 = vadd.f32 %v395_v7, %v364_v43 }
  0xab   : >> { %v420_v8 = vpop.f32.mrf.mxu1 }
  0xaf   : >> { %v443_v9 = vpop.f32.mrf.mxu2  ;;  %v466_v10 = vpop.f32.mrf.mxu3 }
  0xb0   : >> { %v1430_v11 = vpop.f32.mrf.mxu0  ;;  %v444_v29 = vadd.f32 %v443_v9, %v420_v8  ;;  %v365_v9 = vadd.f32 %v361_v6, %v328_v57 }
  0xb2   : >> { %v472_v34 = vadd.f32 %v466_v10, %v444_v29  ;;  %v402_v5 = vadd.f32 %v1430_v11, %v365_v9 }
  0xb3   : >> { %v423_v12 = vpop.f32.mrf.mxu1 }
  0xb7   : >> { %v446_v13 = vpop.f32.mrf.mxu2  ;;  %v469_v14 = vpop.f32.mrf.mxu3 }
  0xb8   : >> { %v491_v15 = vpop.f32.mrf.mxu0  ;;  %v447_v41 = vadd.f32 %v446_v13, %v423_v12 }
  0xb9   : >> { %v497_v39 = vadd.f32 %v491_v15, %v472_v34 }
  0xba   : >> { %v473_v52 = vadd.f32 %v469_v14, %v447_v41 }
  0xbb   : >> { %v519_v16 = vpop.f32.mrf.mxu1 }
  0xbc   : >> { %v525_v46 = vadd.f32 %v519_v16, %v497_v39 }
  0xbe   : >> { %v829_v59 = vmax.f32 %v401_v51, %v525_v46 }
  0xbf   : >> { %v589_v17 = vpop.f32.mrf.mxu2  ;;  %v615_v18 = vpop.f32.mrf.mxu3 }
  0xc0   : >> { %v494_v19 = vpop.f32.mrf.mxu0  ;;  %v616_v35 = vadd.f32 %v615_v18, %v589_v17 }
  0xc1   : >> { %v498_v60 = vadd.f32 %v494_v19, %v473_v52 }
  0xc3   : >> { %v522_v20 = vpop.f32.mrf.mxu1 }
  0xc4   : >> { %v526_v4 = vadd.f32 %v522_v20, %v498_v60 }
  0xc6   : >> { %v830_v17 = vmax.f32 %v402_v5, %v526_v4 }
  0xc7   : >> { %v592_v21 = vpop.f32.mrf.mxu2  ;;  %v618_v22 = vpop.f32.mrf.mxu3 }
  0xc8   : >> { %v641_v23 = vpop.f32.mrf.mxu0  ;;  %v619_v53 = vadd.f32 %v618_v22, %v592_v21  ;;  %v843_v21 = vpop.permute.xlu0 %842 }
  0xc9   : >> { %v647_v40 = vadd.f32 %v641_v23, %v616_v35 }
  0xcb   : >> { %v669_v24 = vpop.f32.mrf.mxu1 }
  0xcc   : >> { %v675_v47 = vadd.f32 %v669_v24, %v647_v40 }
  0xcf   : >> { %v697_v25 = vpop.f32.mrf.mxu2  ;;  %v722_v26 = vpop.f32.mrf.mxu3 }
  0xd0   : >> { %v644_v27 = vpop.f32.mrf.mxu0  ;;  %v703_v54 = vadd.f32 %v697_v25, %v675_v47 }
  0xd1   : >> { %v648_v61 = vadd.f32 %v644_v27, %v619_v53 }
  0xd3   : >> { %v672_v28 = vpop.f32.mrf.mxu1 }
  0xd4   : >> { %v676_v7 = vadd.f32 %v672_v28, %v648_v61 }
  0xd7   : >> { %v700_v30 = vpop.f32.mrf.mxu2  ;;  %v725_v31 = vpop.f32.mrf.mxu3 }
  0xd8   : >> { %v745_v32 = vpop.f32.mrf.mxu0  ;;  %v704_v14 = vadd.f32 %v700_v30, %v676_v7 }
  0xd9   : >> { %v746_v36 = vadd.f32 %v745_v32, %v722_v26 }
  0xdb   : >> { %v768_v38 = vpop.f32.mrf.mxu1 }
  0xdc   : >> { %v774_v42 = vadd.f32 %v768_v38, %v746_v36 }
  0xdf   : >> { %v793_v44 = vpop.f32.mrf.mxu2  ;;  %v821_v45 = vpop.f32.mrf.mxu3 }
  0xe0   : >> { %v799_v48 = vadd.f32 %v793_v44, %v774_v42  ;;  %v748_v49 = vpop.f32.mrf.mxu0 }
  0xe1   : >> { %v749_v55 = vadd.f32 %v748_v49, %v725_v31 }
  0xe2   : >> { %v827_v56 = vadd.f32 %v821_v45, %v799_v48 }
  0xe3   : >> { %v771_v58 = vpop.f32.mrf.mxu1 }
  0xe4   : >> { %v831_v62 = vmax.f32 %v703_v54, %v827_v56  ;;  %v775_v8 = vadd.f32 %v771_v58, %v749_v55 }
  0xe6   : >> { %v833_v2 = vmax.f32 %v829_v59, %v831_v62 }
  0xe7   : >> { %v796_v10 = vpop.f32.mrf.mxu2  ;;  %v824_v3 = vpop.f32.mrf.mxu3 }
  0xe8   : >> { %v845_v12 = vadd.f32 %v838_v63, %v833_v2  ;;  %v800_v13 = vadd.f32 %v796_v10, %v775_v8 }
  0xea   : >> { %v847_v15 = vmax.f32 %v845_v12, 0.0  ;;  %v828_v16 = vadd.f32 %v824_v3, %v800_v13 }
  0xec   : >> { %852 = vst.msk [vmem:[%s850_s27] sm:$0xff] %vm851_vm2, %v847_v15  ;;  %v832_v18 = vmax.f32 %v704_v14, %v828_v16 }
  0xee   : >> { %v834_v19 = vmax.f32 %v830_v17, %v832_v18 }
  0xf0   : >> { %v846_v22 = vadd.f32 %v843_v21, %v834_v19  ;;  %177 = sbr.rel (!%p175_p4) target bundleno = 16 (0x10), region = 86 }
  0xf2   : >> { %v848_v6 = vmax.f32 %v846_v22, 0.0 }
  0xf4   : >> { %853 = vst.msk [vmem:[%s850_s27 + $0x8] sm:$0xff] %vm851_vm2, %v848_v6 }
  0xf5 PF: > { %s13_s12 = sadd.s32 1, %s1150_s12  }
  0xf6   : > { %p10_p5 = scmp.ge.s32.totalorder %s13_s12, 4  }
  0xf8   :  { %12 = sbr.rel (!%p10_p5) target bundleno = 1 (0x1), region = 97 }

// kernel: lenet_forward.5
= control target key start
LH: loop header
LB: loop body
LE: loop exit
PB: predicated region body
PF: predicated region fallthrough
CT: control target
= control target key end

     0   :  { %12 = vsyncpa [#allocation4], 0  ;;  %s2269_s24 = smov 0   ;;  %s3165_s0 = inlined_call_operand.vmem [shape: f32[2,45056], index: 0, kind: input, shape index: {}]   ;;  %s3166_s1 = inlined_call_operand.vmem [shape: f32[45056,128], index: 1, kind: input, shape index: {}]   ;;  %s3167_s2 = inlined_call_operand.vmem [shape: f32[1,128], index: 2, kind: input, shape index: {}]   ;;  %s3168_s3 = inlined_call_operand.vmem [shape: f32[128,128], index: 3, kind: input, shape index: {}]   ;;  %s3169_s4 = inlined_call_operand.vmem [shape: f32[1,128], index: 4, kind: input, shape index: {}]   ;;  %s3170_s5 = inlined_call_operand.vmem [shape: f32[128,128], index: 5, kind: input, shape index: {}]   ;;  %s3171_s6 = inlined_call_operand.vmem [shape: f32[1,128], index: 6, kind: input, shape index: {}]   ;;  %s3172_s7 = inlined_call_operand.hbm [shape: f32[2,128], index: 7, kind: output, shape index: {}]  }
   0x1 LB: > { %s2275_s25 = sadd.s32 4294967295, %s2225_s24   ;;  %p2159_p0 = scmp.ge.s32.totalorder %s2225_s24, 1  ;;  %s2225_s24 = sphi %s2269_s24, %s18_s24  }
   0x2   : > { %p245_p1 = scmp.lt.s32.totalorder %s2225_s24, 9 }
   0x4   : > { %p246_p2 = pnand %p2159_p0, %p245_p1 }
   0x5   : > { %s277_s26 = smul.u32 (!%p246_p2), 44, %s2275_s25  ;;  %p2162_p5 = scmp.ne.s32.totalorder (!%p246_p2), %s2275_s25, 0 }
   0x6   : > { %249 = sbr.rel (%p246_p2) target bundleno = 829 (0x33d), region = 48 }
   0x7   : > { %s283_s27 = smul.u32 (!%p246_p2), 704, %s2275_s25  ;;  %p278_p3 = scmp.lt.s32.totalorder (!%p246_p2), %s277_s26, 351 }
   0x9   : > { %p284_p4 = scmp.lt.s32.totalorder (!%p246_p2), %s283_s27, 5631 }
   0xb   : > { %s3174_s26 = smov (!%p278_p3, %s277_s26), 351  ;;  %s3176_s27 = smov (!%p284_p4, %s283_s27), 5631 }
   0xc   : > { %s2160_s28 = sshll.u32 %s3174_s26, 1  ;;  %s2161_s9 = sshll.u32 %s3176_s27, 3 }
   0xd   : > { %s2284_s8 = scalar_lea.vmem %s3165_s0, %s2160_s28  ;;  %s2289_s12 = scalar_lea.vmem %s3166_s1, %s2161_s9 }
   0xe   : > { %292 = sbr.rel (%p2162_p5) target bundleno = 21 (0x15), region = 52 }
  0x13   : > { %v2227_v0 = vmov 0.0  }
  0x14   : > { %293 = vst [vmem:[#allocation2] sm:$0x3] %v2227_v0 }
  0x15 PF: > { %v321_v1 = vld [vmem:[%s2289_s12 + $0x78] sm:$0xff]  ;;  %v320_v3 = vld [vmem:[%s2289_s12 + $0x70] sm:$0xff]  ;;  %v319_v7 = vld [vmem:[%s2289_s12 + $0x68] sm:$0xff]  ;;  %p2163_p6 = scmp.ne.s32.totalorder %s2275_s25, 7 }
  0x16   : > { %v353_v2 = vld [vmem:[%s2289_s12 + $0x178] sm:$0xff]  ;;  %1121 = vmatpush.msra.mxu0 %v321_v1  ;;  %v352_v5 = vld [vmem:[%s2289_s12 + $0x170] sm:$0xff]  ;;  %v351_v9 = vld [vmem:[%s2289_s12 + $0x168] sm:$0xff] }
  0x17   : > { %1161 = vmatpush.msra.mxu2 %v353_v2  ;;  %v337_v4 = vld [vmem:[%s2289_s12 + $0xf8] sm:$0xff]  ;;  %v336_v8 = vld [vmem:[%s2289_s12 + $0xf0] sm:$0xff]  ;;  %v335_v11 = vld [vmem:[%s2289_s12 + $0xe8] sm:$0xff] }
  0x18   : > { %v369_v6 = vld [vmem:[%s2289_s12 + $0x1f8] sm:$0xff]  ;;  %1141 = vmatpush.msra.mxu1 %v337_v4  ;;  %1122 = vmatpush.msra.mxu0 %v320_v3  ;;  %v368_v10 = vld [vmem:[%s2289_s12 + $0x1f0] sm:$0xff]  ;;  %v318_v12 = vld [vmem:[%s2289_s12 + $0x60] sm:$0xff] }
  0x19   : > { %1181 = vmatpush.msra.mxu3 %v369_v6  ;;  %1162 = vmatpush.msra.mxu2 %v352_v5  ;;  %v350_v13 = vld [vmem:[%s2289_s12 + $0x160] sm:$0xff]  ;;  %v367_v14 = vld [vmem:[%s2289_s12 + $0x1e8] sm:$0xff]  ;;  %v317_v17 = vld [vmem:[%s2289_s12 + $0x58] sm:$0xff] }
  0x1a   : > { %1142 = vmatpush.msra.mxu1 %v336_v8  ;;  %1123 = vmatpush.msra.mxu0 %v319_v7  ;;  %v334_v15 = vld [vmem:[%s2289_s12 + $0xe0] sm:$0xff]  ;;  %v349_v18 = vld [vmem:[%s2289_s12 + $0x158] sm:$0xff]  ;;  %v316_v21 = vld [vmem:[%s2289_s12 + $0x50] sm:$0xff] }
  0x1b   : > { %1182 = vmatpush.msra.mxu3 %v368_v10  ;;  %1163 = vmatpush.msra.mxu2 %v351_v9  ;;  %v366_v16 = vld [vmem:[%s2289_s12 + $0x1e0] sm:$0xff]  ;;  %v333_v19 = vld [vmem:[%s2289_s12 + $0xd8] sm:$0xff]  ;;  %v348_v22 = vld [vmem:[%s2289_s12 + $0x150] sm:$0xff] }
  0x1c   : > { %1143 = vmatpush.msra.mxu1 %v335_v11  ;;  %1124 = vmatpush.msra.mxu0 %v318_v12  ;;  %v365_v20 = vld [vmem:[%s2289_s12 + $0x1d8] sm:$0xff]  ;;  %v332_v23 = vld [vmem:[%s2289_s12 + $0xd0] sm:$0xff]  ;;  %v315_v25 = vld [vmem:[%s2289_s12 + $0x48] sm:$0xff] }
  0x1d   : > { %1183 = vmatpush.msra.mxu3 %v367_v14  ;;  %1164 = vmatpush.msra.mxu2 %v350_v13  ;;  %v364_v24 = vld [vmem:[%s2289_s12 + $0x1d0] sm:$0xff]  ;;  %v347_v26 = vld [vmem:[%s2289_s12 + $0x148] sm:$0xff]  ;;  %v314_v29 = vld [vmem:[%s2289_s12 + $0x40] sm:$0xff] }
  0x1e   : > { %1144 = vmatpush.msra.mxu1 %v334_v15  ;;  %1125 = vmatpush.msra.mxu0 %v317_v17  ;;  %v331_v27 = vld [vmem:[%s2289_s12 + $0xc8] sm:$0xff]  ;;  %v346_v30 = vld [vmem:[%s2289_s12 + $0x140] sm:$0xff]  ;;  %v313_v33 = vld [vmem:[%s2289_s12 + $0x38] sm:$0xff] }
  0x1f   : > { %1184 = vmatpush.msra.mxu3 %v366_v16  ;;  %1165 = vmatpush.msra.mxu2 %v349_v18  ;;  %v363_v28 = vld [vmem:[%s2289_s12 + $0x1c8] sm:$0xff]  ;;  %v330_v31 = vld [vmem:[%s2289_s12 + $0xc0] sm:$0xff]  ;;  %v345_v34 = vld [vmem:[%s2289_s12 + $0x138] sm:$0xff] }
  0x20   : > { %1145 = vmatpush.msra.mxu1 %v333_v19  ;;  %1126 = vmatpush.msra.mxu0 %v316_v21  ;;  %v362_v32 = vld [vmem:[%s2289_s12 + $0x1c0] sm:$0xff]  ;;  %v329_v35 = vld [vmem:[%s2289_s12 + $0xb8] sm:$0xff]  ;;  %v312_v37 = vld [vmem:[%s2289_s12 + $0x30] sm:$0xff] }
  0x21   : > { %1185 = vmatpush.msra.mxu3 %v365_v20  ;;  %1166 = vmatpush.msra.mxu2 %v348_v22  ;;  %v361_v36 = vld [vmem:[%s2289_s12 + $0x1b8] sm:$0xff]  ;;  %v344_v38 = vld [vmem:[%s2289_s12 + $0x130] sm:$0xff]  ;;  %v311_v41 = vld [vmem:[%s2289_s12 + $0x28] sm:$0xff] }
  0x22   : > { %1146 = vmatpush.msra.mxu1 %v332_v23  ;;  %1127 = vmatpush.msra.mxu0 %v315_v25  ;;  %v328_v39 = vld [vmem:[%s2289_s12 + $0xb0] sm:$0xff]  ;;  %v343_v42 = vld [vmem:[%s2289_s12 + $0x128] sm:$0xff]  ;;  %v310_v45 = vld [vmem:[%s2289_s12 + $0x20] sm:$0xff] }
  0x23   : > { %1186 = vmatpush.msra.mxu3 %v364_v24  ;;  %1167 = vmatpush.msra.mxu2 %v347_v26  ;;  %v360_v40 = vld [vmem:[%s2289_s12 + $0x1b0] sm:$0xff]  ;;  %v327_v43 = vld [vmem:[%s2289_s12 + $0xa8] sm:$0xff]  ;;  %v342_v46 = vld [vmem:[%s2289_s12 + $0x120] sm:$0xff] }
  0x24   : > { %1147 = vmatpush.msra.mxu1 %v331_v27  ;;  %1128 = vmatpush.msra.mxu0 %v314_v29  ;;  %v359_v44 = vld [vmem:[%s2289_s12 + $0x1a8] sm:$0xff]  ;;  %v326_v47 = vld [vmem:[%s2289_s12 + $0xa0] sm:$0xff]  ;;  %v309_v49 = vld [vmem:[%s2289_s12 + $0x18] sm:$0xff] }
  0x25   : > { %1187 = vmatpush.msra.mxu3 %v363_v28  ;;  %1168 = vmatpush.msra.mxu2 %v346_v30  ;;  %v358_v48 = vld [vmem:[%s2289_s12 + $0x1a0] sm:$0xff]  ;;  %v341_v50 = vld [vmem:[%s2289_s12 + $0x118] sm:$0xff]  ;;  %v308_v53 = vld [vmem:[%s2289_s12 + $0x10] sm:$0xff] }
  0x26   : > { %1148 = vmatpush.msra.mxu1 %v330_v31  ;;  %1129 = vmatpush.msra.mxu0 %v313_v33  ;;  %v325_v51 = vld [vmem:[%s2289_s12 + $0x98] sm:$0xff]  ;;  %v340_v54 = vld [vmem:[%s2289_s12 + $0x110] sm:$0xff]  ;;  %v307_v57 = vld [vmem:[%s2289_s12 + $0x8] sm:$0xff] }
  0x27   : > { %1188 = vmatpush.msra.mxu3 %v362_v32  ;;  %1169 = vmatpush.msra.mxu2 %v345_v34  ;;  %v357_v52 = vld [vmem:[%s2289_s12 + $0x198] sm:$0xff]  ;;  %v324_v55 = vld [vmem:[%s2289_s12 + $0x90] sm:$0xff]  ;;  %v339_v58 = vld [vmem:[%s2289_s12 + $0x108] sm:$0xff] }
  0x28   : > { %1149 = vmatpush.msra.mxu1 %v329_v35  ;;  %1130 = vmatpush.msra.mxu0 %v312_v37  ;;  %v356_v56 = vld [vmem:[%s2289_s12 + $0x190] sm:$0xff]  ;;  %v323_v59 = vld [vmem:[%s2289_s12 + $0x88] sm:$0xff]  ;;  %v306_v61 = vld [vmem:[%s2289_s12] sm:$0xff] }
  0x29   : > { %1189 = vmatpush.msra.mxu3 %v361_v36  ;;  %1170 = vmatpush.msra.mxu2 %v344_v38  ;;  %v355_v60 = vld [vmem:[%s2289_s12 + $0x188] sm:$0xff]  ;;  %v338_v62 = vld [vmem:[%s2289_s12 + $0x100] sm:$0xff]  ;;  %v385_v63 = vld [vmem:[%s2289_s12 + $0x278] sm:$0xff] }
  0x2a   : > { %1150 = vmatpush.msra.mxu1 %v328_v39  ;;  %1131 = vmatpush.msra.mxu0 %v311_v41  ;;  %v417_v0 = vld [vmem:[%s2289_s12 + $0x378] sm:$0xff]  ;;  %v322_v1 = vld [vmem:[%s2289_s12 + $0x80] sm:$0xff]  ;;  %v384_v3 = vld [vmem:[%s2289_s12 + $0x270] sm:$0xff] }
  0x2b   : > { %1190 = vmatpush.msra.mxu3 %v360_v40  ;;  %1171 = vmatpush.msra.mxu2 %v343_v42  ;;  %v354_v2 = vld [vmem:[%s2289_s12 + $0x180] sm:$0xff]  ;;  %v401_v4 = vld [vmem:[%s2289_s12 + $0x2f8] sm:$0xff]  ;;  %v416_v5 = vld [vmem:[%s2289_s12 + $0x370] sm:$0xff] }
  0x2c   : > { %1151 = vmatpush.msra.mxu1 %v327_v43  ;;  %1132 = vmatpush.msra.mxu0 %v310_v45  ;;  %v433_v6 = vld [vmem:[%s2289_s12 + $0x3f8] sm:$0xff]  ;;  %v383_v7 = vld [vmem:[%s2289_s12 + $0x268] sm:$0xff]  ;;  %v400_v8 = vld [vmem:[%s2289_s12 + $0x2f0] sm:$0xff] }
  0x2d   : > { %1191 = vmatpush.msra.mxu3 %v359_v44  ;;  %1172 = vmatpush.msra.mxu2 %v342_v46  ;;  %v415_v9 = vld [vmem:[%s2289_s12 + $0x368] sm:$0xff]  ;;  %v432_v10 = vld [vmem:[%s2289_s12 + $0x3f0] sm:$0xff]  ;;  %v382_v11 = vld [vmem:[%s2289_s12 + $0x260] sm:$0xff] }
  0x2e   : > { %1152 = vmatpush.msra.mxu1 %v326_v47  ;;  %1133 = vmatpush.msra.mxu0 %v309_v49  ;;  %v399_v12 = vld [vmem:[%s2289_s12 + $0x2e8] sm:$0xff]  ;;  %v414_v13 = vld [vmem:[%s2289_s12 + $0x360] sm:$0xff]  ;;  %v381_v15 = vld [vmem:[%s2289_s12 + $0x258] sm:$0xff] }
  0x2f   : > { %1192 = vmatpush.msra.mxu3 %v358_v48  ;;  %1173 = vmatpush.msra.mxu2 %v341_v50  ;;  %v431_v14 = vld [vmem:[%s2289_s12 + $0x3e8] sm:$0xff]  ;;  %v398_v16 = vld [vmem:[%s2289_s12 + $0x2e0] sm:$0xff]  ;;  %v413_v17 = vld [vmem:[%s2289_s12 + $0x358] sm:$0xff] }
  0x30   : > { %1153 = vmatpush.msra.mxu1 %v325_v51  ;;  %1134 = vmatpush.msra.mxu0 %v308_v53  ;;  %v430_v18 = vld [vmem:[%s2289_s12 + $0x3e0] sm:$0xff]  ;;  %v380_v19 = vld [vmem:[%s2289_s12 + $0x250] sm:$0xff]  ;;  %v397_v20 = vld [vmem:[%s2289_s12 + $0x2d8] sm:$0xff] }
  0x31   : > { %1193 = vmatpush.msra.mxu3 %v357_v52  ;;  %1174 = vmatpush.msra.mxu2 %v340_v54  ;;  %v412_v21 = vld [vmem:[%s2289_s12 + $0x350] sm:$0xff]  ;;  %v429_v22 = vld [vmem:[%s2289_s12 + $0x3d8] sm:$0xff]  ;;  %v295_v23 = vld [vmem:[%s2284_s8] sm:$0xff] }
  0x32   : > { %1154 = vmatpush.msra.mxu1 %v324_v55  ;;  %1135 = vmatpush.msra.mxu0 %v307_v57  ;;  %v379_v24 = vld [vmem:[%s2289_s12 + $0x248] sm:$0xff]  ;;  %v396_v25 = vld [vmem:[%s2289_s12 + $0x2d0] sm:$0xff]  ;;  %1021 = vst [vmem:[#allocation1] ss:$4 sm:$0xff] %v295_v23  ;;  %v378_v28 = vld [vmem:[%s2289_s12 + $0x240] sm:$0xff] }
  0x33   : > { %1194 = vmatpush.msra.mxu3 %v356_v56  ;;  %1175 = vmatpush.msra.mxu2 %v339_v58  ;;  %v411_v26 = vld [vmem:[%s2289_s12 + $0x348] sm:$0xff]  ;;  %v428_v27 = vld [vmem:[%s2289_s12 + $0x3d0] sm:$0xff]  ;;  %v410_v30 = vld [vmem:[%s2289_s12 + $0x340] sm:$0xff] }
  0x34   : > { %1155 = vmatpush.msra.mxu1 %v323_v59  ;;  %1136 = vmatpush.msra.mxu0 %v306_v61  ;;  %v395_v29 = vld [vmem:[%s2289_s12 + $0x2c8] sm:$0xff]  ;;  %v377_v32 = vld [vmem:[%s2289_s12 + $0x238] sm:$0xff]  ;;  %v394_v33 = vld [vmem:[%s2289_s12 + $0x2c0] sm:$0xff] }
  0x35   : > { %1195 = vmatpush.msra.mxu3 %v355_v60  ;;  %1176 = vmatpush.msra.mxu2 %v338_v62  ;;  %v427_v31 = vld [vmem:[%s2289_s12 + $0x3c8] sm:$0xff]  ;;  %v409_v34 = vld [vmem:[%s2289_s12 + $0x338] sm:$0xff]  ;;  %v426_v35 = vld [vmem:[%s2289_s12 + $0x3c0] sm:$0xff] }
  0x36   : > { %1201 = vmatpush.msrb.mxu0 %v385_v63  ;;  %1156 = vmatpush.msra.mxu1 %v322_v1  ;;  %v376_v36 = vld [vmem:[%s2289_s12 + $0x230] sm:$0xff]  ;;  %v393_v37 = vld [vmem:[%s2289_s12 + $0x2b8] sm:$0xff]  ;;  %v296_v40 = vld [vmem:[%s2284_s8 + $0x8] sm:$0xff] }
  0x37   : > { %1241 = vmatpush.msrb.mxu2 %v417_v0  ;;  %1196 = vmatpush.msra.mxu3 %v354_v2  ;;  %v408_v38 = vld [vmem:[%s2289_s12 + $0x330] sm:$0xff]  ;;  %v425_v39 = vld [vmem:[%s2289_s12 + $0x3b8] sm:$0xff]  ;;  %v375_v41 = vld [vmem:[%s2289_s12 + $0x228] sm:$0xff]  ;;  %1023 = vst [vmem:[#allocation1 + $0x20] ss:$4 sm:$0xff] %v296_v40 }
  0x38   : > { %1202 = vmatpush.msrb.mxu0 %v384_v3  ;;  %1221 = vmatpush.msrb.mxu1 %v401_v4  ;;  %v392_v42 = vld [vmem:[%s2289_s12 + $0x2b0] sm:$0xff]  ;;  %v407_v44 = vld [vmem:[%s2289_s12 + $0x328] sm:$0xff]  ;;  %v374_v50 = vld [vmem:[%s2289_s12 + $0x220] sm:$0xff] }
  0x39   : > { %1242 = vmatpush.msrb.mxu2 %v416_v5  ;;  %1261 = vmatpush.msrb.mxu3 %v433_v6  ;;  %v297_v43 = vld [vmem:[%s2284_s8 + $0x10] sm:$0xff]  ;;  %v2400_v46 = vld.sshfl [vmem:[#allocation1] sm:$0xff pattern:$0x73625140]  ;;  %v391_v51 = vld [vmem:[%s2289_s12 + $0x2a8] sm:$0xff] }
  0x3a   : > { %1203 = vmatpush.msrb.mxu0 %v383_v7  ;;  %1222 = vmatpush.msrb.mxu1 %v400_v8  ;;  %v1026_v45 = vld.sshfl [vmem:[#allocation1 + $0x10] sm:$0xff pattern:$0x73625140]  ;;  %v2402_v47 = vld.sshfl [vmem:[#allocation1 + $0x18] sm:$0xff pattern:$0x73625140] }
  0x3b   : > { %1243 = vmatpush.msrb.mxu2 %v415_v9  ;;  %1262 = vmatpush.msrb.mxu3 %v432_v10  ;;  %v2404_v48 = vld.sshfl [vmem:[#allocation1 + $0x8] sm:$0xff pattern:$0x73625140]  ;;  %v424_v49 = vld [vmem:[%s2289_s12 + $0x3b0] sm:$0xff]  ;;  %v406_v52 = vld [vmem:[%s2289_s12 + $0x320] sm:$0xff] }
  0x3c   : > { %1204 = vmatpush.msrb.mxu0 %v382_v11  ;;  %1223 = vmatpush.msrb.mxu1 %v399_v12  ;;  %1032 = vst [vmem:[#allocation1] ss:$4 sm:$0xff] %v297_v43  ;;  %v423_v53 = vld [vmem:[%s2289_s12 + $0x3a8] sm:$0xff]  ;;  %v373_v54 = vld [vmem:[%s2289_s12 + $0x218] sm:$0xff]  ;;  %v390_v55 = vld [vmem:[%s2289_s12 + $0x2a0] sm:$0xff] }
  0x3d   : > { %1244 = vmatpush.msrb.mxu2 %v414_v13  ;;  %1263 = vmatpush.msrb.mxu3 %v431_v14  ;;  %v405_v56 = vld [vmem:[%s2289_s12 + $0x318] sm:$0xff]  ;;  %v422_v57 = vld [vmem:[%s2289_s12 + $0x3a0] sm:$0xff]  ;;  %v372_v58 = vld [vmem:[%s2289_s12 + $0x210] sm:$0xff] }
  0x3e   : > { %1205 = vmatpush.msrb.mxu0 %v381_v15  ;;  %1224 = vmatpush.msrb.mxu1 %v398_v16  ;;  %v389_v59 = vld [vmem:[%s2289_s12 + $0x298] sm:$0xff]  ;;  %v2418_v61 = vld.sshfl [vmem:[#allocation1 + $0x30] sm:$0xff pattern:$0x73625140]  ;;  %v371_v3 = vld [vmem:[%s2289_s12 + $0x208] sm:$0xff] }
  0x3f   : > { %1245 = vmatpush.msrb.mxu2 %v413_v17  ;;  %1264 = vmatpush.msrb.mxu3 %v430_v18  ;;  %v298_v60 = vld [vmem:[%s2284_s8 + $0x18] sm:$0xff]  ;;  %v2420_v62 = vld.sshfl [vmem:[#allocation1 + $0x20] sm:$0xff pattern:$0x73625140]  ;;  %v404_v1 = vld [vmem:[%s2289_s12 + $0x310] sm:$0xff] }
  0x40   : > { %1206 = vmatpush.msrb.mxu0 %v380_v19  ;;  %1225 = vmatpush.msrb.mxu1 %v397_v20  ;;  %v2422_v63 = vld.sshfl [vmem:[#allocation1 + $0x38] sm:$0xff pattern:$0x73625140]  ;;  %v2424_v0 = vld.sshfl [vmem:[#allocation1 + $0x28] sm:$0xff pattern:$0x73625140] }
  0x41   : > { %1246 = vmatpush.msrb.mxu2 %v412_v21  ;;  %1265 = vmatpush.msrb.mxu3 %v429_v22  ;;  %v421_v2 = vld [vmem:[%s2289_s12 + $0x398] sm:$0xff]  ;;  %1033 = vst [vmem:[#allocation1 + $0x20] ss:$4 sm:$0xff] %v298_v60  ;;  %v388_v4 = vld [vmem:[%s2289_s12 + $0x290] sm:$0xff]  ;;  %v403_v5 = vld [vmem:[%s2289_s12 + $0x308] sm:$0xff] }
  0x42   : > { %1207 = vmatpush.msrb.mxu0 %v379_v24  ;;  %1226 = vmatpush.msrb.mxu1 %v396_v25  ;;  %v420_v6 = vld [vmem:[%s2289_s12 + $0x390] sm:$0xff]  ;;  %v370_v7 = vld [vmem:[%s2289_s12 + $0x200] sm:$0xff]  ;;  %v387_v8 = vld [vmem:[%s2289_s12 + $0x288] sm:$0xff] }
  0x43   : > { %1247 = vmatpush.msrb.mxu2 %v411_v26  ;;  %1266 = vmatpush.msrb.mxu3 %v428_v27  ;;  %v402_v9 = vld [vmem:[%s2289_s12 + $0x300] sm:$0xff]  ;;  %v419_v10 = vld [vmem:[%s2289_s12 + $0x388] sm:$0xff]  ;;  %v449_v11 = vld [vmem:[%s2289_s12 + $0x478] sm:$0xff] }
  0x44   : > { %1208 = vmatpush.msrb.mxu0 %v378_v28  ;;  %1227 = vmatpush.msrb.mxu1 %v395_v29  ;;  %v481_v12 = vld [vmem:[%s2289_s12 + $0x578] sm:$0xff]  ;;  %v386_v13 = vld [vmem:[%s2289_s12 + $0x280] sm:$0xff]  ;;  %v448_v15 = vld [vmem:[%s2289_s12 + $0x470] sm:$0xff] }
  0x45   : > { %1248 = vmatpush.msrb.mxu2 %v410_v30  ;;  %1267 = vmatpush.msrb.mxu3 %v427_v31  ;;  %v418_v14 = vld [vmem:[%s2289_s12 + $0x380] sm:$0xff]  ;;  %v465_v16 = vld [vmem:[%s2289_s12 + $0x4f8] sm:$0xff]  ;;  %v480_v17 = vld [vmem:[%s2289_s12 + $0x570] sm:$0xff] }
  0x46   : > { %1209 = vmatpush.msrb.mxu0 %v377_v32  ;;  %1228 = vmatpush.msrb.mxu1 %v394_v33  ;;  %v497_v18 = vld [vmem:[%s2289_s12 + $0x5f8] sm:$0xff]  ;;  %v447_v19 = vld [vmem:[%s2289_s12 + $0x468] sm:$0xff]  ;;  %v464_v20 = vld [vmem:[%s2289_s12 + $0x4f0] sm:$0xff] }
  0x47   : > { %1249 = vmatpush.msrb.mxu2 %v409_v34  ;;  %1268 = vmatpush.msrb.mxu3 %v426_v35  ;;  %v479_v21 = vld [vmem:[%s2289_s12 + $0x568] sm:$0xff]  ;;  %v496_v22 = vld [vmem:[%s2289_s12 + $0x5f0] sm:$0xff]  ;;  %v446_v23 = vld [vmem:[%s2289_s12 + $0x460] sm:$0xff] }
  0x48   : > { %1210 = vmatpush.msrb.mxu0 %v376_v36  ;;  %1229 = vmatpush.msrb.mxu1 %v393_v37  ;;  %v463_v24 = vld [vmem:[%s2289_s12 + $0x4e8] sm:$0xff]  ;;  %v478_v25 = vld [vmem:[%s2289_s12 + $0x560] sm:$0xff]  ;;  %v2456_v27 = vld.sshfl [vmem:[#allocation1 + $0x10] sm:$0xff pattern:$0x73625140] }
  0x49   : > { %1250 = vmatpush.msrb.mxu2 %v408_v38  ;;  %1269 = vmatpush.msrb.mxu3 %v425_v39  ;;  %v2454_v26 = vld.sshfl [vmem:[#allocation1] sm:$0xff pattern:$0x73625140]  ;;  %v2458_v28 = vld.sshfl [vmem:[#allocation1 + $0x8] sm:$0xff pattern:$0x73625140] }
  0x4a   : > { %1211 = vmatpush.msrb.mxu0 %v375_v41  ;;  %1230 = vmatpush.msrb.mxu1 %v392_v42  ;;  %v495_v29 = vld [vmem:[%s2289_s12 + $0x5e8] sm:$0xff]  ;;  %v299_v30 = vld [vmem:[%s2284_s8 + $0x20] sm:$0xff]  ;;  %v2462_v31 = vld.sshfl [vmem:[#allocation1 + $0x18] sm:$0xff pattern:$0x73625140] }
  0x4b   : > { %1251 = vmatpush.msrb.mxu2 %v407_v44  ;;  %1270 = vmatpush.msrb.mxu3 %v424_v49  ;;  %v445_v32 = vld [vmem:[%s2289_s12 + $0x458] sm:$0xff]  ;;  %1042 = vst [vmem:[#allocation1] ss:$4 sm:$0xff] %v299_v30  ;;  %v462_v33 = vld [vmem:[%s2289_s12 + $0x4e0] sm:$0xff]  ;;  %v444_v36 = vld [vmem:[%s2289_s12 + $0x450] sm:$0xff] }
  0x4c   : > { %1212 = vmatpush.msrb.mxu0 %v374_v50  ;;  %1231 = vmatpush.msrb.mxu1 %v391_v51  ;;  %v477_v34 = vld [vmem:[%s2289_s12 + $0x558] sm:$0xff]  ;;  %v494_v35 = vld [vmem:[%s2289_s12 + $0x5e0] sm:$0xff]  ;;  %v476_v38 = vld [vmem:[%s2289_s12 + $0x550] sm:$0xff] }
  0x4d   : > { %1252 = vmatpush.msrb.mxu2 %v406_v52  ;;  %1271 = vmatpush.msrb.mxu3 %v423_v53  ;;  %v461_v37 = vld [vmem:[%s2289_s12 + $0x4d8] sm:$0xff]  ;;  %v443_v40 = vld [vmem:[%s2289_s12 + $0x448] sm:$0xff]  ;;  %v460_v41 = vld [vmem:[%s2289_s12 + $0x4d0] sm:$0xff] }
  0x4e   : > { %1213 = vmatpush.msrb.mxu0 %v373_v54  ;;  %1232 = vmatpush.msrb.mxu1 %v390_v55  ;;  %v493_v39 = vld [vmem:[%s2289_s12 + $0x5d8] sm:$0xff]  ;;  %v475_v42 = vld [vmem:[%s2289_s12 + $0x548] sm:$0xff]  ;;  %v492_v43 = vld [vmem:[%s2289_s12 + $0x5d0] sm:$0xff] }
  0x4f   : > { %1253 = vmatpush.msrb.mxu2 %v405_v56  ;;  %1272 = vmatpush.msrb.mxu3 %v422_v57  ;;  %v442_v44 = vld [vmem:[%s2289_s12 + $0x440] sm:$0xff]  ;;  %v473_v50 = vld [vmem:[%s2289_s12 + $0x538] sm:$0xff]  ;;  %v440_v52 = vld [vmem:[%s2289_s12 + $0x430] sm:$0xff] }
  0x50   : > { %1214 = vmatpush.msrb.mxu0 %v372_v58  ;;  %1233 = vmatpush.msrb.mxu1 %v389_v59  ;;  %v458_v49 = vld [vmem:[%s2289_s12 + $0x4c0] sm:$0xff]  ;;  %v457_v53 = vld [vmem:[%s2289_s12 + $0x4b8] sm:$0xff]  ;;  %v472_v54 = vld [vmem:[%s2289_s12 + $0x530] sm:$0xff] }
  0x51   : > { %1254 = vmatpush.msrb.mxu2 %v404_v1  ;;  %1273 = vmatpush.msrb.mxu3 %v421_v2  ;;  %v490_v51 = vld [vmem:[%s2289_s12 + $0x5c0] sm:$0xff]  ;;  %v489_v55 = vld [vmem:[%s2289_s12 + $0x5b8] sm:$0xff]  ;;  %v439_v56 = vld [vmem:[%s2289_s12 + $0x428] sm:$0xff] }
  0x52   : > { %1215 = vmatpush.msrb.mxu0 %v371_v3  ;;  %1234 = vmatpush.msrb.mxu1 %v388_v4  ;;  %v456_v57 = vld [vmem:[%s2289_s12 + $0x4b0] sm:$0xff]  ;;  %v471_v58 = vld [vmem:[%s2289_s12 + $0x528] sm:$0xff]  ;;  %v438_v60 = vld [vmem:[%s2289_s12 + $0x420] sm:$0xff] }
  0x53   : > { %1255 = vmatpush.msrb.mxu2 %v403_v5  ;;  %1274 = vmatpush.msrb.mxu3 %v420_v6  ;;  %v488_v59 = vld [vmem:[%s2289_s12 + $0x5b0] sm:$0xff]  ;;  %v454_v1 = vld [vmem:[%s2289_s12 + $0x4a0] sm:$0xff]  ;;  %v469_v2 = vld [vmem:[%s2289_s12 + $0x518] sm:$0xff] }
  0x54   : > { %1177 = vmatmul.f32.vlgmr.msra.gmra.mxu2 %v1026_v45  ;;  %1216 = vmatpush.msrb.mxu0 %v370_v7  ;;  %v459_v45 = vld [vmem:[%s2289_s12 + $0x4c8] sm:$0xff]  ;;  %v486_v3 = vld [vmem:[%s2289_s12 + $0x5a0] sm:$0xff]  ;;  %v436_v4 = vld [vmem:[%s2289_s12 + $0x410] sm:$0xff] }
  0x55   : > { %1235 = vmatpush.msrb.mxu1 %v387_v8  ;;  %1256 = vmatpush.msrb.mxu2 %v402_v9  ;;  %v453_v5 = vld [vmem:[%s2289_s12 + $0x498] sm:$0xff]  ;;  %v468_v6 = vld [vmem:[%s2289_s12 + $0x510] sm:$0xff]  ;;  %v435_v8 = vld [vmem:[%s2289_s12 + $0x408] sm:$0xff] }
  0x56   : > { %1275 = vmatpush.msrb.mxu3 %v419_v10  ;;  %1137 = vmatmul.f32.vlgmr.msra.gmra.mxu0 %v2400_v46  ;;  %v474_v46 = vld [vmem:[%s2289_s12 + $0x540] sm:$0xff]  ;;  %v485_v7 = vld [vmem:[%s2289_s12 + $0x598] sm:$0xff]  ;;  %v452_v9 = vld [vmem:[%s2289_s12 + $0x490] sm:$0xff] }
  0x57   : > { %1197 = vmatmul.f32.vlgmr.msra.gmra.mxu3 %v2402_v47  ;;  %1281 = vmatpush.msra.mxu0 %v449_v11  ;;  %v491_v47 = vld [vmem:[%s2289_s12 + $0x5c8] sm:$0xff]  ;;  %v484_v11 = vld [vmem:[%s2289_s12 + $0x590] sm:$0xff]  ;;  %v2533_v30 = vld.sshfl [vmem:[#allocation1 + $0x20] sm:$0xff pattern:$0x73625140] }
  0x58   : > { %1321 = vmatpush.msra.mxu2 %v481_v12  ;;  %1236 = vmatpush.msrb.mxu1 %v386_v13  ;;  %v467_v10 = vld [vmem:[%s2289_s12 + $0x508] sm:$0xff]  ;;  %v434_v12 = vld [vmem:[%s2289_s12 + $0x400] sm:$0xff] }
  0x59   : > { %1276 = vmatpush.msrb.mxu3 %v418_v14  ;;  %1157 = vmatmul.f32.vlgmr.msra.gmra.mxu1 %v2404_v48  ;;  %v441_v48 = vld [vmem:[%s2289_s12 + $0x438] sm:$0xff]  ;;  %v451_v13 = vld [vmem:[%s2289_s12 + $0x488] sm:$0xff]  ;;  %v466_v14 = vld [vmem:[%s2289_s12 + $0x500] sm:$0xff] }
  0x5a   : > { %1282 = vmatpush.msra.mxu0 %v448_v15  ;;  %1301 = vmatpush.msra.mxu1 %v465_v16  ;;  %v483_v15 = vld [vmem:[%s2289_s12 + $0x588] sm:$0xff]  ;;  %v513_v16 = vld [vmem:[%s2289_s12 + $0x678] sm:$0xff] }
  0x5b   : > { %1322 = vmatpush.msra.mxu2 %v480_v17  ;;  %1341 = vmatpush.msra.mxu3 %v497_v18  ;;  %v545_v17 = vld [vmem:[%s2289_s12 + $0x778] sm:$0xff]  ;;  %v450_v18 = vld [vmem:[%s2289_s12 + $0x480] sm:$0xff] }
  0x5c   : > { %1283 = vmatpush.msra.mxu0 %v447_v19  ;;  %1302 = vmatpush.msra.mxu1 %v464_v20  ;;  %v482_v19 = vld [vmem:[%s2289_s12 + $0x580] sm:$0xff]  ;;  %v512_v20 = vld [vmem:[%s2289_s12 + $0x670] sm:$0xff] }
  0x5d   : > { %1323 = vmatpush.msra.mxu2 %v479_v21  ;;  %1342 = vmatpush.msra.mxu3 %v496_v22  ;;  %v529_v21 = vld [vmem:[%s2289_s12 + $0x6f8] sm:$0xff]  ;;  %v544_v22 = vld [vmem:[%s2289_s12 + $0x770] sm:$0xff] }
  0x5e   : > { %1257 = vmatmul.f32.vlgmr.msrb.gmra.mxu2 %v2418_v61  ;;  %1284 = vmatpush.msra.mxu0 %v446_v23  ;;  %v455_v61 = vld [vmem:[%s2289_s12 + $0x4a8] sm:$0xff]  ;;  %v561_v23 = vld [vmem:[%s2289_s12 + $0x7f8] sm:$0xff] }
  0x5f   : > { %1303 = vmatpush.msra.mxu1 %v463_v24  ;;  %1324 = vmatpush.msra.mxu2 %v478_v25  ;;  %v511_v24 = vld [vmem:[%s2289_s12 + $0x668] sm:$0xff]  ;;  %v528_v25 = vld [vmem:[%s2289_s12 + $0x6f0] sm:$0xff] }
  0x60   : > { %1343 = vmatpush.msra.mxu3 %v495_v29  ;;  %1217 = vmatmul.f32.vlgmr.msrb.gmra.mxu0 %v2420_v62  ;;  %v470_v62 = vld [vmem:[%s2289_s12 + $0x520] sm:$0xff]  ;;  %v543_v29 = vld [vmem:[%s2289_s12 + $0x768] sm:$0xff] }
  0x61   : > { %1277 = vmatmul.f32.vlgmr.msrb.gmra.mxu3 %v2422_v63  ;;  %1285 = vmatpush.msra.mxu0 %v445_v32  ;;  %v487_v63 = vld [vmem:[%s2289_s12 + $0x5a8] sm:$0xff]  ;;  %v2535_v32 = vld.sshfl [vmem:[#allocation1 + $0x30] sm:$0xff pattern:$0x73625140] }
  0x62   : > { %1304 = vmatpush.msra.mxu1 %v462_v33  ;;  %1325 = vmatpush.msra.mxu2 %v477_v34  ;;  %v2537_v33 = vld.sshfl [vmem:[#allocation1 + $0x28] sm:$0xff pattern:$0x73625140] }
  0x63   : > { %1344 = vmatpush.msra.mxu3 %v494_v35  ;;  %1237 = vmatmul.f32.vlgmr.msrb.gmra.mxu1 %v2424_v0  ;;  %v437_v0 = vld [vmem:[%s2289_s12 + $0x418] sm:$0xff]  ;;  %v300_v34 = vld [vmem:[%s2284_s8 + $0x28] sm:$0xff]  ;;  %v542_v35 = vld [vmem:[%s2289_s12 + $0x760] sm:$0xff] }
  0x64   : > { %1286 = vmatpush.msra.mxu0 %v444_v36  ;;  %1305 = vmatpush.msra.mxu1 %v461_v37  ;;  %v559_v36 = vld [vmem:[%s2289_s12 + $0x7e8] sm:$0xff]  ;;  %v509_v37 = vld [vmem:[%s2289_s12 + $0x658] sm:$0xff] }
  0x65   : > { %1326 = vmatpush.msra.mxu2 %v476_v38  ;;  %1345 = vmatpush.msra.mxu3 %v493_v39  ;;  %v526_v38 = vld [vmem:[%s2289_s12 + $0x6e0] sm:$0xff]  ;;  %v541_v39 = vld [vmem:[%s2289_s12 + $0x758] sm:$0xff] }
  0x66   : > { %1287 = vmatpush.msra.mxu0 %v443_v40  ;;  %1306 = vmatpush.msra.mxu1 %v460_v41  ;;  %v558_v40 = vld [vmem:[%s2289_s12 + $0x7e0] sm:$0xff]  ;;  %v508_v41 = vld [vmem:[%s2289_s12 + $0x650] sm:$0xff] }
  0x67   : > { %1327 = vmatpush.msra.mxu2 %v475_v42  ;;  %1346 = vmatpush.msra.mxu3 %v492_v43  ;;  %v525_v42 = vld [vmem:[%s2289_s12 + $0x6d8] sm:$0xff]  ;;  %v540_v43 = vld [vmem:[%s2289_s12 + $0x750] sm:$0xff] }
  0x68   : > { %1288 = vmatpush.msra.mxu0 %v442_v44  ;;  %1307 = vmatpush.msra.mxu1 %v459_v45  ;;  %v557_v44 = vld [vmem:[%s2289_s12 + $0x7d8] sm:$0xff]  ;;  %v507_v45 = vld [vmem:[%s2289_s12 + $0x648] sm:$0xff] }
  0x69   : > { %1328 = vmatpush.msra.mxu2 %v474_v46  ;;  %1347 = vmatpush.msra.mxu3 %v491_v47  ;;  %v524_v46 = vld [vmem:[%s2289_s12 + $0x6d0] sm:$0xff]  ;;  %v539_v47 = vld [vmem:[%s2289_s12 + $0x748] sm:$0xff] }
  0x6a   : > { %1289 = vmatpush.msra.mxu0 %v441_v48  ;;  %1308 = vmatpush.msra.mxu1 %v458_v49  ;;  %v556_v48 = vld [vmem:[%s2289_s12 + $0x7d0] sm:$0xff]  ;;  %v506_v49 = vld [vmem:[%s2289_s12 + $0x640] sm:$0xff] }
  0x6b   : > { %1329 = vmatpush.msra.mxu2 %v473_v50  ;;  %1348 = vmatpush.msra.mxu3 %v490_v51  ;;  %v523_v50 = vld [vmem:[%s2289_s12 + $0x6c8] sm:$0xff]  ;;  %v538_v51 = vld [vmem:[%s2289_s12 + $0x740] sm:$0xff] }
  0x6c   : > { %1290 = vmatpush.msra.mxu0 %v440_v52  ;;  %1309 = vmatpush.msra.mxu1 %v457_v53  ;;  %v555_v52 = vld [vmem:[%s2289_s12 + $0x7c8] sm:$0xff]  ;;  %v505_v53 = vld [vmem:[%s2289_s12 + $0x638] sm:$0xff] }
  0x6d   : > { %1330 = vmatpush.msra.mxu2 %v472_v54  ;;  %1349 = vmatpush.msra.mxu3 %v489_v55  ;;  %v522_v54 = vld [vmem:[%s2289_s12 + $0x6c0] sm:$0xff]  ;;  %v537_v55 = vld [vmem:[%s2289_s12 + $0x738] sm:$0xff] }
  0x6e   : > { %1291 = vmatpush.msra.mxu0 %v439_v56  ;;  %1310 = vmatpush.msra.mxu1 %v456_v57  ;;  %v554_v56 = vld [vmem:[%s2289_s12 + $0x7c0] sm:$0xff]  ;;  %v504_v57 = vld [vmem:[%s2289_s12 + $0x630] sm:$0xff] }
  0x6f   : > { %1331 = vmatpush.msra.mxu2 %v471_v58  ;;  %1350 = vmatpush.msra.mxu3 %v488_v59  ;;  %v521_v58 = vld [vmem:[%s2289_s12 + $0x6b8] sm:$0xff]  ;;  %v536_v59 = vld [vmem:[%s2289_s12 + $0x730] sm:$0xff] }
  0x70   : > { %1292 = vmatpush.msra.mxu0 %v438_v60  ;;  %1311 = vmatpush.msra.mxu1 %v455_v61  ;;  %v553_v60 = vld [vmem:[%s2289_s12 + $0x7b8] sm:$0xff]  ;;  %v503_v61 = vld [vmem:[%s2289_s12 + $0x628] sm:$0xff] }
  0x71   : > { %1332 = vmatpush.msra.mxu2 %v470_v62  ;;  %1351 = vmatpush.msra.mxu3 %v487_v63  ;;  %v520_v62 = vld [vmem:[%s2289_s12 + $0x6b0] sm:$0xff]  ;;  %v535_v63 = vld [vmem:[%s2289_s12 + $0x728] sm:$0xff] }
  0x72   : > { %1293 = vmatpush.msra.mxu0 %v437_v0  ;;  %1312 = vmatpush.msra.mxu1 %v454_v1  ;;  %v552_v0 = vld [vmem:[%s2289_s12 + $0x7b0] sm:$0xff]  ;;  %v502_v1 = vld [vmem:[%s2289_s12 + $0x620] sm:$0xff] }
  0x73   : > { %1333 = vmatpush.msra.mxu2 %v469_v2  ;;  %1352 = vmatpush.msra.mxu3 %v486_v3  ;;  %v519_v2 = vld [vmem:[%s2289_s12 + $0x6a8] sm:$0xff]  ;;  %v534_v3 = vld [vmem:[%s2289_s12 + $0x720] sm:$0xff] }
  0x74   : > { %1294 = vmatpush.msra.mxu0 %v436_v4  ;;  %1313 = vmatpush.msra.mxu1 %v453_v5  ;;  %v551_v4 = vld [vmem:[%s2289_s12 + $0x7a8] sm:$0xff]  ;;  %v501_v5 = vld [vmem:[%s2289_s12 + $0x618] sm:$0xff] }
  0x75   : > { %1334 = vmatpush.msra.mxu2 %v468_v6  ;;  %1353 = vmatpush.msra.mxu3 %v485_v7  ;;  %v518_v6 = vld [vmem:[%s2289_s12 + $0x6a0] sm:$0xff]  ;;  %v533_v7 = vld [vmem:[%s2289_s12 + $0x718] sm:$0xff] }
  0x76   : > { %1295 = vmatpush.msra.mxu0 %v435_v8  ;;  %1314 = vmatpush.msra.mxu1 %v452_v9  ;;  %v550_v8 = vld [vmem:[%s2289_s12 + $0x7a0] sm:$0xff]  ;;  %v500_v9 = vld [vmem:[%s2289_s12 + $0x610] sm:$0xff] }
  0x77   : > { %1335 = vmatpush.msra.mxu2 %v467_v10  ;;  %1354 = vmatpush.msra.mxu3 %v484_v11  ;;  %v517_v10 = vld [vmem:[%s2289_s12 + $0x698] sm:$0xff]  ;;  %v532_v11 = vld [vmem:[%s2289_s12 + $0x710] sm:$0xff] }
  0x78   : > { %1296 = vmatpush.msra.mxu0 %v434_v12  ;;  %1315 = vmatpush.msra.mxu1 %v451_v13  ;;  %v549_v12 = vld [vmem:[%s2289_s12 + $0x798] sm:$0xff]  ;;  %v499_v13 = vld [vmem:[%s2289_s12 + $0x608] sm:$0xff] }
  0x79   : > { %1336 = vmatpush.msra.mxu2 %v466_v14  ;;  %1355 = vmatpush.msra.mxu3 %v483_v15  ;;  %v516_v14 = vld [vmem:[%s2289_s12 + $0x690] sm:$0xff]  ;;  %v531_v15 = vld [vmem:[%s2289_s12 + $0x708] sm:$0xff] }
  0x7a   : > { %1297 = vmatmul.f32.vlgmr.msra.gmra.mxu0 %v2454_v26  ;;  %1337 = vmatmul.f32.vlgmr.msra.gmra.mxu2 %v2456_v27  ;;  %v560_v26 = vld [vmem:[%s2289_s12 + $0x7f0] sm:$0xff]  ;;  %v510_v27 = vld [vmem:[%s2289_s12 + $0x660] sm:$0xff] }
  0x7b   : > { %1361 = vmatpush.msrb.mxu0 %v513_v16  ;;  %1401 = vmatpush.msrb.mxu2 %v545_v17  ;;  %v548_v16 = vld [vmem:[%s2289_s12 + $0x790] sm:$0xff]  ;;  %v498_v17 = vld [vmem:[%s2289_s12 + $0x600] sm:$0xff] }
  0x7c   : > { %1316 = vmatpush.msra.mxu1 %v450_v18  ;;  %1356 = vmatpush.msra.mxu3 %v482_v19  ;;  %v515_v18 = vld [vmem:[%s2289_s12 + $0x688] sm:$0xff]  ;;  %v530_v19 = vld [vmem:[%s2289_s12 + $0x700] sm:$0xff] }
  0x7d   : > { %1317 = vmatmul.f32.vlgmr.msra.gmra.mxu1 %v2458_v28  ;;  %1357 = vmatmul.f32.vlgmr.msra.gmra.mxu3 %v2462_v31  ;;  %v527_v28 = vld [vmem:[%s2289_s12 + $0x6e8] sm:$0xff]  ;;  %v2541_v31 = vld.sshfl [vmem:[#allocation1 + $0x38] sm:$0xff pattern:$0x73625140] }
  0x7e   : > { %1362 = vmatpush.msrb.mxu0 %v512_v20  ;;  %1381 = vmatpush.msrb.mxu1 %v529_v21  ;;  %1043 = vst [vmem:[#allocation1 + $0x20] ss:$4 sm:$0xff] %v300_v34  ;;  %v547_v20 = vld [vmem:[%s2289_s12 + $0x788] sm:$0xff]  ;;  %v577_v21 = vld [vmem:[%s2289_s12 + $0x878] sm:$0xff]  ;;  %v624_v34 = vld [vmem:[%s2289_s12 + $0x9f0] sm:$0xff] }
  0x7f   : > { %1402 = vmatpush.msrb.mxu2 %v544_v22  ;;  %1421 = vmatpush.msrb.mxu3 %v561_v23  ;;  %v609_v22 = vld [vmem:[%s2289_s12 + $0x978] sm:$0xff]  ;;  %v514_v23 = vld [vmem:[%s2289_s12 + $0x680] sm:$0xff] }
  0x80   : > { %1363 = vmatpush.msrb.mxu0 %v511_v24  ;;  %1382 = vmatpush.msrb.mxu1 %v528_v25  ;;  %v546_v24 = vld [vmem:[%s2289_s12 + $0x780] sm:$0xff]  ;;  %v576_v25 = vld [vmem:[%s2289_s12 + $0x870] sm:$0xff] }
  0x81   : > { %1403 = vmatpush.msrb.mxu2 %v543_v29  ;;  %1422 = vmatpush.msrb.mxu3 %v560_v26  ;;  %v593_v29 = vld [vmem:[%s2289_s12 + $0x8f8] sm:$0xff]  ;;  %v608_v26 = vld [vmem:[%s2289_s12 + $0x970] sm:$0xff] }
  0x82   : > { %1364 = vmatpush.msrb.mxu0 %v510_v27  ;;  %1383 = vmatpush.msrb.mxu1 %v527_v28  ;;  %v625_v27 = vld [vmem:[%s2289_s12 + $0x9f8] sm:$0xff]  ;;  %v607_v28 = vld [vmem:[%s2289_s12 + $0x968] sm:$0xff] }
  0x83   : > { %1404 = vmatpush.msrb.mxu2 %v542_v35  ;;  %1423 = vmatpush.msrb.mxu3 %v559_v36  ;;  %v574_v35 = vld [vmem:[%s2289_s12 + $0x860] sm:$0xff]  ;;  %v591_v36 = vld [vmem:[%s2289_s12 + $0x8e8] sm:$0xff] }
  0x84   : > { %1365 = vmatpush.msrb.mxu0 %v509_v37  ;;  %1384 = vmatpush.msrb.mxu1 %v526_v38  ;;  %v573_v37 = vld [vmem:[%s2289_s12 + $0x858] sm:$0xff]  ;;  %v590_v38 = vld [vmem:[%s2289_s12 + $0x8e0] sm:$0xff] }
  0x85   : > { %1405 = vmatpush.msrb.mxu2 %v541_v39  ;;  %1424 = vmatpush.msrb.mxu3 %v558_v40  ;;  %v605_v39 = vld [vmem:[%s2289_s12 + $0x958] sm:$0xff]  ;;  %v622_v40 = vld [vmem:[%s2289_s12 + $0x9e0] sm:$0xff] }
  0x86   : > { %1366 = vmatpush.msrb.mxu0 %v508_v41  ;;  %1385 = vmatpush.msrb.mxu1 %v525_v42  ;;  %v572_v41 = vld [vmem:[%s2289_s12 + $0x850] sm:$0xff]  ;;  %v589_v42 = vld [vmem:[%s2289_s12 + $0x8d8] sm:$0xff] }
  0x87   : > { %1406 = vmatpush.msrb.mxu2 %v540_v43  ;;  %1425 = vmatpush.msrb.mxu3 %v557_v44  ;;  %v604_v43 = vld [vmem:[%s2289_s12 + $0x950] sm:$0xff]  ;;  %v621_v44 = vld [vmem:[%s2289_s12 + $0x9d8] sm:$0xff] }
  0x88   : > { %1367 = vmatpush.msrb.mxu0 %v507_v45  ;;  %1386 = vmatpush.msrb.mxu1 %v524_v46  ;;  %v571_v45 = vld [vmem:[%s2289_s12 + $0x848] sm:$0xff]  ;;  %v588_v46 = vld [vmem:[%s2289_s12 + $0x8d0] sm:$0xff] }
  0x89   : > { %1407 = vmatpush.msrb.mxu2 %v539_v47  ;;  %1426 = vmatpush.msrb.mxu3 %v556_v48  ;;  %v603_v47 = vld [vmem:[%s2289_s12 + $0x948] sm:$0xff]  ;;  %v620_v48 = vld [vmem:[%s2289_s12 + $0x9d0] sm:$0xff] }
  0x8a   : > { %1368 = vmatpush.msrb.mxu0 %v506_v49  ;;  %1387 = vmatpush.msrb.mxu1 %v523_v50  ;;  %v570_v49 = vld [vmem:[%s2289_s12 + $0x840] sm:$0xff]  ;;  %v587_v50 = vld [vmem:[%s2289_s12 + $0x8c8] sm:$0xff] }
  0x8b   : > { %1408 = vmatpush.msrb.mxu2 %v538_v51  ;;  %1427 = vmatpush.msrb.mxu3 %v555_v52  ;;  %v602_v51 = vld [vmem:[%s2289_s12 + $0x940] sm:$0xff]  ;;  %v619_v52 = vld [vmem:[%s2289_s12 + $0x9c8] sm:$0xff] }
  0x8c   : > { %1369 = vmatpush.msrb.mxu0 %v505_v53  ;;  %1388 = vmatpush.msrb.mxu1 %v522_v54  ;;  %v569_v53 = vld [vmem:[%s2289_s12 + $0x838] sm:$0xff]  ;;  %v586_v54 = vld [vmem:[%s2289_s12 + $0x8c0] sm:$0xff] }
  0x8d   : > { %1409 = vmatpush.msrb.mxu2 %v537_v55  ;;  %1428 = vmatpush.msrb.mxu3 %v554_v56  ;;  %v601_v55 = vld [vmem:[%s2289_s12 + $0x938] sm:$0xff]  ;;  %v618_v56 = vld [vmem:[%s2289_s12 + $0x9c0] sm:$0xff] }
  0x8e   : > { %1370 = vmatpush.msrb.mxu0 %v504_v57  ;;  %1389 = vmatpush.msrb.mxu1 %v521_v58  ;;  %v568_v57 = vld [vmem:[%s2289_s12 + $0x830] sm:$0xff]  ;;  %v585_v58 = vld [vmem:[%s2289_s12 + $0x8b8] sm:$0xff] }
  0x8f   : > { %1410 = vmatpush.msrb.mxu2 %v536_v59  ;;  %1429 = vmatpush.msrb.mxu3 %v553_v60  ;;  %v600_v59 = vld [vmem:[%s2289_s12 + $0x930] sm:$0xff]  ;;  %v617_v60 = vld [vmem:[%s2289_s12 + $0x9b8] sm:$0xff] }
  0x90   : > { %1371 = vmatpush.msrb.mxu0 %v503_v61  ;;  %1390 = vmatpush.msrb.mxu1 %v520_v62  ;;  %v567_v61 = vld [vmem:[%s2289_s12 + $0x828] sm:$0xff]  ;;  %v584_v62 = vld [vmem:[%s2289_s12 + $0x8b0] sm:$0xff] }
  0x91   : > { %1411 = vmatpush.msrb.mxu2 %v535_v63  ;;  %1430 = vmatpush.msrb.mxu3 %v552_v0  ;;  %v599_v63 = vld [vmem:[%s2289_s12 + $0x928] sm:$0xff]  ;;  %v616_v0 = vld [vmem:[%s2289_s12 + $0x9b0] sm:$0xff] }
  0x92   : > { %1372 = vmatpush.msrb.mxu0 %v502_v1  ;;  %1391 = vmatpush.msrb.mxu1 %v519_v2  ;;  %v566_v1 = vld [vmem:[%s2289_s12 + $0x820] sm:$0xff]  ;;  %v583_v2 = vld [vmem:[%s2289_s12 + $0x8a8] sm:$0xff] }
  0x93   : > { %1412 = vmatpush.msrb.mxu2 %v534_v3  ;;  %1431 = vmatpush.msrb.mxu3 %v551_v4  ;;  %v598_v3 = vld [vmem:[%s2289_s12 + $0x920] sm:$0xff]  ;;  %v615_v4 = vld [vmem:[%s2289_s12 + $0x9a8] sm:$0xff] }
  0x94   : > { %1373 = vmatpush.msrb.mxu0 %v501_v5  ;;  %1392 = vmatpush.msrb.mxu1 %v518_v6  ;;  %v565_v5 = vld [vmem:[%s2289_s12 + $0x818] sm:$0xff]  ;;  %v582_v6 = vld [vmem:[%s2289_s12 + $0x8a0] sm:$0xff] }
  0x95   : > { %1413 = vmatpush.msrb.mxu2 %v533_v7  ;;  %1432 = vmatpush.msrb.mxu3 %v550_v8  ;;  %v597_v7 = vld [vmem:[%s2289_s12 + $0x918] sm:$0xff]  ;;  %v614_v8 = vld [vmem:[%s2289_s12 + $0x9a0] sm:$0xff] }
  0x96   : > { %1374 = vmatpush.msrb.mxu0 %v500_v9  ;;  %1393 = vmatpush.msrb.mxu1 %v517_v10  ;;  %v564_v9 = vld [vmem:[%s2289_s12 + $0x810] sm:$0xff]  ;;  %v581_v10 = vld [vmem:[%s2289_s12 + $0x898] sm:$0xff] }
  0x97   : > { %1414 = vmatpush.msrb.mxu2 %v532_v11  ;;  %1433 = vmatpush.msrb.mxu3 %v549_v12  ;;  %v596_v11 = vld [vmem:[%s2289_s12 + $0x910] sm:$0xff]  ;;  %v613_v12 = vld [vmem:[%s2289_s12 + $0x998] sm:$0xff] }
  0x98   : > { %1375 = vmatpush.msrb.mxu0 %v499_v13  ;;  %1394 = vmatpush.msrb.mxu1 %v516_v14  ;;  %v563_v13 = vld [vmem:[%s2289_s12 + $0x808] sm:$0xff]  ;;  %v580_v14 = vld [vmem:[%s2289_s12 + $0x890] sm:$0xff] }
  0x99   : > { %1415 = vmatpush.msrb.mxu2 %v531_v15  ;;  %1434 = vmatpush.msrb.mxu3 %v548_v16  ;;  %v595_v15 = vld [vmem:[%s2289_s12 + $0x908] sm:$0xff]  ;;  %v612_v16 = vld [vmem:[%s2289_s12 + $0x990] sm:$0xff] }
  0x9a   : > { %1376 = vmatpush.msrb.mxu0 %v498_v17  ;;  %1395 = vmatpush.msrb.mxu1 %v515_v18  ;;  %v562_v17 = vld [vmem:[%s2289_s12 + $0x800] sm:$0xff]  ;;  %v579_v18 = vld [vmem:[%s2289_s12 + $0x888] sm:$0xff] }
  0x9b   : > { %1416 = vmatpush.msrb.mxu2 %v530_v19  ;;  %1435 = vmatpush.msrb.mxu3 %v547_v20  ;;  %v594_v19 = vld [vmem:[%s2289_s12 + $0x900] sm:$0xff]  ;;  %v611_v20 = vld [vmem:[%s2289_s12 + $0x988] sm:$0xff] }
  0x9c   : > { %1377 = vmatmul.f32.vlgmr.msrb.gmra.mxu0 %v2533_v30  ;;  %1417 = vmatmul.f32.vlgmr.msrb.gmra.mxu2 %v2535_v32  ;;  %v575_v30 = vld [vmem:[%s2289_s12 + $0x868] sm:$0xff]  ;;  %v592_v32 = vld [vmem:[%s2289_s12 + $0x8f0] sm:$0xff] }
  0x9d   : > { %1441 = vmatpush.msra.mxu0 %v577_v21  ;;  %1481 = vmatpush.msra.mxu2 %v609_v22  ;;  %v1044_v21 = vld.sshfl [vmem:[#allocation1] sm:$0xff pattern:$0x73625140]  ;;  %v1046_v22 = vld.sshfl [vmem:[#allocation1 + $0x10] sm:$0xff pattern:$0x73625140] }
  0x9e   : > { %1396 = vmatpush.msrb.mxu1 %v514_v23  ;;  %1436 = vmatpush.msrb.mxu3 %v546_v24  ;;  %v641_v23 = vld [vmem:[%s2289_s12 + $0xa78] sm:$0xff] }
  0x9f   : > { %1397 = vmatmul.f32.vlgmr.msrb.gmra.mxu1 %v2537_v33  ;;  %1437 = vmatmul.f32.vlgmr.msrb.gmra.mxu3 %v2541_v31  ;;  %v606_v33 = vld [vmem:[%s2289_s12 + $0x960] sm:$0xff]  ;;  %v623_v31 = vld [vmem:[%s2289_s12 + $0x9e8] sm:$0xff]  ;;  %v673_v24 = vld [vmem:[%s2289_s12 + $0xb78] sm:$0xff] }
  0xa0   : > { %1442 = vmatpush.msra.mxu0 %v576_v25  ;;  %1461 = vmatpush.msra.mxu1 %v593_v29  ;;  %v578_v25 = vld [vmem:[%s2289_s12 + $0x880] sm:$0xff] }
  0xa1   : > { %1482 = vmatpush.msra.mxu2 %v608_v26  ;;  %1501 = vmatpush.msra.mxu3 %v625_v27  ;;  %v610_v29 = vld [vmem:[%s2289_s12 + $0x980] sm:$0xff]  ;;  %v1045_v26 = vld.sshfl [vmem:[#allocation1 + $0x8] sm:$0xff pattern:$0x73625140] }
  0xa2   : > { %1443 = vmatpush.msra.mxu0 %v575_v30  ;;  %1462 = vmatpush.msra.mxu1 %v592_v32  ;;  %v1047_v27 = vld.sshfl [vmem:[#allocation1 + $0x18] sm:$0xff pattern:$0x73625140]  ;;  %v640_v30 = vld [vmem:[%s2289_s12 + $0xa70] sm:$0xff] }
  0xa3   : > { %1483 = vmatpush.msra.mxu2 %v607_v28  ;;  %1502 = vmatpush.msra.mxu3 %v624_v34  ;;  %v657_v32 = vld [vmem:[%s2289_s12 + $0xaf8] sm:$0xff]  ;;  %v672_v28 = vld [vmem:[%s2289_s12 + $0xb70] sm:$0xff] }
  0xa4   : > { %1444 = vmatpush.msra.mxu0 %v574_v35  ;;  %1463 = vmatpush.msra.mxu1 %v591_v36  ;;  %v689_v34 = vld [vmem:[%s2289_s12 + $0xbf8] sm:$0xff]  ;;  %v639_v35 = vld [vmem:[%s2289_s12 + $0xa68] sm:$0xff]  ;;  %v656_v36 = vld [vmem:[%s2289_s12 + $0xaf0] sm:$0xff] }
  0xa5   : > { %1484 = vmatpush.msra.mxu2 %v606_v33  ;;  %1503 = vmatpush.msra.mxu3 %v623_v31  ;;  %v671_v33 = vld [vmem:[%s2289_s12 + $0xb68] sm:$0xff]  ;;  %v688_v31 = vld [vmem:[%s2289_s12 + $0xbf0] sm:$0xff] }
  0xa6   : > { %1445 = vmatpush.msra.mxu0 %v573_v37  ;;  %1464 = vmatpush.msra.mxu1 %v590_v38  ;;  %v638_v37 = vld [vmem:[%s2289_s12 + $0xa60] sm:$0xff]  ;;  %v655_v38 = vld [vmem:[%s2289_s12 + $0xae8] sm:$0xff] }
  0xa7   : > { %1485 = vmatpush.msra.mxu2 %v605_v39  ;;  %1504 = vmatpush.msra.mxu3 %v622_v40  ;;  %v670_v39 = vld [vmem:[%s2289_s12 + $0xb60] sm:$0xff]  ;;  %v687_v40 = vld [vmem:[%s2289_s12 + $0xbe8] sm:$0xff] }
  0xa8   : > { %1446 = vmatpush.msra.mxu0 %v572_v41  ;;  %1465 = vmatpush.msra.mxu1 %v589_v42  ;;  %v637_v41 = vld [vmem:[%s2289_s12 + $0xa58] sm:$0xff]  ;;  %v654_v42 = vld [vmem:[%s2289_s12 + $0xae0] sm:$0xff] }
  0xa9   : > { %1486 = vmatpush.msra.mxu2 %v604_v43  ;;  %1505 = vmatpush.msra.mxu3 %v621_v44  ;;  %v669_v43 = vld [vmem:[%s2289_s12 + $0xb58] sm:$0xff]  ;;  %v686_v44 = vld [vmem:[%s2289_s12 + $0xbe0] sm:$0xff] }
  0xaa   : > { %1447 = vmatpush.msra.mxu0 %v571_v45  ;;  %1466 = vmatpush.msra.mxu1 %v588_v46  ;;  %v636_v45 = vld [vmem:[%s2289_s12 + $0xa50] sm:$0xff]  ;;  %v653_v46 = vld [vmem:[%s2289_s12 + $0xad8] sm:$0xff] }
  0xab   : > { %1487 = vmatpush.msra.mxu2 %v603_v47  ;;  %1506 = vmatpush.msra.mxu3 %v620_v48  ;;  %v668_v47 = vld [vmem:[%s2289_s12 + $0xb50] sm:$0xff]  ;;  %v685_v48 = vld [vmem:[%s2289_s12 + $0xbd8] sm:$0xff] }
  0xac   : > { %1448 = vmatpush.msra.mxu0 %v570_v49  ;;  %1467 = vmatpush.msra.mxu1 %v587_v50  ;;  %v635_v49 = vld [vmem:[%s2289_s12 + $0xa48] sm:$0xff]  ;;  %v652_v50 = vld [vmem:[%s2289_s12 + $0xad0] sm:$0xff] }
  0xad   : > { %1488 = vmatpush.msra.mxu2 %v602_v51  ;;  %1507 = vmatpush.msra.mxu3 %v619_v52  ;;  %v667_v51 = vld [vmem:[%s2289_s12 + $0xb48] sm:$0xff]  ;;  %v684_v52 = vld [vmem:[%s2289_s12 + $0xbd0] sm:$0xff] }
  0xae   : > { %1449 = vmatpush.msra.mxu0 %v569_v53  ;;  %1468 = vmatpush.msra.mxu1 %v586_v54  ;;  %v634_v53 = vld [vmem:[%s2289_s12 + $0xa40] sm:$0xff]  ;;  %v651_v54 = vld [vmem:[%s2289_s12 + $0xac8] sm:$0xff] }
  0xaf   : > { %1489 = vmatpush.msra.mxu2 %v601_v55  ;;  %1508 = vmatpush.msra.mxu3 %v618_v56  ;;  %v666_v55 = vld [vmem:[%s2289_s12 + $0xb40] sm:$0xff]  ;;  %v683_v56 = vld [vmem:[%s2289_s12 + $0xbc8] sm:$0xff] }
  0xb0   : > { %1450 = vmatpush.msra.mxu0 %v568_v57  ;;  %1469 = vmatpush.msra.mxu1 %v585_v58  ;;  %v633_v57 = vld [vmem:[%s2289_s12 + $0xa38] sm:$0xff]  ;;  %v650_v58 = vld [vmem:[%s2289_s12 + $0xac0] sm:$0xff] }
  0xb1   : > { %1490 = vmatpush.msra.mxu2 %v600_v59  ;;  %1509 = vmatpush.msra.mxu3 %v617_v60  ;;  %v665_v59 = vld [vmem:[%s2289_s12 + $0xb38] sm:$0xff]  ;;  %v682_v60 = vld [vmem:[%s2289_s12 + $0xbc0] sm:$0xff] }
  0xb2   : > { %1451 = vmatpush.msra.mxu0 %v567_v61  ;;  %1470 = vmatpush.msra.mxu1 %v584_v62  ;;  %v632_v61 = vld [vmem:[%s2289_s12 + $0xa30] sm:$0xff]  ;;  %v649_v62 = vld [vmem:[%s2289_s12 + $0xab8] sm:$0xff] }
  0xb3   : > { %1491 = vmatpush.msra.mxu2 %v599_v63  ;;  %1510 = vmatpush.msra.mxu3 %v616_v0  ;;  %v664_v63 = vld [vmem:[%s2289_s12 + $0xb30] sm:$0xff]  ;;  %v681_v0 = vld [vmem:[%s2289_s12 + $0xbb8] sm:$0xff] }
  0xb4   : > { %1452 = vmatpush.msra.mxu0 %v566_v1  ;;  %1471 = vmatpush.msra.mxu1 %v583_v2  ;;  %v631_v1 = vld [vmem:[%s2289_s12 + $0xa28] sm:$0xff]  ;;  %v648_v2 = vld [vmem:[%s2289_s12 + $0xab0] sm:$0xff] }
  0xb5   : > { %1492 = vmatpush.msra.mxu2 %v598_v3  ;;  %1511 = vmatpush.msra.mxu3 %v615_v4  ;;  %v663_v3 = vld [vmem:[%s2289_s12 + $0xb28] sm:$0xff]  ;;  %v680_v4 = vld [vmem:[%s2289_s12 + $0xbb0] sm:$0xff] }
  0xb6   : > { %1453 = vmatpush.msra.mxu0 %v565_v5  ;;  %1472 = vmatpush.msra.mxu1 %v582_v6  ;;  %v630_v5 = vld [vmem:[%s2289_s12 + $0xa20] sm:$0xff]  ;;  %v647_v6 = vld [vmem:[%s2289_s12 + $0xaa8] sm:$0xff] }
  0xb7   : > { %1493 = vmatpush.msra.mxu2 %v597_v7  ;;  %1512 = vmatpush.msra.mxu3 %v614_v8  ;;  %v662_v7 = vld [vmem:[%s2289_s12 + $0xb20] sm:$0xff]  ;;  %v679_v8 = vld [vmem:[%s2289_s12 + $0xba8] sm:$0xff] }
  0xb8   : > { %1454 = vmatpush.msra.mxu0 %v564_v9  ;;  %1473 = vmatpush.msra.mxu1 %v581_v10  ;;  %v629_v9 = vld [vmem:[%s2289_s12 + $0xa18] sm:$0xff]  ;;  %v646_v10 = vld [vmem:[%s2289_s12 + $0xaa0] sm:$0xff] }
  0xb9   : > { %1494 = vmatpush.msra.mxu2 %v596_v11  ;;  %1513 = vmatpush.msra.mxu3 %v613_v12  ;;  %v661_v11 = vld [vmem:[%s2289_s12 + $0xb18] sm:$0xff]  ;;  %v678_v12 = vld [vmem:[%s2289_s12 + $0xba0] sm:$0xff] }
  0xba   : > { %1455 = vmatpush.msra.mxu0 %v563_v13  ;;  %1474 = vmatpush.msra.mxu1 %v580_v14  ;;  %v628_v13 = vld [vmem:[%s2289_s12 + $0xa10] sm:$0xff]  ;;  %v645_v14 = vld [vmem:[%s2289_s12 + $0xa98] sm:$0xff] }
  0xbb   : > { %1495 = vmatpush.msra.mxu2 %v595_v15  ;;  %1514 = vmatpush.msra.mxu3 %v612_v16  ;;  %v660_v15 = vld [vmem:[%s2289_s12 + $0xb10] sm:$0xff]  ;;  %v677_v16 = vld [vmem:[%s2289_s12 + $0xb98] sm:$0xff] }
  0xbc   : > { %1456 = vmatpush.msra.mxu0 %v562_v17  ;;  %1475 = vmatpush.msra.mxu1 %v579_v18  ;;  %v627_v17 = vld [vmem:[%s2289_s12 + $0xa08] sm:$0xff]  ;;  %v644_v18 = vld [vmem:[%s2289_s12 + $0xa90] sm:$0xff] }
  0xbd   : > { %1496 = vmatpush.msra.mxu2 %v594_v19  ;;  %1515 = vmatpush.msra.mxu3 %v611_v20  ;;  %v301_v19 = vld [vmem:[%s2284_s8 + $0x30] sm:$0xff]  ;;  %v659_v20 = vld [vmem:[%s2289_s12 + $0xb08] sm:$0xff] }
  0xbe   : > { %1457 = vmatmul.f32.vlgmr.msra.gmra.mxu0 %v1044_v21  ;;  %1497 = vmatmul.f32.vlgmr.msra.gmra.mxu2 %v1046_v22  ;;  %v676_v21 = vld [vmem:[%s2289_s12 + $0xb90] sm:$0xff]  ;;  %1052 = vst [vmem:[#allocation1] ss:$4 sm:$0xff] %v301_v19  ;;  %v626_v22 = vld [vmem:[%s2289_s12 + $0xa00] sm:$0xff]  ;;  %v709_v19 = vld [vmem:[%s2289_s12 + $0xc98] sm:$0xff] }
  0xbf   : > { %1521 = vmatpush.msrb.mxu0 %v641_v23  ;;  %1561 = vmatpush.msrb.mxu2 %v673_v24  ;;  %v643_v23 = vld [vmem:[%s2289_s12 + $0xa88] sm:$0xff]  ;;  %v658_v24 = vld [vmem:[%s2289_s12 + $0xb00] sm:$0xff] }
  0xc0   : > { %1476 = vmatpush.msra.mxu1 %v578_v25  ;;  %1516 = vmatpush.msra.mxu3 %v610_v29  ;;  %v675_v25 = vld [vmem:[%s2289_s12 + $0xb88] sm:$0xff]  ;;  %v1048_v29 = vld.sshfl [vmem:[#allocation1 + $0x20] sm:$0xff pattern:$0x73625140] }
  0xc1   : > { %1477 = vmatmul.f32.vlgmr.msra.gmra.mxu1 %v1045_v26  ;;  %1517 = vmatmul.f32.vlgmr.msra.gmra.mxu3 %v1047_v27  ;;  %v1050_v26 = vld.sshfl [vmem:[#allocation1 + $0x30] sm:$0xff pattern:$0x73625140]  ;;  %v705_v27 = vld [vmem:[%s2289_s12 + $0xc78] sm:$0xff] }
  0xc2   : > { %1522 = vmatpush.msrb.mxu0 %v640_v30  ;;  %1541 = vmatpush.msrb.mxu1 %v657_v32  ;;  %v737_v30 = vld [vmem:[%s2289_s12 + $0xd78] sm:$0xff]  ;;  %v642_v32 = vld [vmem:[%s2289_s12 + $0xa80] sm:$0xff] }
  0xc3   : > { %1562 = vmatpush.msrb.mxu2 %v672_v28  ;;  %1581 = vmatpush.msrb.mxu3 %v689_v34  ;;  %v674_v28 = vld [vmem:[%s2289_s12 + $0xb80] sm:$0xff]  ;;  %v1049_v34 = vld.sshfl [vmem:[#allocation1 + $0x28] sm:$0xff pattern:$0x73625140] }
  0xc4   : > { %1523 = vmatpush.msrb.mxu0 %v639_v35  ;;  %1542 = vmatpush.msrb.mxu1 %v656_v36  ;;  %v1051_v35 = vld.sshfl [vmem:[#allocation1 + $0x38] sm:$0xff pattern:$0x73625140]  ;;  %v704_v36 = vld [vmem:[%s2289_s12 + $0xc70] sm:$0xff] }
  0xc5   : > { %1563 = vmatpush.msrb.mxu2 %v671_v33  ;;  %1582 = vmatpush.msrb.mxu3 %v688_v31  ;;  %v721_v33 = vld [vmem:[%s2289_s12 + $0xcf8] sm:$0xff]  ;;  %v736_v31 = vld [vmem:[%s2289_s12 + $0xd70] sm:$0xff] }
  0xc6   : > { %1524 = vmatpush.msrb.mxu0 %v638_v37  ;;  %1543 = vmatpush.msrb.mxu1 %v655_v38  ;;  %v753_v37 = vld [vmem:[%s2289_s12 + $0xdf8] sm:$0xff]  ;;  %v703_v38 = vld [vmem:[%s2289_s12 + $0xc68] sm:$0xff] }
  0xc7   : > { %1564 = vmatpush.msrb.mxu2 %v670_v39  ;;  %1583 = vmatpush.msrb.mxu3 %v687_v40  ;;  %v720_v39 = vld [vmem:[%s2289_s12 + $0xcf0] sm:$0xff]  ;;  %v735_v40 = vld [vmem:[%s2289_s12 + $0xd68] sm:$0xff] }
  0xc8   : > { %1525 = vmatpush.msrb.mxu0 %v637_v41  ;;  %1544 = vmatpush.msrb.mxu1 %v654_v42  ;;  %v752_v41 = vld [vmem:[%s2289_s12 + $0xdf0] sm:$0xff]  ;;  %v702_v42 = vld [vmem:[%s2289_s12 + $0xc60] sm:$0xff] }
  0xc9   : > { %1565 = vmatpush.msrb.mxu2 %v669_v43  ;;  %1584 = vmatpush.msrb.mxu3 %v686_v44  ;;  %v719_v43 = vld [vmem:[%s2289_s12 + $0xce8] sm:$0xff]  ;;  %v734_v44 = vld [vmem:[%s2289_s12 + $0xd60] sm:$0xff] }
  0xca   : > { %1526 = vmatpush.msrb.mxu0 %v636_v45  ;;  %1545 = vmatpush.msrb.mxu1 %v653_v46  ;;  %v751_v45 = vld [vmem:[%s2289_s12 + $0xde8] sm:$0xff]  ;;  %v701_v46 = vld [vmem:[%s2289_s12 + $0xc58] sm:$0xff] }
  0xcb   : > { %1566 = vmatpush.msrb.mxu2 %v668_v47  ;;  %1585 = vmatpush.msrb.mxu3 %v685_v48  ;;  %v718_v47 = vld [vmem:[%s2289_s12 + $0xce0] sm:$0xff]  ;;  %v733_v48 = vld [vmem:[%s2289_s12 + $0xd58] sm:$0xff] }
  0xcc   : > { %1527 = vmatpush.msrb.mxu0 %v635_v49  ;;  %1546 = vmatpush.msrb.mxu1 %v652_v50  ;;  %v750_v49 = vld [vmem:[%s2289_s12 + $0xde0] sm:$0xff]  ;;  %v700_v50 = vld [vmem:[%s2289_s12 + $0xc50] sm:$0xff] }
  0xcd   : > { %1567 = vmatpush.msrb.mxu2 %v667_v51  ;;  %1586 = vmatpush.msrb.mxu3 %v684_v52  ;;  %v717_v51 = vld [vmem:[%s2289_s12 + $0xcd8] sm:$0xff]  ;;  %v732_v52 = vld [vmem:[%s2289_s12 + $0xd50] sm:$0xff] }
  0xce   : > { %1528 = vmatpush.msrb.mxu0 %v634_v53  ;;  %1547 = vmatpush.msrb.mxu1 %v651_v54  ;;  %v749_v53 = vld [vmem:[%s2289_s12 + $0xdd8] sm:$0xff]  ;;  %v699_v54 = vld [vmem:[%s2289_s12 + $0xc48] sm:$0xff] }
  0xcf   : > { %1568 = vmatpush.msrb.mxu2 %v666_v55  ;;  %1587 = vmatpush.msrb.mxu3 %v683_v56  ;;  %v716_v55 = vld [vmem:[%s2289_s12 + $0xcd0] sm:$0xff]  ;;  %v731_v56 = vld [vmem:[%s2289_s12 + $0xd48] sm:$0xff] }
  0xd0   : > { %1529 = vmatpush.msrb.mxu0 %v633_v57  ;;  %1548 = vmatpush.msrb.mxu1 %v650_v58  ;;  %v748_v57 = vld [vmem:[%s2289_s12 + $0xdd0] sm:$0xff]  ;;  %v698_v58 = vld [vmem:[%s2289_s12 + $0xc40] sm:$0xff] }
  0xd1   : > { %1569 = vmatpush.msrb.mxu2 %v665_v59  ;;  %1588 = vmatpush.msrb.mxu3 %v682_v60  ;;  %v715_v59 = vld [vmem:[%s2289_s12 + $0xcc8] sm:$0xff]  ;;  %v730_v60 = vld [vmem:[%s2289_s12 + $0xd40] sm:$0xff] }
  0xd2   : > { %1530 = vmatpush.msrb.mxu0 %v632_v61  ;;  %1549 = vmatpush.msrb.mxu1 %v649_v62  ;;  %v747_v61 = vld [vmem:[%s2289_s12 + $0xdc8] sm:$0xff]  ;;  %v697_v62 = vld [vmem:[%s2289_s12 + $0xc38] sm:$0xff] }
  0xd3   : > { %1570 = vmatpush.msrb.mxu2 %v664_v63  ;;  %1589 = vmatpush.msrb.mxu3 %v681_v0  ;;  %v714_v63 = vld [vmem:[%s2289_s12 + $0xcc0] sm:$0xff]  ;;  %v729_v0 = vld [vmem:[%s2289_s12 + $0xd38] sm:$0xff] }
  0xd4   : > { %1531 = vmatpush.msrb.mxu0 %v631_v1  ;;  %1550 = vmatpush.msrb.mxu1 %v648_v2  ;;  %v746_v1 = vld [vmem:[%s2289_s12 + $0xdc0] sm:$0xff]  ;;  %v696_v2 = vld [vmem:[%s2289_s12 + $0xc30] sm:$0xff] }
  0xd5   : > { %1571 = vmatpush.msrb.mxu2 %v663_v3  ;;  %1590 = vmatpush.msrb.mxu3 %v680_v4  ;;  %v713_v3 = vld [vmem:[%s2289_s12 + $0xcb8] sm:$0xff]  ;;  %v728_v4 = vld [vmem:[%s2289_s12 + $0xd30] sm:$0xff] }
  0xd6   : > { %1532 = vmatpush.msrb.mxu0 %v630_v5  ;;  %1551 = vmatpush.msrb.mxu1 %v647_v6  ;;  %v745_v5 = vld [vmem:[%s2289_s12 + $0xdb8] sm:$0xff]  ;;  %v695_v6 = vld [vmem:[%s2289_s12 + $0xc28] sm:$0xff] }
  0xd7   : > { %1572 = vmatpush.msrb.mxu2 %v662_v7  ;;  %1591 = vmatpush.msrb.mxu3 %v679_v8  ;;  %v712_v7 = vld [vmem:[%s2289_s12 + $0xcb0] sm:$0xff]  ;;  %v727_v8 = vld [vmem:[%s2289_s12 + $0xd28] sm:$0xff] }
  0xd8   : > { %1533 = vmatpush.msrb.mxu0 %v629_v9  ;;  %1552 = vmatpush.msrb.mxu1 %v646_v10  ;;  %v744_v9 = vld [vmem:[%s2289_s12 + $0xdb0] sm:$0xff]  ;;  %v694_v10 = vld [vmem:[%s2289_s12 + $0xc20] sm:$0xff] }
  0xd9   : > { %1573 = vmatpush.msrb.mxu2 %v661_v11  ;;  %1592 = vmatpush.msrb.mxu3 %v678_v12  ;;  %v711_v11 = vld [vmem:[%s2289_s12 + $0xca8] sm:$0xff]  ;;  %v726_v12 = vld [vmem:[%s2289_s12 + $0xd20] sm:$0xff] }
  0xda   : > { %1534 = vmatpush.msrb.mxu0 %v628_v13  ;;  %1553 = vmatpush.msrb.mxu1 %v645_v14  ;;  %v743_v13 = vld [vmem:[%s2289_s12 + $0xda8] sm:$0xff]  ;;  %v693_v14 = vld [vmem:[%s2289_s12 + $0xc18] sm:$0xff] }
  0xdb   : > { %1574 = vmatpush.msrb.mxu2 %v660_v15  ;;  %1593 = vmatpush.msrb.mxu3 %v677_v16  ;;  %v710_v15 = vld [vmem:[%s2289_s12 + $0xca0] sm:$0xff]  ;;  %v725_v16 = vld [vmem:[%s2289_s12 + $0xd18] sm:$0xff] }
  0xdc   : > { %1535 = vmatpush.msrb.mxu0 %v627_v17  ;;  %1554 = vmatpush.msrb.mxu1 %v644_v18  ;;  %v742_v17 = vld [vmem:[%s2289_s12 + $0xda0] sm:$0xff]  ;;  %v692_v18 = vld [vmem:[%s2289_s12 + $0xc10] sm:$0xff] }
  0xdd   : > { %1575 = vmatpush.msrb.mxu2 %v659_v20  ;;  %1594 = vmatpush.msrb.mxu3 %v676_v21  ;;  %v724_v20 = vld [vmem:[%s2289_s12 + $0xd10] sm:$0xff]  ;;  %v741_v21 = vld [vmem:[%s2289_s12 + $0xd98] sm:$0xff] }
  0xde   : > { %1536 = vmatpush.msrb.mxu0 %v626_v22  ;;  %1555 = vmatpush.msrb.mxu1 %v643_v23  ;;  %v691_v22 = vld [vmem:[%s2289_s12 + $0xc08] sm:$0xff]  ;;  %v708_v23 = vld [vmem:[%s2289_s12 + $0xc90] sm:$0xff] }
  0xdf   : > { %1576 = vmatpush.msrb.mxu2 %v658_v24  ;;  %1595 = vmatpush.msrb.mxu3 %v675_v25  ;;  %v302_v24 = vld [vmem:[%s2284_s8 + $0x38] sm:$0xff]  ;;  %v723_v25 = vld [vmem:[%s2289_s12 + $0xd08] sm:$0xff] }
  0xe0   : > { %1537 = vmatmul.f32.vlgmr.msrb.gmra.mxu0 %v1048_v29  ;;  %1577 = vmatmul.f32.vlgmr.msrb.gmra.mxu2 %v1050_v26  ;;  %v740_v29 = vld [vmem:[%s2289_s12 + $0xd90] sm:$0xff]  ;;  %1053 = vst [vmem:[#allocation1 + $0x20] ss:$4 sm:$0xff] %v302_v24  ;;  %v690_v26 = vld [vmem:[%s2289_s12 + $0xc00] sm:$0xff]  ;;  %v773_v24 = vld [vmem:[%s2289_s12 + $0xe98] sm:$0xff] }
  0xe1   : > { %1601 = vmatpush.msra.mxu0 %v705_v27  ;;  %1641 = vmatpush.msra.mxu2 %v737_v30  ;;  %v707_v27 = vld [vmem:[%s2289_s12 + $0xc88] sm:$0xff]  ;;  %v722_v30 = vld [vmem:[%s2289_s12 + $0xd00] sm:$0xff] }
  0xe2   : > { %1556 = vmatpush.msrb.mxu1 %v642_v32  ;;  %1596 = vmatpush.msrb.mxu3 %v674_v28  ;;  %v739_v32 = vld [vmem:[%s2289_s12 + $0xd88] sm:$0xff]  ;;  %v1054_v28 = vld.sshfl [vmem:[#allocation1] sm:$0xff pattern:$0x73625140] }
  0xe3   : > { %1557 = vmatmul.f32.vlgmr.msrb.gmra.mxu1 %v1049_v34  ;;  %1597 = vmatmul.f32.vlgmr.msrb.gmra.mxu3 %v1051_v35  ;;  %v1056_v34 = vld.sshfl [vmem:[#allocation1 + $0x10] sm:$0xff pattern:$0x73625140]  ;;  %v769_v35 = vld [vmem:[%s2289_s12 + $0xe78] sm:$0xff] }
  0xe4   : > { %1602 = vmatpush.msra.mxu0 %v704_v36  ;;  %1621 = vmatpush.msra.mxu1 %v721_v33  ;;  %v801_v36 = vld [vmem:[%s2289_s12 + $0xf78] sm:$0xff]  ;;  %v706_v33 = vld [vmem:[%s2289_s12 + $0xc80] sm:$0xff] }
  0xe5   : > { %1642 = vmatpush.msra.mxu2 %v736_v31  ;;  %1661 = vmatpush.msra.mxu3 %v753_v37  ;;  %v738_v31 = vld [vmem:[%s2289_s12 + $0xd80] sm:$0xff]  ;;  %v1055_v37 = vld.sshfl [vmem:[#allocation1 + $0x8] sm:$0xff pattern:$0x73625140] }
  0xe6   : > { %1603 = vmatpush.msra.mxu0 %v703_v38  ;;  %1622 = vmatpush.msra.mxu1 %v720_v39  ;;  %v1057_v38 = vld.sshfl [vmem:[#allocation1 + $0x18] sm:$0xff pattern:$0x73625140]  ;;  %v768_v39 = vld [vmem:[%s2289_s12 + $0xe70] sm:$0xff] }
  0xe7   : > { %1643 = vmatpush.msra.mxu2 %v735_v40  ;;  %1662 = vmatpush.msra.mxu3 %v752_v41  ;;  %v785_v40 = vld [vmem:[%s2289_s12 + $0xef8] sm:$0xff]  ;;  %v800_v41 = vld [vmem:[%s2289_s12 + $0xf70] sm:$0xff] }
  0xe8   : > { %1604 = vmatpush.msra.mxu0 %v702_v42  ;;  %1623 = vmatpush.msra.mxu1 %v719_v43  ;;  %v817_v42 = vld [vmem:[%s2289_s12 + $0xff8] sm:$0xff]  ;;  %v767_v43 = vld [vmem:[%s2289_s12 + $0xe68] sm:$0xff] }
  0xe9   : > { %1644 = vmatpush.msra.mxu2 %v734_v44  ;;  %1663 = vmatpush.msra.mxu3 %v751_v45  ;;  %v784_v44 = vld [vmem:[%s2289_s12 + $0xef0] sm:$0xff]  ;;  %v799_v45 = vld [vmem:[%s2289_s12 + $0xf68] sm:$0xff] }
  0xea   : > { %1605 = vmatpush.msra.mxu0 %v701_v46  ;;  %1624 = vmatpush.msra.mxu1 %v718_v47  ;;  %v816_v46 = vld [vmem:[%s2289_s12 + $0xff0] sm:$0xff]  ;;  %v766_v47 = vld [vmem:[%s2289_s12 + $0xe60] sm:$0xff] }
  0xeb   : > { %1645 = vmatpush.msra.mxu2 %v733_v48  ;;  %1664 = vmatpush.msra.mxu3 %v750_v49  ;;  %v783_v48 = vld [vmem:[%s2289_s12 + $0xee8] sm:$0xff]  ;;  %v798_v49 = vld [vmem:[%s2289_s12 + $0xf60] sm:$0xff] }
  0xec   : > { %1606 = vmatpush.msra.mxu0 %v700_v50  ;;  %1625 = vmatpush.msra.mxu1 %v717_v51  ;;  %v815_v50 = vld [vmem:[%s2289_s12 + $0xfe8] sm:$0xff]  ;;  %v765_v51 = vld [vmem:[%s2289_s12 + $0xe58] sm:$0xff] }
  0xed   : > { %1646 = vmatpush.msra.mxu2 %v732_v52  ;;  %1665 = vmatpush.msra.mxu3 %v749_v53  ;;  %v782_v52 = vld [vmem:[%s2289_s12 + $0xee0] sm:$0xff]  ;;  %v797_v53 = vld [vmem:[%s2289_s12 + $0xf58] sm:$0xff] }
  0xee   : > { %1607 = vmatpush.msra.mxu0 %v699_v54  ;;  %1626 = vmatpush.msra.mxu1 %v716_v55  ;;  %v814_v54 = vld [vmem:[%s2289_s12 + $0xfe0] sm:$0xff]  ;;  %v764_v55 = vld [vmem:[%s2289_s12 + $0xe50] sm:$0xff] }
  0xef   : > { %1647 = vmatpush.msra.mxu2 %v731_v56  ;;  %1666 = vmatpush.msra.mxu3 %v748_v57  ;;  %v781_v56 = vld [vmem:[%s2289_s12 + $0xed8] sm:$0xff]  ;;  %v796_v57 = vld [vmem:[%s2289_s12 + $0xf50] sm:$0xff] }
  0xf0   : > { %1608 = vmatpush.msra.mxu0 %v698_v58  ;;  %1627 = vmatpush.msra.mxu1 %v715_v59  ;;  %v813_v58 = vld [vmem:[%s2289_s12 + $0xfd8] sm:$0xff]  ;;  %v763_v59 = vld [vmem:[%s2289_s12 + $0xe48] sm:$0xff] }
  0xf1   : > { %1648 = vmatpush.msra.mxu2 %v730_v60  ;;  %1667 = vmatpush.msra.mxu3 %v747_v61  ;;  %v780_v60 = vld [vmem:[%s2289_s12 + $0xed0] sm:$0xff]  ;;  %v795_v61 = vld [vmem:[%s2289_s12 + $0xf48] sm:$0xff] }
  0xf2   : > { %1609 = vmatpush.msra.mxu0 %v697_v62  ;;  %1628 = vmatpush.msra.mxu1 %v714_v63  ;;  %v812_v62 = vld [vmem:[%s2289_s12 + $0xfd0] sm:$0xff]  ;;  %v762_v63 = vld [vmem:[%s2289_s12 + $0xe40] sm:$0xff] }
  0xf3   : > { %1649 = vmatpush.msra.mxu2 %v729_v0  ;;  %1668 = vmatpush.msra.mxu3 %v746_v1  ;;  %v779_v0 = vld [vmem:[%s2289_s12 + $0xec8] sm:$0xff]  ;;  %v794_v1 = vld [vmem:[%s2289_s12 + $0xf40] sm:$0xff] }
  0xf4   : > { %1610 = vmatpush.msra.mxu0 %v696_v2  ;;  %1629 = vmatpush.msra.mxu1 %v713_v3  ;;  %v811_v2 = vld [vmem:[%s2289_s12 + $0xfc8] sm:$0xff]  ;;  %v761_v3 = vld [vmem:[%s2289_s12 + $0xe38] sm:$0xff] }
  0xf5   : > { %1650 = vmatpush.msra.mxu2 %v728_v4  ;;  %1669 = vmatpush.msra.mxu3 %v745_v5  ;;  %v778_v4 = vld [vmem:[%s2289_s12 + $0xec0] sm:$0xff]  ;;  %v793_v5 = vld [vmem:[%s2289_s12 + $0xf38] sm:$0xff] }
  0xf6   : > { %1611 = vmatpush.msra.mxu0 %v695_v6  ;;  %1630 = vmatpush.msra.mxu1 %v712_v7  ;;  %v810_v6 = vld [vmem:[%s2289_s12 + $0xfc0] sm:$0xff]  ;;  %v760_v7 = vld [vmem:[%s2289_s12 + $0xe30] sm:$0xff] }
  0xf7   : > { %1651 = vmatpush.msra.mxu2 %v727_v8  ;;  %1670 = vmatpush.msra.mxu3 %v744_v9  ;;  %v777_v8 = vld [vmem:[%s2289_s12 + $0xeb8] sm:$0xff]  ;;  %v792_v9 = vld [vmem:[%s2289_s12 + $0xf30] sm:$0xff] }
  0xf8   : > { %1612 = vmatpush.msra.mxu0 %v694_v10  ;;  %1631 = vmatpush.msra.mxu1 %v711_v11  ;;  %v809_v10 = vld [vmem:[%s2289_s12 + $0xfb8] sm:$0xff]  ;;  %v759_v11 = vld [vmem:[%s2289_s12 + $0xe28] sm:$0xff] }
  0xf9   : > { %1652 = vmatpush.msra.mxu2 %v726_v12  ;;  %1671 = vmatpush.msra.mxu3 %v743_v13  ;;  %v776_v12 = vld [vmem:[%s2289_s12 + $0xeb0] sm:$0xff]  ;;  %v791_v13 = vld [vmem:[%s2289_s12 + $0xf28] sm:$0xff] }
  0xfa   : > { %1613 = vmatpush.msra.mxu0 %v693_v14  ;;  %1632 = vmatpush.msra.mxu1 %v710_v15  ;;  %v808_v14 = vld [vmem:[%s2289_s12 + $0xfb0] sm:$0xff]  ;;  %v758_v15 = vld [vmem:[%s2289_s12 + $0xe20] sm:$0xff] }
  0xfb   : > { %1653 = vmatpush.msra.mxu2 %v725_v16  ;;  %1672 = vmatpush.msra.mxu3 %v742_v17  ;;  %v775_v16 = vld [vmem:[%s2289_s12 + $0xea8] sm:$0xff]  ;;  %v790_v17 = vld [vmem:[%s2289_s12 + $0xf20] sm:$0xff] }
  0xfc   : > { %1614 = vmatpush.msra.mxu0 %v692_v18  ;;  %1633 = vmatpush.msra.mxu1 %v709_v19  ;;  %v807_v18 = vld [vmem:[%s2289_s12 + $0xfa8] sm:$0xff]  ;;  %v757_v19 = vld [vmem:[%s2289_s12 + $0xe18] sm:$0xff] }
  0xfd   : > { %1654 = vmatpush.msra.mxu2 %v724_v20  ;;  %1673 = vmatpush.msra.mxu3 %v741_v21  ;;  %v774_v20 = vld [vmem:[%s2289_s12 + $0xea0] sm:$0xff]  ;;  %v789_v21 = vld [vmem:[%s2289_s12 + $0xf18] sm:$0xff] }
  0xfe   : > { %1615 = vmatpush.msra.mxu0 %v691_v22  ;;  %1634 = vmatpush.msra.mxu1 %v708_v23  ;;  %v806_v22 = vld [vmem:[%s2289_s12 + $0xfa0] sm:$0xff]  ;;  %v756_v23 = vld [vmem:[%s2289_s12 + $0xe10] sm:$0xff] }
  0xff   : > { %1655 = vmatpush.msra.mxu2 %v723_v25  ;;  %1674 = vmatpush.msra.mxu3 %v740_v29  ;;  %v788_v25 = vld [vmem:[%s2289_s12 + $0xf10] sm:$0xff]  ;;  %v805_v29 = vld [vmem:[%s2289_s12 + $0xf98] sm:$0xff] }
 0x100   : > { %1616 = vmatpush.msra.mxu0 %v690_v26  ;;  %1635 = vmatpush.msra.mxu1 %v707_v27  ;;  %v755_v26 = vld [vmem:[%s2289_s12 + $0xe08] sm:$0xff]  ;;  %v772_v27 = vld [vmem:[%s2289_s12 + $0xe90] sm:$0xff] }
 0x101   : > { %1656 = vmatpush.msra.mxu2 %v722_v30  ;;  %1675 = vmatpush.msra.mxu3 %v739_v32  ;;  %v303_v30 = vld [vmem:[%s2284_s8 + $0x40] sm:$0xff]  ;;  %v787_v32 = vld [vmem:[%s2289_s12 + $0xf08] sm:$0xff] }
 0x102   : > { %1617 = vmatmul.f32.vlgmr.msra.gmra.mxu0 %v1054_v28  ;;  %1657 = vmatmul.f32.vlgmr.msra.gmra.mxu2 %v1056_v34  ;;  %v804_v28 = vld [vmem:[%s2289_s12 + $0xf90] sm:$0xff]  ;;  %1062 = vst [vmem:[#allocation1] ss:$4 sm:$0xff] %v303_v30  ;;  %v754_v34 = vld [vmem:[%s2289_s12 + $0xe00] sm:$0xff]  ;;  %v837_v30 = vld [vmem:[%s2289_s12 + $0x1098] sm:$0xff] }
 0x103   : > { %1681 = vmatpush.msrb.mxu0 %v769_v35  ;;  %1721 = vmatpush.msrb.mxu2 %v801_v36  ;;  %v771_v35 = vld [vmem:[%s2289_s12 + $0xe88] sm:$0xff]  ;;  %v786_v36 = vld [vmem:[%s2289_s12 + $0xf00] sm:$0xff] }
 0x104   : > { %1636 = vmatpush.msra.mxu1 %v706_v33  ;;  %1676 = vmatpush.msra.mxu3 %v738_v31  ;;  %v803_v33 = vld [vmem:[%s2289_s12 + $0xf88] sm:$0xff]  ;;  %v1058_v31 = vld.sshfl [vmem:[#allocation1 + $0x20] sm:$0xff pattern:$0x73625140] }
 0x105   : > { %1637 = vmatmul.f32.vlgmr.msra.gmra.mxu1 %v1055_v37  ;;  %1677 = vmatmul.f32.vlgmr.msra.gmra.mxu3 %v1057_v38  ;;  %v1060_v37 = vld.sshfl [vmem:[#allocation1 + $0x30] sm:$0xff pattern:$0x73625140]  ;;  %v833_v38 = vld [vmem:[%s2289_s12 + $0x1078] sm:$0xff] }
 0x106   : > { %1682 = vmatpush.msrb.mxu0 %v768_v39  ;;  %1701 = vmatpush.msrb.mxu1 %v785_v40  ;;  %v865_v39 = vld [vmem:[%s2289_s12 + $0x1178] sm:$0xff]  ;;  %v770_v40 = vld [vmem:[%s2289_s12 + $0xe80] sm:$0xff] }
 0x107   : > { %1722 = vmatpush.msrb.mxu2 %v800_v41  ;;  %1741 = vmatpush.msrb.mxu3 %v817_v42  ;;  %v802_v41 = vld [vmem:[%s2289_s12 + $0xf80] sm:$0xff]  ;;  %v1059_v42 = vld.sshfl [vmem:[#allocation1 + $0x28] sm:$0xff pattern:$0x73625140] }
 0x108   : > { %1683 = vmatpush.msrb.mxu0 %v767_v43  ;;  %1702 = vmatpush.msrb.mxu1 %v784_v44  ;;  %v1061_v43 = vld.sshfl [vmem:[#allocation1 + $0x38] sm:$0xff pattern:$0x73625140]  ;;  %v832_v44 = vld [vmem:[%s2289_s12 + $0x1070] sm:$0xff] }
 0x109   : > { %1723 = vmatpush.msrb.mxu2 %v799_v45  ;;  %1742 = vmatpush.msrb.mxu3 %v816_v46  ;;  %v849_v45 = vld [vmem:[%s2289_s12 + $0x10f8] sm:$0xff]  ;;  %v864_v46 = vld [vmem:[%s2289_s12 + $0x1170] sm:$0xff] }
 0x10a   : > { %1684 = vmatpush.msrb.mxu0 %v766_v47  ;;  %1703 = vmatpush.msrb.mxu1 %v783_v48  ;;  %v881_v47 = vld [vmem:[%s2289_s12 + $0x11f8] sm:$0xff]  ;;  %v831_v48 = vld [vmem:[%s2289_s12 + $0x1068] sm:$0xff] }
 0x10b   : > { %1724 = vmatpush.msrb.mxu2 %v798_v49  ;;  %1743 = vmatpush.msrb.mxu3 %v815_v50  ;;  %v848_v49 = vld [vmem:[%s2289_s12 + $0x10f0] sm:$0xff]  ;;  %v863_v50 = vld [vmem:[%s2289_s12 + $0x1168] sm:$0xff] }
 0x10c   : > { %1685 = vmatpush.msrb.mxu0 %v765_v51  ;;  %1704 = vmatpush.msrb.mxu1 %v782_v52  ;;  %v880_v51 = vld [vmem:[%s2289_s12 + $0x11f0] sm:$0xff]  ;;  %v830_v52 = vld [vmem:[%s2289_s12 + $0x1060] sm:$0xff] }
 0x10d   : > { %1725 = vmatpush.msrb.mxu2 %v797_v53  ;;  %1744 = vmatpush.msrb.mxu3 %v814_v54  ;;  %v847_v53 = vld [vmem:[%s2289_s12 + $0x10e8] sm:$0xff]  ;;  %v862_v54 = vld [vmem:[%s2289_s12 + $0x1160] sm:$0xff] }
 0x10e   : > { %1686 = vmatpush.msrb.mxu0 %v764_v55  ;;  %1705 = vmatpush.msrb.mxu1 %v781_v56  ;;  %v879_v55 = vld [vmem:[%s2289_s12 + $0x11e8] sm:$0xff]  ;;  %v829_v56 = vld [vmem:[%s2289_s12 + $0x1058] sm:$0xff] }
 0x10f   : > { %1726 = vmatpush.msrb.mxu2 %v796_v57  ;;  %1745 = vmatpush.msrb.mxu3 %v813_v58  ;;  %v846_v57 = vld [vmem:[%s2289_s12 + $0x10e0] sm:$0xff]  ;;  %v861_v58 = vld [vmem:[%s2289_s12 + $0x1158] sm:$0xff] }
 0x110   : > { %1687 = vmatpush.msrb.mxu0 %v763_v59  ;;  %1706 = vmatpush.msrb.mxu1 %v780_v60  ;;  %v878_v59 = vld [vmem:[%s2289_s12 + $0x11e0] sm:$0xff]  ;;  %v828_v60 = vld [vmem:[%s2289_s12 + $0x1050] sm:$0xff] }
 0x111   : > { %1727 = vmatpush.msrb.mxu2 %v795_v61  ;;  %1746 = vmatpush.msrb.mxu3 %v812_v62  ;;  %v845_v61 = vld [vmem:[%s2289_s12 + $0x10d8] sm:$0xff]  ;;  %v860_v62 = vld [vmem:[%s2289_s12 + $0x1150] sm:$0xff] }
 0x112   : > { %1688 = vmatpush.msrb.mxu0 %v762_v63  ;;  %1707 = vmatpush.msrb.mxu1 %v779_v0  ;;  %v877_v63 = vld [vmem:[%s2289_s12 + $0x11d8] sm:$0xff]  ;;  %v827_v0 = vld [vmem:[%s2289_s12 + $0x1048] sm:$0xff] }
 0x113   : > { %1728 = vmatpush.msrb.mxu2 %v794_v1  ;;  %1747 = vmatpush.msrb.mxu3 %v811_v2  ;;  %v844_v1 = vld [vmem:[%s2289_s12 + $0x10d0] sm:$0xff]  ;;  %v859_v2 = vld [vmem:[%s2289_s12 + $0x1148] sm:$0xff] }
 0x114   : > { %1689 = vmatpush.msrb.mxu0 %v761_v3  ;;  %1708 = vmatpush.msrb.mxu1 %v778_v4  ;;  %v876_v3 = vld [vmem:[%s2289_s12 + $0x11d0] sm:$0xff]  ;;  %v826_v4 = vld [vmem:[%s2289_s12 + $0x1040] sm:$0xff] }
 0x115   : > { %1729 = vmatpush.msrb.mxu2 %v793_v5  ;;  %1748 = vmatpush.msrb.mxu3 %v810_v6  ;;  %v843_v5 = vld [vmem:[%s2289_s12 + $0x10c8] sm:$0xff]  ;;  %v858_v6 = vld [vmem:[%s2289_s12 + $0x1140] sm:$0xff] }
 0x116   : > { %1690 = vmatpush.msrb.mxu0 %v760_v7  ;;  %1709 = vmatpush.msrb.mxu1 %v777_v8  ;;  %v875_v7 = vld [vmem:[%s2289_s12 + $0x11c8] sm:$0xff]  ;;  %v825_v8 = vld [vmem:[%s2289_s12 + $0x1038] sm:$0xff] }
 0x117   : > { %1730 = vmatpush.msrb.mxu2 %v792_v9  ;;  %1749 = vmatpush.msrb.mxu3 %v809_v10  ;;  %v842_v9 = vld [vmem:[%s2289_s12 + $0x10c0] sm:$0xff]  ;;  %v857_v10 = vld [vmem:[%s2289_s12 + $0x1138] sm:$0xff] }
 0x118   : > { %1691 = vmatpush.msrb.mxu0 %v759_v11  ;;  %1710 = vmatpush.msrb.mxu1 %v776_v12  ;;  %v874_v11 = vld [vmem:[%s2289_s12 + $0x11c0] sm:$0xff]  ;;  %v824_v12 = vld [vmem:[%s2289_s12 + $0x1030] sm:$0xff] }
 0x119   : > { %1731 = vmatpush.msrb.mxu2 %v791_v13  ;;  %1750 = vmatpush.msrb.mxu3 %v808_v14  ;;  %v841_v13 = vld [vmem:[%s2289_s12 + $0x10b8] sm:$0xff]  ;;  %v856_v14 = vld [vmem:[%s2289_s12 + $0x1130] sm:$0xff] }
 0x11a   : > { %1692 = vmatpush.msrb.mxu0 %v758_v15  ;;  %1711 = vmatpush.msrb.mxu1 %v775_v16  ;;  %v873_v15 = vld [vmem:[%s2289_s12 + $0x11b8] sm:$0xff]  ;;  %v823_v16 = vld [vmem:[%s2289_s12 + $0x1028] sm:$0xff] }
 0x11b   : > { %1732 = vmatpush.msrb.mxu2 %v790_v17  ;;  %1751 = vmatpush.msrb.mxu3 %v807_v18  ;;  %v840_v17 = vld [vmem:[%s2289_s12 + $0x10b0] sm:$0xff]  ;;  %v855_v18 = vld [vmem:[%s2289_s12 + $0x1128] sm:$0xff] }
 0x11c   : > { %1693 = vmatpush.msrb.mxu0 %v757_v19  ;;  %1712 = vmatpush.msrb.mxu1 %v774_v20  ;;  %v872_v19 = vld [vmem:[%s2289_s12 + $0x11b0] sm:$0xff]  ;;  %v822_v20 = vld [vmem:[%s2289_s12 + $0x1020] sm:$0xff] }
 0x11d   : > { %1733 = vmatpush.msrb.mxu2 %v789_v21  ;;  %1752 = vmatpush.msrb.mxu3 %v806_v22  ;;  %v839_v21 = vld [vmem:[%s2289_s12 + $0x10a8] sm:$0xff]  ;;  %v854_v22 = vld [vmem:[%s2289_s12 + $0x1120] sm:$0xff] }
 0x11e   : > { %1694 = vmatpush.msrb.mxu0 %v756_v23  ;;  %1713 = vmatpush.msrb.mxu1 %v773_v24  ;;  %v871_v23 = vld [vmem:[%s2289_s12 + $0x11a8] sm:$0xff]  ;;  %v821_v24 = vld [vmem:[%s2289_s12 + $0x1018] sm:$0xff] }
 0x11f   : > { %1734 = vmatpush.msrb.mxu2 %v788_v25  ;;  %1753 = vmatpush.msrb.mxu3 %v805_v29  ;;  %v838_v25 = vld [vmem:[%s2289_s12 + $0x10a0] sm:$0xff]  ;;  %v853_v29 = vld [vmem:[%s2289_s12 + $0x1118] sm:$0xff] }
 0x120   : > { %1695 = vmatpush.msrb.mxu0 %v755_v26  ;;  %1714 = vmatpush.msrb.mxu1 %v772_v27  ;;  %v870_v26 = vld [vmem:[%s2289_s12 + $0x11a0] sm:$0xff]  ;;  %v820_v27 = vld [vmem:[%s2289_s12 + $0x1010] sm:$0xff] }
 0x121   : > { %1735 = vmatpush.msrb.mxu2 %v787_v32  ;;  %1754 = vmatpush.msrb.mxu3 %v804_v28  ;;  %v852_v32 = vld [vmem:[%s2289_s12 + $0x1110] sm:$0xff]  ;;  %v869_v28 = vld [vmem:[%s2289_s12 + $0x1198] sm:$0xff] }
 0x122   : > { %1696 = vmatpush.msrb.mxu0 %v754_v34  ;;  %1715 = vmatpush.msrb.mxu1 %v771_v35  ;;  %v819_v34 = vld [vmem:[%s2289_s12 + $0x1008] sm:$0xff]  ;;  %v836_v35 = vld [vmem:[%s2289_s12 + $0x1090] sm:$0xff] }
 0x123   : > { %1736 = vmatpush.msrb.mxu2 %v786_v36  ;;  %1755 = vmatpush.msrb.mxu3 %v803_v33  ;;  %v304_v36 = vld [vmem:[%s2284_s8 + $0x48] sm:$0xff] }
 0x124   : > { %1697 = vmatmul.f32.vlgmr.msrb.gmra.mxu0 %v1058_v31  ;;  %1737 = vmatmul.f32.vlgmr.msrb.gmra.mxu2 %v1060_v37  ;;  %v851_v33 = vld [vmem:[%s2289_s12 + $0x1108] sm:$0xff]  ;;  %v868_v31 = vld [vmem:[%s2289_s12 + $0x1190] sm:$0xff]  ;;  %1063 = vst [vmem:[#allocation1 + $0x20] ss:$4 sm:$0xff] %v304_v36  ;;  %v818_v37 = vld [vmem:[%s2289_s12 + $0x1000] sm:$0xff] }
 0x125   : > { %1761 = vmatpush.msra.mxu0 %v833_v38  ;;  %1801 = vmatpush.msra.mxu2 %v865_v39  ;;  %v835_v38 = vld [vmem:[%s2289_s12 + $0x1088] sm:$0xff]  ;;  %v850_v39 = vld [vmem:[%s2289_s12 + $0x1100] sm:$0xff]  ;;  %v901_v36 = vld [vmem:[%s2289_s12 + $0x1298] sm:$0xff] }
 0x126   : > { %1716 = vmatpush.msrb.mxu1 %v770_v40  ;;  %1756 = vmatpush.msrb.mxu3 %v802_v41  ;;  %v867_v40 = vld [vmem:[%s2289_s12 + $0x1188] sm:$0xff]  ;;  %v1064_v41 = vld.sshfl [vmem:[#allocation1] sm:$0xff pattern:$0x73625140] }
 0x127   : > { %1717 = vmatmul.f32.vlgmr.msrb.gmra.mxu1 %v1059_v42  ;;  %1757 = vmatmul.f32.vlgmr.msrb.gmra.mxu3 %v1061_v43  ;;  %v1066_v42 = vld.sshfl [vmem:[#allocation1 + $0x10] sm:$0xff pattern:$0x73625140]  ;;  %v897_v43 = vld [vmem:[%s2289_s12 + $0x1278] sm:$0xff] }
 0x128   : > { %1762 = vmatpush.msra.mxu0 %v832_v44  ;;  %1781 = vmatpush.msra.mxu1 %v849_v45  ;;  %v929_v44 = vld [vmem:[%s2289_s12 + $0x1378] sm:$0xff]  ;;  %v834_v45 = vld [vmem:[%s2289_s12 + $0x1080] sm:$0xff] }
 0x129   : > { %1802 = vmatpush.msra.mxu2 %v864_v46  ;;  %1821 = vmatpush.msra.mxu3 %v881_v47  ;;  %v866_v46 = vld [vmem:[%s2289_s12 + $0x1180] sm:$0xff]  ;;  %v1065_v47 = vld.sshfl [vmem:[#allocation1 + $0x8] sm:$0xff pattern:$0x73625140] }
 0x12a   : > { %1763 = vmatpush.msra.mxu0 %v831_v48  ;;  %1782 = vmatpush.msra.mxu1 %v848_v49  ;;  %v1067_v48 = vld.sshfl [vmem:[#allocation1 + $0x18] sm:$0xff pattern:$0x73625140]  ;;  %v896_v49 = vld [vmem:[%s2289_s12 + $0x1270] sm:$0xff] }
 0x12b   : > { %1803 = vmatpush.msra.mxu2 %v863_v50  ;;  %1822 = vmatpush.msra.mxu3 %v880_v51  ;;  %v913_v50 = vld [vmem:[%s2289_s12 + $0x12f8] sm:$0xff]  ;;  %v928_v51 = vld [vmem:[%s2289_s12 + $0x1370] sm:$0xff] }
 0x12c   : > { %1764 = vmatpush.msra.mxu0 %v830_v52  ;;  %1783 = vmatpush.msra.mxu1 %v847_v53  ;;  %v945_v52 = vld [vmem:[%s2289_s12 + $0x13f8] sm:$0xff]  ;;  %v895_v53 = vld [vmem:[%s2289_s12 + $0x1268] sm:$0xff] }
 0x12d   : > { %1804 = vmatpush.msra.mxu2 %v862_v54  ;;  %1823 = vmatpush.msra.mxu3 %v879_v55  ;;  %v912_v54 = vld [vmem:[%s2289_s12 + $0x12f0] sm:$0xff]  ;;  %v927_v55 = vld [vmem:[%s2289_s12 + $0x1368] sm:$0xff] }
 0x12e   : > { %1765 = vmatpush.msra.mxu0 %v829_v56  ;;  %1784 = vmatpush.msra.mxu1 %v846_v57  ;;  %v944_v56 = vld [vmem:[%s2289_s12 + $0x13f0] sm:$0xff]  ;;  %v894_v57 = vld [vmem:[%s2289_s12 + $0x1260] sm:$0xff] }
 0x12f   : > { %1805 = vmatpush.msra.mxu2 %v861_v58  ;;  %1824 = vmatpush.msra.mxu3 %v878_v59  ;;  %v911_v58 = vld [vmem:[%s2289_s12 + $0x12e8] sm:$0xff]  ;;  %v926_v59 = vld [vmem:[%s2289_s12 + $0x1360] sm:$0xff] }
 0x130   : > { %1766 = vmatpush.msra.mxu0 %v828_v60  ;;  %1785 = vmatpush.msra.mxu1 %v845_v61  ;;  %v943_v60 = vld [vmem:[%s2289_s12 + $0x13e8] sm:$0xff]  ;;  %v893_v61 = vld [vmem:[%s2289_s12 + $0x1258] sm:$0xff] }
 0x131   : > { %1806 = vmatpush.msra.mxu2 %v860_v62  ;;  %1825 = vmatpush.msra.mxu3 %v877_v63  ;;  %v910_v62 = vld [vmem:[%s2289_s12 + $0x12e0] sm:$0xff]  ;;  %v925_v63 = vld [vmem:[%s2289_s12 + $0x1358] sm:$0xff] }
 0x132   : > { %1767 = vmatpush.msra.mxu0 %v827_v0  ;;  %1786 = vmatpush.msra.mxu1 %v844_v1  ;;  %v942_v0 = vld [vmem:[%s2289_s12 + $0x13e0] sm:$0xff]  ;;  %v892_v1 = vld [vmem:[%s2289_s12 + $0x1250] sm:$0xff] }
 0x133   : > { %1807 = vmatpush.msra.mxu2 %v859_v2  ;;  %1826 = vmatpush.msra.mxu3 %v876_v3  ;;  %v909_v2 = vld [vmem:[%s2289_s12 + $0x12d8] sm:$0xff]  ;;  %v924_v3 = vld [vmem:[%s2289_s12 + $0x1350] sm:$0xff] }
 0x134   : > { %1768 = vmatpush.msra.mxu0 %v826_v4  ;;  %1787 = vmatpush.msra.mxu1 %v843_v5  ;;  %v941_v4 = vld [vmem:[%s2289_s12 + $0x13d8] sm:$0xff]  ;;  %v891_v5 = vld [vmem:[%s2289_s12 + $0x1248] sm:$0xff] }
 0x135   : > { %1808 = vmatpush.msra.mxu2 %v858_v6  ;;  %1827 = vmatpush.msra.mxu3 %v875_v7  ;;  %v908_v6 = vld [vmem:[%s2289_s12 + $0x12d0] sm:$0xff]  ;;  %v923_v7 = vld [vmem:[%s2289_s12 + $0x1348] sm:$0xff] }
 0x136   : > { %1769 = vmatpush.msra.mxu0 %v825_v8  ;;  %1788 = vmatpush.msra.mxu1 %v842_v9  ;;  %v940_v8 = vld [vmem:[%s2289_s12 + $0x13d0] sm:$0xff]  ;;  %v890_v9 = vld [vmem:[%s2289_s12 + $0x1240] sm:$0xff] }
 0x137   : > { %1809 = vmatpush.msra.mxu2 %v857_v10  ;;  %1828 = vmatpush.msra.mxu3 %v874_v11  ;;  %v907_v10 = vld [vmem:[%s2289_s12 + $0x12c8] sm:$0xff]  ;;  %v922_v11 = vld [vmem:[%s2289_s12 + $0x1340] sm:$0xff] }
 0x138   : > { %1770 = vmatpush.msra.mxu0 %v824_v12  ;;  %1789 = vmatpush.msra.mxu1 %v841_v13  ;;  %v939_v12 = vld [vmem:[%s2289_s12 + $0x13c8] sm:$0xff]  ;;  %v889_v13 = vld [vmem:[%s2289_s12 + $0x1238] sm:$0xff] }
 0x139   : > { %1810 = vmatpush.msra.mxu2 %v856_v14  ;;  %1829 = vmatpush.msra.mxu3 %v873_v15  ;;  %v906_v14 = vld [vmem:[%s2289_s12 + $0x12c0] sm:$0xff]  ;;  %v921_v15 = vld [vmem:[%s2289_s12 + $0x1338] sm:$0xff] }
 0x13a   : > { %1771 = vmatpush.msra.mxu0 %v823_v16  ;;  %1790 = vmatpush.msra.mxu1 %v840_v17  ;;  %v938_v16 = vld [vmem:[%s2289_s12 + $0x13c0] sm:$0xff]  ;;  %v888_v17 = vld [vmem:[%s2289_s12 + $0x1230] sm:$0xff] }
 0x13b   : > { %1811 = vmatpush.msra.mxu2 %v855_v18  ;;  %1830 = vmatpush.msra.mxu3 %v872_v19  ;;  %v905_v18 = vld [vmem:[%s2289_s12 + $0x12b8] sm:$0xff]  ;;  %v920_v19 = vld [vmem:[%s2289_s12 + $0x1330] sm:$0xff] }
 0x13c   : > { %1772 = vmatpush.msra.mxu0 %v822_v20  ;;  %1791 = vmatpush.msra.mxu1 %v839_v21  ;;  %v937_v20 = vld [vmem:[%s2289_s12 + $0x13b8] sm:$0xff]  ;;  %v887_v21 = vld [vmem:[%s2289_s12 + $0x1228] sm:$0xff] }
 0x13d   : > { %1812 = vmatpush.msra.mxu2 %v854_v22  ;;  %1831 = vmatpush.msra.mxu3 %v871_v23  ;;  %v904_v22 = vld [vmem:[%s2289_s12 + $0x12b0] sm:$0xff]  ;;  %v919_v23 = vld [vmem:[%s2289_s12 + $0x1328] sm:$0xff] }
 0x13e   : > { %1773 = vmatpush.msra.mxu0 %v821_v24  ;;  %1792 = vmatpush.msra.mxu1 %v838_v25  ;;  %v936_v24 = vld [vmem:[%s2289_s12 + $0x13b0] sm:$0xff]  ;;  %v886_v25 = vld [vmem:[%s2289_s12 + $0x1220] sm:$0xff] }
 0x13f   : > { %1813 = vmatpush.msra.mxu2 %v853_v29  ;;  %1832 = vmatpush.msra.mxu3 %v870_v26  ;;  %v903_v29 = vld [vmem:[%s2289_s12 + $0x12a8] sm:$0xff]  ;;  %v918_v26 = vld [vmem:[%s2289_s12 + $0x1320] sm:$0xff] }
 0x140   : > { %1774 = vmatpush.msra.mxu0 %v820_v27  ;;  %1793 = vmatpush.msra.mxu1 %v837_v30  ;;  %v935_v27 = vld [vmem:[%s2289_s12 + $0x13a8] sm:$0xff]  ;;  %v885_v30 = vld [vmem:[%s2289_s12 + $0x1218] sm:$0xff] }
 0x141   : > { %1814 = vmatpush.msra.mxu2 %v852_v32  ;;  %1833 = vmatpush.msra.mxu3 %v869_v28  ;;  %v902_v32 = vld [vmem:[%s2289_s12 + $0x12a0] sm:$0xff]  ;;  %v917_v28 = vld [vmem:[%s2289_s12 + $0x1318] sm:$0xff] }
 0x142   : > { %1775 = vmatpush.msra.mxu0 %v819_v34  ;;  %1794 = vmatpush.msra.mxu1 %v836_v35  ;;  %v934_v34 = vld [vmem:[%s2289_s12 + $0x13a0] sm:$0xff]  ;;  %v884_v35 = vld [vmem:[%s2289_s12 + $0x1210] sm:$0xff] }
 0x143   : > { %1815 = vmatpush.msra.mxu2 %v851_v33  ;;  %1834 = vmatpush.msra.mxu3 %v868_v31  ;;  %v916_v33 = vld [vmem:[%s2289_s12 + $0x1310] sm:$0xff]  ;;  %v933_v31 = vld [vmem:[%s2289_s12 + $0x1398] sm:$0xff] }
 0x144   : > { %1776 = vmatpush.msra.mxu0 %v818_v37  ;;  %1795 = vmatpush.msra.mxu1 %v835_v38  ;;  %v883_v37 = vld [vmem:[%s2289_s12 + $0x1208] sm:$0xff]  ;;  %v900_v38 = vld [vmem:[%s2289_s12 + $0x1290] sm:$0xff] }
 0x145   : > { %1816 = vmatpush.msra.mxu2 %v850_v39  ;;  %1835 = vmatpush.msra.mxu3 %v867_v40  ;;  %v305_v39 = vld [vmem:[%s2284_s8 + $0x50] sm:$0xff]  ;;  %v915_v40 = vld [vmem:[%s2289_s12 + $0x1308] sm:$0xff] }
 0x146   : > { %1777 = vmatmul.f32.vlgmr.msra.gmra.mxu0 %v1064_v41  ;;  %1817 = vmatmul.f32.vlgmr.msra.gmra.mxu2 %v1066_v42  ;;  %v932_v41 = vld [vmem:[%s2289_s12 + $0x1390] sm:$0xff]  ;;  %1072 = vst [vmem:[#allocation1] ss:$4 sm:$0xff] %v305_v39  ;;  %v882_v42 = vld [vmem:[%s2289_s12 + $0x1200] sm:$0xff]  ;;  %v965_v39 = vld [vmem:[%s2289_s12 + $0x1498] sm:$0xff] }
 0x147   : > { %1841 = vmatpush.msrb.mxu0 %v897_v43  ;;  %1881 = vmatpush.msrb.mxu2 %v929_v44  ;;  %v899_v43 = vld [vmem:[%s2289_s12 + $0x1288] sm:$0xff]  ;;  %v914_v44 = vld [vmem:[%s2289_s12 + $0x1300] sm:$0xff] }
 0x148   : > { %1796 = vmatpush.msra.mxu1 %v834_v45  ;;  %1836 = vmatpush.msra.mxu3 %v866_v46  ;;  %v931_v45 = vld [vmem:[%s2289_s12 + $0x1388] sm:$0xff]  ;;  %v1068_v46 = vld.sshfl [vmem:[#allocation1 + $0x20] sm:$0xff pattern:$0x73625140] }
 0x149   : > { %1797 = vmatmul.f32.vlgmr.msra.gmra.mxu1 %v1065_v47  ;;  %1837 = vmatmul.f32.vlgmr.msra.gmra.mxu3 %v1067_v48  ;;  %v1070_v47 = vld.sshfl [vmem:[#allocation1 + $0x30] sm:$0xff pattern:$0x73625140]  ;;  %v961_v48 = vld [vmem:[%s2289_s12 + $0x1478] sm:$0xff] }
 0x14a   : > { %1842 = vmatpush.msrb.mxu0 %v896_v49  ;;  %1861 = vmatpush.msrb.mxu1 %v913_v50  ;;  %v993_v49 = vld [vmem:[%s2289_s12 + $0x1578] sm:$0xff]  ;;  %v898_v50 = vld [vmem:[%s2289_s12 + $0x1280] sm:$0xff] }
 0x14b   : > { %1882 = vmatpush.msrb.mxu2 %v928_v51  ;;  %1901 = vmatpush.msrb.mxu3 %v945_v52  ;;  %v930_v51 = vld [vmem:[%s2289_s12 + $0x1380] sm:$0xff]  ;;  %v1069_v52 = vld.sshfl [vmem:[#allocation1 + $0x28] sm:$0xff pattern:$0x73625140] }
 0x14c   : > { %1843 = vmatpush.msrb.mxu0 %v895_v53  ;;  %1862 = vmatpush.msrb.mxu1 %v912_v54  ;;  %v1071_v53 = vld.sshfl [vmem:[#allocation1 + $0x38] sm:$0xff pattern:$0x73625140]  ;;  %v960_v54 = vld [vmem:[%s2289_s12 + $0x1470] sm:$0xff] }
 0x14d   : > { %1883 = vmatpush.msrb.mxu2 %v927_v55  ;;  %1902 = vmatpush.msrb.mxu3 %v944_v56  ;;  %v977_v55 = vld [vmem:[%s2289_s12 + $0x14f8] sm:$0xff]  ;;  %v992_v56 = vld [vmem:[%s2289_s12 + $0x1570] sm:$0xff] }
 0x14e   : > { %1844 = vmatpush.msrb.mxu0 %v894_v57  ;;  %1863 = vmatpush.msrb.mxu1 %v911_v58  ;;  %v1009_v57 = vld [vmem:[%s2289_s12 + $0x15f8] sm:$0xff]  ;;  %v959_v58 = vld [vmem:[%s2289_s12 + $0x1468] sm:$0xff] }
 0x14f   : > { %1884 = vmatpush.msrb.mxu2 %v926_v59  ;;  %1903 = vmatpush.msrb.mxu3 %v943_v60  ;;  %v976_v59 = vld [vmem:[%s2289_s12 + $0x14f0] sm:$0xff]  ;;  %v991_v60 = vld [vmem:[%s2289_s12 + $0x1568] sm:$0xff] }
 0x150   : > { %1845 = vmatpush.msrb.mxu0 %v893_v61  ;;  %1864 = vmatpush.msrb.mxu1 %v910_v62  ;;  %v1008_v61 = vld [vmem:[%s2289_s12 + $0x15f0] sm:$0xff]  ;;  %v958_v62 = vld [vmem:[%s2289_s12 + $0x1460] sm:$0xff] }
 0x151   : > { %1885 = vmatpush.msrb.mxu2 %v925_v63  ;;  %1904 = vmatpush.msrb.mxu3 %v942_v0  ;;  %v975_v63 = vld [vmem:[%s2289_s12 + $0x14e8] sm:$0xff]  ;;  %v990_v0 = vld [vmem:[%s2289_s12 + $0x1560] sm:$0xff] }
 0x152   : > { %1846 = vmatpush.msrb.mxu0 %v892_v1  ;;  %1865 = vmatpush.msrb.mxu1 %v909_v2  ;;  %v1007_v1 = vld [vmem:[%s2289_s12 + $0x15e8] sm:$0xff]  ;;  %v957_v2 = vld [vmem:[%s2289_s12 + $0x1458] sm:$0xff] }
 0x153   : > { %1886 = vmatpush.msrb.mxu2 %v924_v3  ;;  %1905 = vmatpush.msrb.mxu3 %v941_v4  ;;  %v974_v3 = vld [vmem:[%s2289_s12 + $0x14e0] sm:$0xff]  ;;  %v989_v4 = vld [vmem:[%s2289_s12 + $0x1558] sm:$0xff] }
 0x154   : > { %1847 = vmatpush.msrb.mxu0 %v891_v5  ;;  %1866 = vmatpush.msrb.mxu1 %v908_v6  ;;  %v1006_v5 = vld [vmem:[%s2289_s12 + $0x15e0] sm:$0xff]  ;;  %v956_v6 = vld [vmem:[%s2289_s12 + $0x1450] sm:$0xff] }
 0x155   : > { %1887 = vmatpush.msrb.mxu2 %v923_v7  ;;  %1906 = vmatpush.msrb.mxu3 %v940_v8  ;;  %v973_v7 = vld [vmem:[%s2289_s12 + $0x14d8] sm:$0xff]  ;;  %v988_v8 = vld [vmem:[%s2289_s12 + $0x1550] sm:$0xff] }
 0x156   : > { %1848 = vmatpush.msrb.mxu0 %v890_v9  ;;  %1867 = vmatpush.msrb.mxu1 %v907_v10  ;;  %v1005_v9 = vld [vmem:[%s2289_s12 + $0x15d8] sm:$0xff]  ;;  %v955_v10 = vld [vmem:[%s2289_s12 + $0x1448] sm:$0xff] }
 0x157   : > { %1888 = vmatpush.msrb.mxu2 %v922_v11  ;;  %1907 = vmatpush.msrb.mxu3 %v939_v12  ;;  %v972_v11 = vld [vmem:[%s2289_s12 + $0x14d0] sm:$0xff]  ;;  %v987_v12 = vld [vmem:[%s2289_s12 + $0x1548] sm:$0xff] }
 0x158   : > { %1849 = vmatpush.msrb.mxu0 %v889_v13  ;;  %1868 = vmatpush.msrb.mxu1 %v906_v14  ;;  %v1004_v13 = vld [vmem:[%s2289_s12 + $0x15d0] sm:$0xff]  ;;  %v954_v14 = vld [vmem:[%s2289_s12 + $0x1440] sm:$0xff] }
 0x159   : > { %1889 = vmatpush.msrb.mxu2 %v921_v15  ;;  %1908 = vmatpush.msrb.mxu3 %v938_v16  ;;  %v971_v15 = vld [vmem:[%s2289_s12 + $0x14c8] sm:$0xff]  ;;  %v986_v16 = vld [vmem:[%s2289_s12 + $0x1540] sm:$0xff] }
 0x15a   : > { %1850 = vmatpush.msrb.mxu0 %v888_v17  ;;  %1869 = vmatpush.msrb.mxu1 %v905_v18  ;;  %v1003_v17 = vld [vmem:[%s2289_s12 + $0x15c8] sm:$0xff]  ;;  %v953_v18 = vld [vmem:[%s2289_s12 + $0x1438] sm:$0xff] }
 0x15b   : > { %1890 = vmatpush.msrb.mxu2 %v920_v19  ;;  %1909 = vmatpush.msrb.mxu3 %v937_v20  ;;  %v970_v19 = vld [vmem:[%s2289_s12 + $0x14c0] sm:$0xff]  ;;  %v985_v20 = vld [vmem:[%s2289_s12 + $0x1538] sm:$0xff] }
 0x15c   : > { %1851 = vmatpush.msrb.mxu0 %v887_v21  ;;  %1870 = vmatpush.msrb.mxu1 %v904_v22  ;;  %v1002_v21 = vld [vmem:[%s2289_s12 + $0x15c0] sm:$0xff]  ;;  %v952_v22 = vld [vmem:[%s2289_s12 + $0x1430] sm:$0xff] }
 0x15d   : > { %1891 = vmatpush.msrb.mxu2 %v919_v23  ;;  %1910 = vmatpush.msrb.mxu3 %v936_v24  ;;  %v969_v23 = vld [vmem:[%s2289_s12 + $0x14b8] sm:$0xff]  ;;  %v984_v24 = vld [vmem:[%s2289_s12 + $0x1530] sm:$0xff] }
 0x15e   : > { %1852 = vmatpush.msrb.mxu0 %v886_v25  ;;  %1871 = vmatpush.msrb.mxu1 %v903_v29  ;;  %v1001_v25 = vld [vmem:[%s2289_s12 + $0x15b8] sm:$0xff]  ;;  %v951_v29 = vld [vmem:[%s2289_s12 + $0x1428] sm:$0xff] }
 0x15f   : > { %1892 = vmatpush.msrb.mxu2 %v918_v26  ;;  %1911 = vmatpush.msrb.mxu3 %v935_v27  ;;  %v968_v26 = vld [vmem:[%s2289_s12 + $0x14b0] sm:$0xff]  ;;  %v983_v27 = vld [vmem:[%s2289_s12 + $0x1528] sm:$0xff] }
 0x160   : > { %1853 = vmatpush.msrb.mxu0 %v885_v30  ;;  %1872 = vmatpush.msrb.mxu1 %v902_v32  ;;  %v1000_v30 = vld [vmem:[%s2289_s12 + $0x15b0] sm:$0xff]  ;;  %v950_v32 = vld [vmem:[%s2289_s12 + $0x1420] sm:$0xff] }
 0x161   : > { %1893 = vmatpush.msrb.mxu2 %v917_v28  ;;  %1912 = vmatpush.msrb.mxu3 %v934_v34  ;;  %v967_v28 = vld [vmem:[%s2289_s12 + $0x14a8] sm:$0xff]  ;;  %v982_v34 = vld [vmem:[%s2289_s12 + $0x1520] sm:$0xff] }
 0x162   : > { %1854 = vmatpush.msrb.mxu0 %v884_v35  ;;  %1873 = vmatpush.msrb.mxu1 %v901_v36  ;;  %v999_v35 = vld [vmem:[%s2289_s12 + $0x15a8] sm:$0xff]  ;;  %v949_v36 = vld [vmem:[%s2289_s12 + $0x1418] sm:$0xff] }
 0x163   : > { %1894 = vmatpush.msrb.mxu2 %v916_v33  ;;  %1913 = vmatpush.msrb.mxu3 %v933_v31  ;;  %v966_v33 = vld [vmem:[%s2289_s12 + $0x14a0] sm:$0xff]  ;;  %v981_v31 = vld [vmem:[%s2289_s12 + $0x1518] sm:$0xff] }
 0x164   : > { %1855 = vmatpush.msrb.mxu0 %v883_v37  ;;  %1874 = vmatpush.msrb.mxu1 %v900_v38  ;;  %v998_v37 = vld [vmem:[%s2289_s12 + $0x15a0] sm:$0xff]  ;;  %v948_v38 = vld [vmem:[%s2289_s12 + $0x1410] sm:$0xff] }
 0x165   : > { %1895 = vmatpush.msrb.mxu2 %v915_v40  ;;  %1914 = vmatpush.msrb.mxu3 %v932_v41  ;;  %v980_v40 = vld [vmem:[%s2289_s12 + $0x1510] sm:$0xff]  ;;  %v997_v41 = vld [vmem:[%s2289_s12 + $0x1598] sm:$0xff] }
 0x166   : > { %1856 = vmatpush.msrb.mxu0 %v882_v42  ;;  %1875 = vmatpush.msrb.mxu1 %v899_v43  ;;  %v947_v42 = vld [vmem:[%s2289_s12 + $0x1408] sm:$0xff]  ;;  %v964_v43 = vld [vmem:[%s2289_s12 + $0x1490] sm:$0xff] }
 0x167   : > { %1896 = vmatpush.msrb.mxu2 %v914_v44  ;;  %1915 = vmatpush.msrb.mxu3 %v931_v45  ;;  %v979_v44 = vld [vmem:[%s2289_s12 + $0x1508] sm:$0xff]  ;;  %v996_v45 = vld [vmem:[%s2289_s12 + $0x1590] sm:$0xff] }
 0x168   : > { %1857 = vmatmul.f32.vlgmr.msrb.gmra.mxu0 %v1068_v46  ;;  %1897 = vmatmul.f32.vlgmr.msrb.gmra.mxu2 %v1070_v47  ;;  %v946_v46 = vld [vmem:[%s2289_s12 + $0x1400] sm:$0xff]  ;;  %v963_v47 = vld [vmem:[%s2289_s12 + $0x1488] sm:$0xff] }
 0x169   : > { %1921 = vmatpush.msra.mxu0 %v961_v48  ;;  %1961 = vmatpush.msra.mxu2 %v993_v49  ;;  %v978_v48 = vld [vmem:[%s2289_s12 + $0x1500] sm:$0xff]  ;;  %v995_v49 = vld [vmem:[%s2289_s12 + $0x1588] sm:$0xff] }
 0x16a   : > { %1876 = vmatpush.msrb.mxu1 %v898_v50  ;;  %1916 = vmatpush.msrb.mxu3 %v930_v51  ;;  %v1073_v50 = vld.sshfl [vmem:[#allocation1] sm:$0xff pattern:$0x73625140]  ;;  %v1075_v51 = vld.sshfl [vmem:[#allocation1 + $0x10] sm:$0xff pattern:$0x73625140] }
 0x16b   : > { %1877 = vmatmul.f32.vlgmr.msrb.gmra.mxu1 %v1069_v52  ;;  %1917 = vmatmul.f32.vlgmr.msrb.gmra.mxu3 %v1071_v53  ;;  %v962_v52 = vld [vmem:[%s2289_s12 + $0x1480] sm:$0xff] }
 0x16c   : > { %1922 = vmatpush.msra.mxu0 %v960_v54  ;;  %1941 = vmatpush.msra.mxu1 %v977_v55  ;;  %v994_v53 = vld [vmem:[%s2289_s12 + $0x1580] sm:$0xff]  ;;  %v1074_v54 = vld.sshfl [vmem:[#allocation1 + $0x8] sm:$0xff pattern:$0x73625140] }
 0x16d   : > { %1962 = vmatpush.msra.mxu2 %v992_v56  ;;  %1981 = vmatpush.msra.mxu3 %v1009_v57  ;;  %v1076_v55 = vld.sshfl [vmem:[#allocation1 + $0x18] sm:$0xff pattern:$0x73625140]  ;;  %v1158_v56 = vpop.f32.mrf.mxu1  ;;  %v1138_v57 = vpop.f32.mrf.mxu0 }
 0x16e   : > { %1923 = vmatpush.msra.mxu0 %v959_v58  ;;  %1942 = vmatpush.msra.mxu1 %v976_v59  ;;  %v1159_v58 = vadd.f32 %v1158_v56, %v1138_v57  ;;  %v1178_v59 = vpop.f32.mrf.mxu2 }
 0x16f   : > { %1963 = vmatpush.msra.mxu2 %v991_v60  ;;  %1982 = vmatpush.msra.mxu3 %v1008_v61  ;;  %v1198_v61 = vpop.f32.mrf.mxu3 }
 0x170   : > { %1924 = vmatpush.msra.mxu0 %v958_v62  ;;  %1943 = vmatpush.msra.mxu1 %v975_v63  ;;  %v1179_v60 = vadd.f32 %v1178_v59, %v1159_v58 }
 0x171   : > { %1964 = vmatpush.msra.mxu2 %v990_v0  ;;  %1983 = vmatpush.msra.mxu3 %v1007_v1 }
 0x172   : > { %1925 = vmatpush.msra.mxu0 %v957_v2  ;;  %1944 = vmatpush.msra.mxu1 %v974_v3  ;;  %v1199_v62 = vadd.f32 %v1198_v61, %v1179_v60 }
 0x173   : > { %1965 = vmatpush.msra.mxu2 %v989_v4  ;;  %1984 = vmatpush.msra.mxu3 %v1006_v5 }
 0x174   : > { %1926 = vmatpush.msra.mxu0 %v956_v6  ;;  %1945 = vmatpush.msra.mxu1 %v973_v7 }
 0x175   : > { %1966 = vmatpush.msra.mxu2 %v988_v8  ;;  %1985 = vmatpush.msra.mxu3 %v1005_v9  ;;  %v1218_v63 = vpop.f32.mrf.mxu0  ;;  %v1238_v1 = vpop.f32.mrf.mxu1 }
 0x176   : > { %1927 = vmatpush.msra.mxu0 %v955_v10  ;;  %1946 = vmatpush.msra.mxu1 %v972_v11  ;;  %v1219_v0 = vadd.f32 %v1218_v63, %v1199_v62  ;;  %v1258_v3 = vpop.f32.mrf.mxu2 }
 0x177   : > { %1967 = vmatpush.msra.mxu2 %v987_v12  ;;  %1986 = vmatpush.msra.mxu3 %v1004_v13  ;;  %v1278_v5 = vpop.f32.mrf.mxu3 }
 0x178   : > { %1928 = vmatpush.msra.mxu0 %v954_v14  ;;  %1947 = vmatpush.msra.mxu1 %v971_v15  ;;  %v1239_v2 = vadd.f32 %v1238_v1, %v1219_v0 }
 0x179   : > { %1968 = vmatpush.msra.mxu2 %v986_v16  ;;  %1987 = vmatpush.msra.mxu3 %v1003_v17 }
 0x17a   : > { %1929 = vmatpush.msra.mxu0 %v953_v18  ;;  %1948 = vmatpush.msra.mxu1 %v970_v19  ;;  %v1259_v4 = vadd.f32 %v1258_v3, %v1239_v2 }
 0x17b   : > { %1969 = vmatpush.msra.mxu2 %v985_v20  ;;  %1988 = vmatpush.msra.mxu3 %v1002_v21 }
 0x17c   : > { %1930 = vmatpush.msra.mxu0 %v952_v22  ;;  %1949 = vmatpush.msra.mxu1 %v969_v23  ;;  %v1279_v7 = vadd.f32 %v1278_v5, %v1259_v4 }
 0x17d   : > { %1970 = vmatpush.msra.mxu2 %v984_v24  ;;  %1989 = vmatpush.msra.mxu3 %v1001_v25  ;;  %v1298_v6 = vpop.f32.mrf.mxu0  ;;  %v1318_v9 = vpop.f32.mrf.mxu1 }
 0x17e   : > { %1931 = vmatpush.msra.mxu0 %v951_v29  ;;  %1950 = vmatpush.msra.mxu1 %v968_v26  ;;  %v1299_v8 = vadd.f32 %v1298_v6, %v1279_v7  ;;  %v1338_v10 = vpop.f32.mrf.mxu2 }
 0x17f   : > { %1971 = vmatpush.msra.mxu2 %v983_v27  ;;  %1990 = vmatpush.msra.mxu3 %v1000_v30  ;;  %v1358_v13 = vpop.f32.mrf.mxu3 }
 0x180   : > { %1932 = vmatpush.msra.mxu0 %v950_v32  ;;  %1951 = vmatpush.msra.mxu1 %v967_v28  ;;  %v1319_v11 = vadd.f32 %v1318_v9, %v1299_v8 }
 0x181   : > { %1972 = vmatpush.msra.mxu2 %v982_v34  ;;  %1991 = vmatpush.msra.mxu3 %v999_v35 }
 0x182   : > { %1933 = vmatpush.msra.mxu0 %v949_v36  ;;  %1952 = vmatpush.msra.mxu1 %v966_v33  ;;  %v1339_v12 = vadd.f32 %v1338_v10, %v1319_v11 }
 0x183   : > { %1973 = vmatpush.msra.mxu2 %v981_v31  ;;  %1992 = vmatpush.msra.mxu3 %v998_v37 }
 0x184   : > { %1934 = vmatpush.msra.mxu0 %v948_v38  ;;  %1953 = vmatpush.msra.mxu1 %v965_v39  ;;  %v1359_v15 = vadd.f32 %v1358_v13, %v1339_v12  ;;  %v294_v13 = vld [vmem:[#allocation2] sm:$0x3] }
 0x185   : > { %1974 = vmatpush.msra.mxu2 %v980_v40  ;;  %1993 = vmatpush.msra.mxu3 %v997_v41  ;;  %v1378_v14 = vpop.f32.mrf.mxu0  ;;  %v1398_v17 = vpop.f32.mrf.mxu1 }
 0x186   : > { %1935 = vmatpush.msra.mxu0 %v947_v42  ;;  %1954 = vmatpush.msra.mxu1 %v964_v43  ;;  %v1379_v16 = vadd.f32 %v1378_v14, %v1359_v15  ;;  %v1418_v18 = vpop.f32.mrf.mxu2 }
 0x187   : > { %1975 = vmatpush.msra.mxu2 %v979_v44  ;;  %1994 = vmatpush.msra.mxu3 %v996_v45  ;;  %v1438_v21 = vpop.f32.mrf.mxu3 }
 0x188   : > { %1936 = vmatpush.msra.mxu0 %v946_v46  ;;  %1955 = vmatpush.msra.mxu1 %v963_v47  ;;  %v1399_v19 = vadd.f32 %v1398_v17, %v1379_v16 }
 0x189   : > { %1976 = vmatpush.msra.mxu2 %v978_v48  ;;  %1995 = vmatpush.msra.mxu3 %v995_v49 }
 0x18a   : > { %1937 = vmatmul.f32.vlgmr.msra.gmra.mxu0 %v1073_v50  ;;  %1977 = vmatmul.f32.vlgmr.msra.gmra.mxu2 %v1075_v51  ;;  %v1419_v20 = vadd.f32 %v1418_v18, %v1399_v19 }
 0x18b   : > { %1956 = vmatpush.msra.mxu1 %v962_v52  ;;  %1996 = vmatpush.msra.mxu3 %v994_v53 }
 0x18c   : > { %1957 = vmatmul.f32.vlgmr.msra.gmra.mxu1 %v1074_v54  ;;  %1997 = vmatmul.f32.vlgmr.msra.gmra.mxu3 %v1076_v55  ;;  %v1439_v23 = vadd.f32 %v1438_v21, %v1419_v20 }
 0x18d   : > { %v1458_v22 = vpop.f32.mrf.mxu0  ;;  %v1478_v25 = vpop.f32.mrf.mxu1 }
 0x18e   : > { %v1459_v24 = vadd.f32 %v1458_v22, %v1439_v23  ;;  %v1498_v29 = vpop.f32.mrf.mxu2 }
 0x18f   : > { %v1518_v30 = vpop.f32.mrf.mxu3 }
 0x190   : > { %v1479_v26 = vadd.f32 %v1478_v25, %v1459_v24 }
 0x192   : > { %v1499_v27 = vadd.f32 %v1498_v29, %v1479_v26 }
 0x194   : > { %v1519_v28 = vadd.f32 %v1518_v30, %v1499_v27 }
 0x195   : > { %v1538_v32 = vpop.f32.mrf.mxu0  ;;  %v1558_v35 = vpop.f32.mrf.mxu1 }
 0x196   : > { %v1539_v34 = vadd.f32 %v1538_v32, %v1519_v28  ;;  %v1578_v36 = vpop.f32.mrf.mxu2 }
 0x197   : > { %v1598_v37 = vpop.f32.mrf.mxu3 }
 0x198   : > { %v1559_v33 = vadd.f32 %v1558_v35, %v1539_v34 }
 0x19a   : > { %v1579_v31 = vadd.f32 %v1578_v36, %v1559_v33 }
 0x19c   : > { %v1599_v39 = vadd.f32 %v1598_v37, %v1579_v31 }
 0x19d   : > { %v1618_v38 = vpop.f32.mrf.mxu0  ;;  %v1638_v41 = vpop.f32.mrf.mxu1 }
 0x19e   : > { %v1619_v40 = vadd.f32 %v1618_v38, %v1599_v39  ;;  %v1658_v42 = vpop.f32.mrf.mxu2 }
 0x19f   : > { %v1678_v45 = vpop.f32.mrf.mxu3 }
 0x1a0   : > { %v1639_v43 = vadd.f32 %v1638_v41, %v1619_v40 }
 0x1a2   : > { %v1659_v44 = vadd.f32 %v1658_v42, %v1639_v43 }
 0x1a4   : > { %v1679_v47 = vadd.f32 %v1678_v45, %v1659_v44 }
 0x1a5   : > { %v1698_v46 = vpop.f32.mrf.mxu0  ;;  %v1718_v49 = vpop.f32.mrf.mxu1 }
 0x1a6   : > { %v1699_v48 = vadd.f32 %v1698_v46, %v1679_v47 }
 0x1a7   : > { %v1738_v50 = vpop.f32.mrf.mxu2 }
 0x1a8   : > { %v1719_v51 = vadd.f32 %v1718_v49, %v1699_v48 }
 0x1aa   : > { %v1739_v52 = vadd.f32 %v1738_v50, %v1719_v51  ;;  %v1758_v53 = vpop.f32.mrf.mxu3 }
 0x1ac   : > { %v1759_v55 = vadd.f32 %v1758_v53, %v1739_v52 }
 0x1c3   : > { %v1778_v54 = vpop.f32.mrf.mxu0 }
 0x1c4   : > { %v1779_v56 = vadd.f32 %v1778_v54, %v1759_v55 }
 0x1c6   : > { %v1798_v57 = vpop.f32.mrf.mxu1 }
 0x1c7   : > { %v1799_v59 = vadd.f32 %v1798_v57, %v1779_v56 }
 0x1c9   : > { %v1818_v58 = vpop.f32.mrf.mxu2 }
 0x1ca   : > { %v1819_v60 = vadd.f32 %v1818_v58, %v1799_v59 }
 0x1cc   : > { %v1838_v61 = vpop.f32.mrf.mxu3 }
 0x1cd   : > { %v1839_v63 = vadd.f32 %v1838_v61, %v1819_v60 }
 0x1e5   : > { %v1858_v62 = vpop.f32.mrf.mxu0 }
 0x1e6   : > { %v1859_v0 = vadd.f32 %v1858_v62, %v1839_v63 }
 0x1e8   : > { %v1878_v1 = vpop.f32.mrf.mxu1 }
 0x1e9   : > { %v1879_v3 = vadd.f32 %v1878_v1, %v1859_v0 }
 0x1eb   : > { %v1898_v2 = vpop.f32.mrf.mxu2 }
 0x1ec   : > { %v1899_v4 = vadd.f32 %v1898_v2, %v1879_v3 }
 0x1ee   : > { %v1918_v5 = vpop.f32.mrf.mxu3 }
 0x1ef   : > { %v1919_v6 = vadd.f32 %v1918_v5, %v1899_v4 }
 0x207   : > { %v1938_v7 = vpop.f32.mrf.mxu0 }
 0x208   : > { %v1939_v8 = vadd.f32 %v1938_v7, %v1919_v6 }
 0x209   : > { %v1958_v9 = vpop.f32.mrf.mxu1 }
 0x20a   : > { %v1959_v10 = vadd.f32 %v1958_v9, %v1939_v8 }
 0x20d   : > { %v1978_v11 = vpop.f32.mrf.mxu2 }
 0x20e   : > { %v1979_v12 = vadd.f32 %v1978_v11, %v1959_v10 }
 0x20f   : > { %v1998_v14 = vpop.f32.mrf.mxu3 }
 0x210   : > { %v1999_v15 = vadd.f32 %v1998_v14, %v1979_v12  ;;  %2006 = sbr.rel (%p2163_p6) target bundleno = 824 (0x338), region = 56 }
 0x212   : > { %v2001_v16 = vadd.f32 %v1999_v15, %v294_v13 }
 0x214   : > { %2002 = vst [vmem:[#allocation2] sm:$0x3] %v2001_v16 }
 0x215   : > { %v2029_v17 = vld [vmem:[%s3168_s3 + $0x78] sm:$0xff]  ;;  %v2028_v18 = vld [vmem:[%s3168_s3 + $0x70] sm:$0xff]  ;;  %v2027_v19 = vld [vmem:[%s3168_s3 + $0x68] sm:$0xff] }
 0x216   : > { %2034 = vmatpush.msra.mxu0 %v2029_v17  ;;  %v2026_v20 = vld [vmem:[%s3168_s3 + $0x60] sm:$0xff]  ;;  %v2025_v21 = vld [vmem:[%s3168_s3 + $0x58] sm:$0xff]  ;;  %v2069_v23 = vld [vmem:[%s3170_s5 + $0x70] sm:$0xff] }
 0x217   : > { %v2070_v22 = vld [vmem:[%s3170_s5 + $0x78] sm:$0xff]  ;;  %v2024_v24 = vld [vmem:[%s3168_s3 + $0x50] sm:$0xff]  ;;  %v2068_v25 = vld [vmem:[%s3170_s5 + $0x68] sm:$0xff] }
 0x218   : > { %2035 = vmatpush.msra.mxu0 %v2028_v18  ;;  %2075 = vmatpush.msra.mxu1 %v2070_v22  ;;  %v2023_v29 = vld [vmem:[%s3168_s3 + $0x48] sm:$0xff]  ;;  %v2067_v26 = vld [vmem:[%s3170_s5 + $0x60] sm:$0xff]  ;;  %v2066_v30 = vld [vmem:[%s3170_s5 + $0x58] sm:$0xff] }
 0x219   : > { %v2022_v27 = vld [vmem:[%s3168_s3 + $0x40] sm:$0xff]  ;;  %v2021_v32 = vld [vmem:[%s3168_s3 + $0x38] sm:$0xff]  ;;  %v2065_v28 = vld [vmem:[%s3170_s5 + $0x50] sm:$0xff] }
 0x21a   : > { %2036 = vmatpush.msra.mxu0 %v2027_v19  ;;  %2076 = vmatpush.msra.mxu1 %v2069_v23  ;;  %v2020_v34 = vld [vmem:[%s3168_s3 + $0x30] sm:$0xff]  ;;  %v2064_v35 = vld [vmem:[%s3170_s5 + $0x48] sm:$0xff]  ;;  %v2063_v33 = vld [vmem:[%s3170_s5 + $0x40] sm:$0xff] }
 0x21b   : > { %v2019_v36 = vld [vmem:[%s3168_s3 + $0x28] sm:$0xff]  ;;  %v2018_v31 = vld [vmem:[%s3168_s3 + $0x20] sm:$0xff]  ;;  %v2062_v38 = vld [vmem:[%s3170_s5 + $0x38] sm:$0xff] }
 0x21c   : > { %2037 = vmatpush.msra.mxu0 %v2026_v20  ;;  %2077 = vmatpush.msra.mxu1 %v2068_v25  ;;  %v2184_v37 = vld [vmem:[%s3167_s2] ss:$0 sm:$0xff]  ;;  %v2007_v39 = vld [vmem:[#allocation2] sm:$0x3]  ;;  %v2017_v40 = vld [vmem:[%s3168_s3 + $0x18] sm:$0xff] }
 0x21d   : > { %v2061_v41 = vld [vmem:[%s3170_s5 + $0x30] sm:$0xff]  ;;  %v2012_v43 = vadd.f32 %v2184_v37, %v2007_v39  ;;  %v2060_v44 = vld [vmem:[%s3170_s5 + $0x28] sm:$0xff]  ;;  %v2059_v46 = vld [vmem:[%s3170_s5 + $0x20] sm:$0xff] }
 0x21e   : > { %2038 = vmatpush.msra.mxu0 %v2025_v21  ;;  %2078 = vmatpush.msra.mxu1 %v2067_v26  ;;  %v2016_v42 = vld [vmem:[%s3168_s3 + $0x10] sm:$0xff]  ;;  %v2015_v45 = vld [vmem:[%s3168_s3 + $0x8] sm:$0xff]  ;;  %v2014_v47 = vld [vmem:[%s3168_s3] sm:$0xff] }
 0x21f   : > { %v2013_v48 = vmax.f32 %v2012_v43, 0.0  ;;  %v2058_v49 = vld [vmem:[%s3170_s5 + $0x18] sm:$0xff]  ;;  %v2057_v50 = vld [vmem:[%s3170_s5 + $0x10] sm:$0xff]  ;;  %v2056_v51 = vld [vmem:[%s3170_s5 + $0x8] sm:$0xff] }
 0x220   : > { %2039 = vmatpush.msra.mxu0 %v2024_v24  ;;  %2079 = vmatpush.msra.mxu1 %v2066_v30  ;;  %v2055_v52 = vld [vmem:[%s3170_s5] sm:$0xff] }
 0x221   : > { %v2185_v53 = vld [vmem:[%s3169_s4] ss:$0 sm:$0xff] }
 0x222   : > { %2040 = vmatpush.msra.mxu0 %v2023_v29  ;;  %2080 = vmatpush.msra.mxu1 %v2065_v28  ;;  %v2186_v57 = vld [vmem:[%s3171_s6] ss:$0 sm:$0xff] }
 0x224   : > { %2041 = vmatpush.msra.mxu0 %v2022_v27  ;;  %2081 = vmatpush.msra.mxu1 %v2064_v35 }
 0x226   : > { %2042 = vmatpush.msra.mxu0 %v2021_v32  ;;  %2082 = vmatpush.msra.mxu1 %v2063_v33 }
 0x228   : > { %2043 = vmatpush.msra.mxu0 %v2020_v34  ;;  %2083 = vmatpush.msra.mxu1 %v2062_v38 }
 0x22a   : > { %2044 = vmatpush.msra.mxu0 %v2019_v36  ;;  %2084 = vmatpush.msra.mxu1 %v2061_v41 }
 0x22c   : > { %2045 = vmatpush.msra.mxu0 %v2018_v31  ;;  %2085 = vmatpush.msra.mxu1 %v2060_v44 }
 0x22e   : > { %2046 = vmatpush.msra.mxu0 %v2017_v40  ;;  %2086 = vmatpush.msra.mxu1 %v2059_v46 }
 0x230   : > { %2047 = vmatpush.msra.mxu0 %v2016_v42  ;;  %2087 = vmatpush.msra.mxu1 %v2058_v49 }
 0x232   : > { %2048 = vmatpush.msra.mxu0 %v2015_v45  ;;  %2088 = vmatpush.msra.mxu1 %v2057_v50 }
 0x234   : > { %2049 = vmatpush.msra.mxu0 %v2014_v47  ;;  %2089 = vmatpush.msra.mxu1 %v2056_v51 }
 0x235   : > { %2050 = vmatmul.f32.vlgmr.msra.gmra.mxu0 %v2013_v48 }
 0x236   : > { %2090 = vmatpush.msra.mxu1 %v2055_v52 }
 0x2b2   : > { %v2051_v54 = vpop.f32.mrf.mxu0 }
 0x2b3   : > { %v2052_v55 = vadd.f32 %v2185_v53, %v2051_v54 }
 0x2b5   : > { %v2054_v56 = vmax.f32 %v2052_v55, 0.0 }
 0x2b7   : > { %2091 = vmatmul.f32.vlgmr.msra.gmra.mxu1 %v2054_v56 }
 0x334   : > { %v2092_v58 = vpop.f32.mrf.mxu1 }
 0x335   : > { %v2093_v59 = vadd.f32 %v2186_v57, %v2092_v58 }
 0x337   : > { %2095 = vst [vmem:[#allocation3] sm:$0x3] %v2093_v59 }
 0x338 PF: > { %p2172_p7 = scmp.eq.s32.totalorder %s2275_s25, 7  ;;  %s2228_s20 = smov [#allocation3]  }
 0x339   : > { %s2102_s21 = sshll.u32 %s2228_s20, 4  ;;  %s2104_s26 = sshll.u32 %s3172_s7, 4  ;;  %s2103_s21 = int_to_ptr.vmem [resolvable:$true] %s2102_s21  ;;  %s2105_s26 = int_to_ptr.hbm [resolvable:$true] %s2104_s26 }
 0x33a   : > { %2169 = dma.vmem_to_hbm [thread:$0]  (%p2172_p7), %s2103_s21, 32, %s2105_s26, [#allocation4]  }
 0x33b   : > { %2220 = dma.done.wait (%p2172_p7), [#allocation4], 32  }
 0x33c   : > { %2222 = vsyncadd (%p2172_p7), [#allocation4], 4294967264 }
 0x33d PF: > { %s18_s24 = sadd.s32 1, %s2225_s24  }
 0x33e   : > { %p15_p8 = scmp.ge.s32.totalorder %s18_s24, 10  }
 0x340   :  { %17 = sbr.rel (!%p15_p8) target bundleno = 1 (0x1), region = 87 }
 0x345   :  { %2118 = vsyncpa [#allocation4], 1 }
 0x346   :  { %2120 = vsyncpa [#allocation4 + $0x1], 1 }

</bundles_post_ra>
